<compile_context>
chip_gen: v7x
topology: tpu7x:2x2x1
jax: 0.10.0
libtpu: 0.0.40
codegen_flags: <defaults>
</compile_context>

<pallas_src>
import math

import jax
import jax.numpy as jnp
from jax.experimental import pallas as pl
from jax.experimental.pallas import tpu as pltpu

# ----------------------------- hyperparameters -------------------------------
D_MODEL = 256          # d_model (Mask3D decoder hidden dim)
DIM_FFN = 1024         # dim_feedforward
SEQ_LEN = 8            # L  (number of queries)
BATCH = 1              # bs (PyTorch layout is (L, bs, d_model))
LN_EPS = 1e-5


# ------------------------------- helpers --------------------------------------
def _layernorm(x, g, b, eps=LN_EPS):
    mu = jnp.mean(x, axis=-1, keepdims=True)
    xc = x - mu
    var = jnp.mean(xc * xc, axis=-1, keepdims=True)
    return xc * jax.lax.rsqrt(var + eps) * g + b


def _default_row_tile(tokens: int) -> int:
    """128 rows on v4/v5 (4x128 MXU); 256 on v6e/v7x once there are enough tokens."""
    if tokens < 256:
        return 128
    try:
        kind = jax.devices()[0].device_kind.lower()
    except Exception:  # pragma: no cover - CPU/interpret fallback
        kind = ""
    if "v5" in kind or "v4" in kind:
        return 128
    return 256


# ------------------------------- kernel --------------------------------------
def _make_ffn_kernel(normalize_before: bool, f_chunk: int):
    """Fused FFN block kernel over one (tm, D) tile of tokens.

    Matmuls run bf16 x bf16 -> f32 on the MXU; everything else stays f32.
    The FFN hidden dim is processed in static chunks of `f_chunk` columns so the
    live ReLU intermediate stays small when the row tile is large.
    """

    def kernel(x_ref, w1_ref, b1_ref, w2_ref, b2_ref, g_ref, beta_ref, o_ref):
        x = x_ref[...]                                   # (tm, D)  f32
        g = g_ref[...]                                   # (1, D)   f32 (hoisted)
        beta = beta_ref[...]                             # (1, D)   f32 (hoisted)
        b2 = b2_ref[...]                                 # (1, D)   f32 (hoisted)

        ff_in = _layernorm(x, g, beta) if normalize_before else x
        ff_in_bf = ff_in.astype(jnp.bfloat16)            # MXU operand

        tm, D = x.shape
        F = w1_ref.shape[1]
        n_chunks = F // f_chunk

        t2 = jnp.zeros((tm, D), jnp.float32)
        for c in range(n_chunks):                        # static, fully unrolled
            f0 = c * f_chunk
            w1c = w1_ref[:, f0:f0 + f_chunk]             # (D, tf)  bf16
            b1c = b1_ref[:, f0:f0 + f_chunk]             # (1, tf)  f32
            h = jnp.dot(ff_in_bf, w1c,
                        preferred_element_type=jnp.float32) + b1c
            h = jnp.maximum(h, 0.0).astype(jnp.bfloat16)  # relu, bf16 MXU operand
            w2c = w2_ref[f0:f0 + f_chunk, :]             # (tf, D)  bf16
            t2 = t2 + jnp.dot(h, w2c, preferred_element_type=jnp.float32)

        y = x + t2 + b2                                  # residual (+ linear2 bias)
        if not normalize_before:
            y = _layernorm(y, g, beta)
        o_ref[...] = y.astype(o_ref.dtype)

    return kernel


# ------------------------------- wrapper --------------------------------------
def _build_ffn_call(padded, tm, D, F, normalize_before, f_chunk,
                    single_buffer_weights):
    kernel = _make_ffn_kernel(normalize_before, f_chunk)
    const = lambda i: (0, 0)

    def wspec(shape):
        # Constant-index blocks never change across grid steps -> single buffer.
        if single_buffer_weights:
            return pl.BlockSpec(shape, const, pipeline_mode=pl.Buffered(1))
        return pl.BlockSpec(shape, const)

    return pl.pallas_call(
        kernel,
        out_shape=jax.ShapeDtypeStruct((padded, D), jnp.float32),
        grid_spec=pltpu.PrefetchScalarGridSpec(
            num_scalar_prefetch=0,
            grid=(padded // tm,),
            in_specs=[
                pl.BlockSpec((tm, D), lambda i: (i, 0)),   # x tile
                wspec((D, F)),                             # W1^T   (bf16)
                wspec((1, F)),                             # b1     (f32)
                wspec((F, D)),                             # W2^T   (bf16)
                wspec((1, D)),                             # b2     (f32)
                wspec((1, D)),                             # LN gamma
                wspec((1, D)),                             # LN beta
            ],
            out_specs=pl.BlockSpec((tm, D), lambda i: (i, 0)),
        ),
        compiler_params=pltpu.CompilerParams(
            dimension_semantics=("parallel",)),
    )


def ffn_layer_forward(tgt, params, *, normalize_before=False,
                      row_tile=None, f_chunk=None):
    """FFNLayer.forward (dropout == 0).

    tgt: (L, bs, d_model) float32, PyTorch sequence-first layout.
    """
    L, bs, D = tgt.shape
    F = params['w1_t'].shape[1]
    x = tgt.reshape(L * bs, D).astype(jnp.float32)

    tokens = L * bs
    if row_tile is None:
        row_tile = _default_row_tile(tokens)
    tm = min(row_tile, max(8, int(pl.next_power_of_2(tokens))))   # multiple of 8
    padded = pl.cdiv(tokens, tm) * tm
    if padded != tokens:
        x = jnp.pad(x, ((0, padded - tokens), (0, 0)))

    # Chunk the FFN hidden dim only when the row tile is large enough that the
    # (tm, F) intermediate would spill through VMEM.
    if f_chunk is None:
        f_chunk = F if tm < 256 else min(F, 512)
    assert F % f_chunk == 0, "f_chunk must divide dim_feedforward"

    # bf16 weights for the MXU (halves HBM bytes on the dominant DMA path);
    # biases / LN params stay f32.
    args = (
        x,
        params['w1_t'].astype(jnp.bfloat16),
        params['b1'].astype(jnp.float32),
        params['w2_t'].astype(jnp.bfloat16),
        params['b2'].astype(jnp.float32),
        params['ln_g'].astype(jnp.float32),
        params['ln_b'].astype(jnp.float32),
    )

    try:
        out = _build_ffn_call(padded, tm, D, F, normalize_before, f_chunk,
                              single_buffer_weights=True)(*args)
    except Exception:
        # Older jaxlibs may reject pipeline_mode / buffer_count=1 — fall back to
        # the default (double-buffered) pipelining; numerics are identical.
        out = _build_ffn_call(padded, tm, D, F, normalize_before, f_chunk,
                              single_buffer_weights=False)(*args)

    return out[:tokens].reshape(L, bs, D)


# ------------------------------ reference --------------------------------------
def ffn_layer_reference(tgt, params, *, normalize_before=False):
    """Pure-JAX f32 reference (weights up-cast from their stored dtype)."""
    x = tgt.astype(jnp.float32)
    w1 = params['w1_t'].astype(jnp.float32)
    w2 = params['w2_t'].astype(jnp.float32)

    def ln(v):
        mu = jnp.mean(v, axis=-1, keepdims=True)
        var = jnp.mean((v - mu) ** 2, axis=-1, keepdims=True)
        return ((v - mu) / jnp.sqrt(var + LN_EPS)) * params['ln_g'][0] + params['ln_b'][0]

    ff_in = ln(x) if normalize_before else x
    h = jnp.maximum(ff_in @ w1 + params['b1'][0], 0.0)
    t2 = h @ w2 + params['b2'][0]
    y = x + t2
    return ln(y) if not normalize_before else y


# ------------------------------ parameters --------------------------------------
def init_params(key, d_model=D_MODEL, dim_ffn=DIM_FFN):
    k1, k2, k3, k4 = jax.random.split(key, 4)

    def xavier(k, shape):  # (out, in) as in nn.Linear.weight
        limit = math.sqrt(6.0 / (shape[0] + shape[1]))
        return jax.random.uniform(k, shape, jnp.float32, -limit, limit)

    w1 = xavier(k1, (dim_ffn, d_model))         # linear1.weight
    w2 = xavier(k2, (d_model, dim_ffn))         # linear2.weight
    # nn.Linear biases keep default uniform init (xavier reset only touches dim>1)
    b1 = jax.random.uniform(k3, (1, dim_ffn), jnp.float32,
                            -1.0 / math.sqrt(d_model), 1.0 / math.sqrt(d_model))
    b2 = jax.random.uniform(k4, (1, d_model), jnp.float32,
                            -1.0 / math.sqrt(dim_ffn), 1.0 / math.sqrt(dim_ffn))
    return {
        # pre-transposed, stored bf16: kernel does x @ W^T on the MXU
        'w1_t': w1.T.astype(jnp.bfloat16), 'b1': b1,
        'w2_t': w2.T.astype(jnp.bfloat16), 'b2': b2,
        'ln_g': jnp.ones((1, d_model), jnp.float32),
        'ln_b': jnp.zeros((1, d_model), jnp.float32),
    }


# --------------------------------- main ------------------------------------------
if __name__ == "__main__":
    key = jax.random.PRNGKey(0)
    kp, kx = jax.random.split(key)
    params = init_params(kp)

    tgt = jax.random.normal(kx, (SEQ_LEN, BATCH, D_MODEL), jnp.float32)

    # forward_post (normalize_before=False, the module default)
    out_post = ffn_layer_forward(tgt, params, normalize_before=False)
    out_post = jax.block_until_ready(out_post)
    ref_post = ffn_layer_reference(tgt.reshape(-1, D_MODEL), params,
                                   normalize_before=False).reshape(tgt.shape)

    # forward_pre (normalize_before=True) — same kernel, pre-norm variant
    out_pre = ffn_layer_forward(tgt, params, normalize_before=True)
    out_pre = jax.block_until_ready(out_pre)
    ref_pre = ffn_layer_reference(tgt.reshape(-1, D_MODEL), params,
                                  normalize_before=True).reshape(tgt.shape)

    assert out_post.shape == (SEQ_LEN, BATCH, D_MODEL)
    # bf16 MXU operands (f32 accumulation): loosened tolerance vs the f32 reference.
    assert jnp.allclose(out_post, ref_post, atol=3e-2, rtol=3e-2), \
        float(jnp.max(jnp.abs(out_post - ref_post)))
    assert jnp.allclose(out_pre, ref_pre, atol=3e-2, rtol=3e-2), \
        float(jnp.max(jnp.abs(out_pre - ref_pre)))

    print("KERNEL_OK")
</pallas_src>

<mosaic_0001>
module attributes {stable_mosaic.version = 11 : i64} {
  func.func @kernel(%arg0: i32, %arg1: memref<8x256xf32, #tpu.memory_space<vmem>>, %arg2: memref<256x1024xbf16, #tpu.memory_space<vmem>>, %arg3: memref<1x1024xf32, #tpu.memory_space<vmem>>, %arg4: memref<1024x256xbf16, #tpu.memory_space<vmem>>, %arg5: memref<1x256xf32, #tpu.memory_space<vmem>>, %arg6: memref<1x256xf32, #tpu.memory_space<vmem>>, %arg7: memref<1x256xf32, #tpu.memory_space<vmem>>, %arg8: memref<8x256xf32, #tpu.memory_space<vmem>>) attributes {dimension_semantics = [#tpu.dimension_semantics<parallel>], iteration_bounds = array<i64: 1>, scalar_prefetch = 0 : i64, scratch_operands = 0 : i64, tpu.core_type = #tpu.core_type<tc>, window_params = [{transform_indices = @transform_0, window_bounds = array<i64: 8, 256>}, {pipeline_mode = #tpu.pipeline_mode<synchronous>, transform_indices = @transform_1, window_bounds = array<i64: 256, 1024>}, {pipeline_mode = #tpu.pipeline_mode<synchronous>, transform_indices = @transform_2, window_bounds = array<i64: 1, 1024>}, {pipeline_mode = #tpu.pipeline_mode<synchronous>, transform_indices = @transform_3, window_bounds = array<i64: 1024, 256>}, {pipeline_mode = #tpu.pipeline_mode<synchronous>, transform_indices = @transform_4, window_bounds = array<i64: 1, 256>}, {pipeline_mode = #tpu.pipeline_mode<synchronous>, transform_indices = @transform_5, window_bounds = array<i64: 1, 256>}, {pipeline_mode = #tpu.pipeline_mode<synchronous>, transform_indices = @transform_6, window_bounds = array<i64: 1, 256>}, {transform_indices = @transform_7, window_bounds = array<i64: 8, 256>}]} {
    %c0 = arith.constant 0 : index
    %c0_0 = arith.constant 0 : index
    %0 = vector.load %arg1[%c0, %c0_0] : memref<8x256xf32, #tpu.memory_space<vmem>>, vector<8x256xf32>
    %c0_1 = arith.constant 0 : index
    %c0_2 = arith.constant 0 : index
    %1 = vector.load %arg6[%c0_1, %c0_2] : memref<1x256xf32, #tpu.memory_space<vmem>>, vector<1x256xf32>
    %c0_3 = arith.constant 0 : index
    %c0_4 = arith.constant 0 : index
    %2 = vector.load %arg7[%c0_3, %c0_4] : memref<1x256xf32, #tpu.memory_space<vmem>>, vector<1x256xf32>
    %c0_5 = arith.constant 0 : index
    %c0_6 = arith.constant 0 : index
    %3 = vector.load %arg5[%c0_5, %c0_6] : memref<1x256xf32, #tpu.memory_space<vmem>>, vector<1x256xf32>
    %4 = arith.truncf %0 : vector<8x256xf32> to vector<8x256xbf16>
    %cst = arith.constant 0.000000e+00 : f32
    %5 = vector.broadcast %cst : f32 to vector<8x256xf32>
    %c0_7 = arith.constant 0 : index
    %c0_8 = arith.constant 0 : index
    %6 = vector.load %arg2[%c0_7, %c0_8] : memref<256x1024xbf16, #tpu.memory_space<vmem>>, vector<256x1024xbf16>
    %c0_9 = arith.constant 0 : index
    %c0_10 = arith.constant 0 : index
    %7 = vector.load %arg3[%c0_9, %c0_10] : memref<1x1024xf32, #tpu.memory_space<vmem>>, vector<1x1024xf32>
    %cst_11 = arith.constant dense<0.000000e+00> : vector<8x1024xf32>
    %8 = tpu.matmul %4, %6, %cst_11 {dimension_numbers = #tpu.dot_dimension_numbers<[1], [0], [0], [1], [0, 0, 1, 1], [], []>} : vector<8x256xbf16>, vector<256x1024xbf16>, vector<8x1024xf32> -> vector<8x1024xf32>
    %9 = vector.broadcast %7 : vector<1x1024xf32> to vector<8x1024xf32>
    %10 = arith.addf %8, %9 : vector<8x1024xf32>
    %cst_12 = arith.constant 0.000000e+00 : f32
    %11 = vector.broadcast %cst_12 : f32 to vector<8x1024xf32>
    %12 = arith.maximumf %10, %11 : vector<8x1024xf32>
    %13 = arith.truncf %12 : vector<8x1024xf32> to vector<8x1024xbf16>
    %c0_13 = arith.constant 0 : index
    %c0_14 = arith.constant 0 : index
    %14 = vector.load %arg4[%c0_13, %c0_14] : memref<1024x256xbf16, #tpu.memory_space<vmem>>, vector<1024x256xbf16>
    %cst_15 = arith.constant dense<0.000000e+00> : vector<8x256xf32>
    %15 = tpu.matmul %13, %14, %cst_15 {dimension_numbers = #tpu.dot_dimension_numbers<[1], [0], [0], [1], [0, 0, 1, 1], [], []>} : vector<8x1024xbf16>, vector<1024x256xbf16>, vector<8x256xf32> -> vector<8x256xf32>
    %16 = arith.addf %5, %15 : vector<8x256xf32>
    %17 = arith.addf %0, %16 : vector<8x256xf32>
    %18 = vector.broadcast %3 : vector<1x256xf32> to vector<8x256xf32>
    %19 = arith.addf %17, %18 : vector<8x256xf32>
    %cst_16 = arith.constant dense<0.000000e+00> : vector<8xf32>
    %20 = vector.multi_reduction <add>, %19, %cst_16 [1] : vector<8x256xf32> to vector<8xf32>
    %21 = vector.shape_cast %20 : vector<8xf32> to vector<8x1xf32>
    %cst_17 = arith.constant 2.560000e+02 : f32
    %22 = vector.broadcast %cst_17 : f32 to vector<8x1xf32>
    %23 = arith.divf %21, %22 : vector<8x1xf32>
    %24 = vector.broadcast %23 : vector<8x1xf32> to vector<8x256xf32>
    %25 = arith.subf %19, %24 : vector<8x256xf32>
    %26 = arith.mulf %25, %25 : vector<8x256xf32>
    %cst_18 = arith.constant dense<0.000000e+00> : vector<8xf32>
    %27 = vector.multi_reduction <add>, %26, %cst_18 [1] : vector<8x256xf32> to vector<8xf32>
    %28 = vector.shape_cast %27 : vector<8xf32> to vector<8x1xf32>
    %cst_19 = arith.constant 2.560000e+02 : f32
    %29 = vector.broadcast %cst_19 : f32 to vector<8x1xf32>
    %30 = arith.divf %28, %29 : vector<8x1xf32>
    %cst_20 = arith.constant 9.99999974E-6 : f32
    %31 = vector.broadcast %cst_20 : f32 to vector<8x1xf32>
    %32 = arith.addf %30, %31 : vector<8x1xf32>
    %33 = math.rsqrt %32 : vector<8x1xf32>
    %34 = vector.broadcast %33 : vector<8x1xf32> to vector<8x256xf32>
    %35 = arith.mulf %25, %34 : vector<8x256xf32>
    %36 = vector.broadcast %1 : vector<1x256xf32> to vector<8x256xf32>
    %37 = arith.mulf %35, %36 : vector<8x256xf32>
    %38 = vector.broadcast %2 : vector<1x256xf32> to vector<8x256xf32>
    %39 = arith.addf %37, %38 : vector<8x256xf32>
    %c0_21 = arith.constant 0 : index
    %c0_22 = arith.constant 0 : index
    %40 = vector.load %arg8[%c0_21, %c0_22] : memref<8x256xf32, #tpu.memory_space<vmem>>, vector<8x256xf32>
    tpu.vector_store %arg8[%c0_21, %c0_22], %39 {strides = array<i32>} : memref<8x256xf32, #tpu.memory_space<vmem>>, vector<8x256xf32>,
    return
  }
  func.func @transform_0(%arg0: i32) -> (i32, i32) {
    %c0_i32 = arith.constant 0 : i32
    %c0_i32_0 = arith.constant 0 : i32
    return %arg0, %c0_i32 : i32, i32
  }
  func.func @transform_1(%arg0: i32) -> (i32, i32) {
    %c0_i32 = arith.constant 0 : i32
    %c0_i32_0 = arith.constant 0 : i32
    %c0_i32_1 = arith.constant 0 : i32
    return %c0_i32, %c0_i32_0 : i32, i32
  }
  func.func @transform_2(%arg0: i32) -> (i32, i32) {
    %c0_i32 = arith.constant 0 : i32
    %c0_i32_0 = arith.constant 0 : i32
    %c0_i32_1 = arith.constant 0 : i32
    return %c0_i32, %c0_i32_0 : i32, i32
  }
  func.func @transform_3(%arg0: i32) -> (i32, i32) {
    %c0_i32 = arith.constant 0 : i32
    %c0_i32_0 = arith.constant 0 : i32
    %c0_i32_1 = arith.constant 0 : i32
    return %c0_i32, %c0_i32_0 : i32, i32
  }
  func.func @transform_4(%arg0: i32) -> (i32, i32) {
    %c0_i32 = arith.constant 0 : i32
    %c0_i32_0 = arith.constant 0 : i32
    %c0_i32_1 = arith.constant 0 : i32
    return %c0_i32, %c0_i32_0 : i32, i32
  }
  func.func @transform_5(%arg0: i32) -> (i32, i32) {
    %c0_i32 = arith.constant 0 : i32
    %c0_i32_0 = arith.constant 0 : i32
    %c0_i32_1 = arith.constant 0 : i32
    return %c0_i32, %c0_i32_0 : i32, i32
  }
  func.func @transform_6(%arg0: i32) -> (i32, i32) {
    %c0_i32 = arith.constant 0 : i32
    %c0_i32_0 = arith.constant 0 : i32
    %c0_i32_1 = arith.constant 0 : i32
    return %c0_i32, %c0_i32_0 : i32, i32
  }
  func.func @transform_7(%arg0: i32) -> (i32, i32) {
    %c0_i32 = arith.constant 0 : i32
    %c0_i32_0 = arith.constant 0 : i32
    return %arg0, %c0_i32 : i32, i32
  }
}

module attributes {stable_mosaic.version = 11 : i64} {
  func.func @kernel(%arg0: i32, %arg1: memref<8x256xf32, #tpu.memory_space<vmem>>, %arg2: memref<256x1024xbf16, #tpu.memory_space<vmem>>, %arg3: memref<1x1024xf32, #tpu.memory_space<vmem>>, %arg4: memref<1024x256xbf16, #tpu.memory_space<vmem>>, %arg5: memref<1x256xf32, #tpu.memory_space<vmem>>, %arg6: memref<1x256xf32, #tpu.memory_space<vmem>>, %arg7: memref<1x256xf32, #tpu.memory_space<vmem>>, %arg8: memref<8x256xf32, #tpu.memory_space<vmem>>) attributes {dimension_semantics = [#tpu.dimension_semantics<parallel>], iteration_bounds = array<i64: 1>, scalar_prefetch = 0 : i64, scratch_operands = 0 : i64, tpu.core_type = #tpu.core_type<tc>, window_params = [{transform_indices = @transform_0, window_bounds = array<i64: 8, 256>}, {pipeline_mode = #tpu.pipeline_mode<synchronous>, transform_indices = @transform_1, window_bounds = array<i64: 256, 1024>}, {pipeline_mode = #tpu.pipeline_mode<synchronous>, transform_indices = @transform_2, window_bounds = array<i64: 1, 1024>}, {pipeline_mode = #tpu.pipeline_mode<synchronous>, transform_indices = @transform_3, window_bounds = array<i64: 1024, 256>}, {pipeline_mode = #tpu.pipeline_mode<synchronous>, transform_indices = @transform_4, window_bounds = array<i64: 1, 256>}, {pipeline_mode = #tpu.pipeline_mode<synchronous>, transform_indices = @transform_5, window_bounds = array<i64: 1, 256>}, {pipeline_mode = #tpu.pipeline_mode<synchronous>, transform_indices = @transform_6, window_bounds = array<i64: 1, 256>}, {transform_indices = @transform_7, window_bounds = array<i64: 8, 256>}]} {
    %c0 = arith.constant 0 : index
    %c0_0 = arith.constant 0 : index
    %0 = vector.load %arg1[%c0, %c0_0] : memref<8x256xf32, #tpu.memory_space<vmem>>, vector<8x256xf32>
    %c0_1 = arith.constant 0 : index
    %c0_2 = arith.constant 0 : index
    %1 = vector.load %arg6[%c0_1, %c0_2] : memref<1x256xf32, #tpu.memory_space<vmem>>, vector<1x256xf32>
    %c0_3 = arith.constant 0 : index
    %c0_4 = arith.constant 0 : index
    %2 = vector.load %arg7[%c0_3, %c0_4] : memref<1x256xf32, #tpu.memory_space<vmem>>, vector<1x256xf32>
    %c0_5 = arith.constant 0 : index
    %c0_6 = arith.constant 0 : index
    %3 = vector.load %arg5[%c0_5, %c0_6] : memref<1x256xf32, #tpu.memory_space<vmem>>, vector<1x256xf32>
    %4 = arith.truncf %0 : vector<8x256xf32> to vector<8x256xbf16>
    %cst = arith.constant 0.000000e+00 : f32
    %5 = vector.broadcast %cst : f32 to vector<8x256xf32>
    %c0_7 = arith.constant 0 : index
    %c0_8 = arith.constant 0 : index
    %6 = vector.load %arg2[%c0_7, %c0_8] : memref<256x1024xbf16, #tpu.memory_space<vmem>>, vector<256x1024xbf16>
    %c0_9 = arith.constant 0 : index
    %c0_10 = arith.constant 0 : index
    %7 = vector.load %arg3[%c0_9, %c0_10] : memref<1x1024xf32, #tpu.memory_space<vmem>>, vector<1x1024xf32>
    %cst_11 = arith.constant dense<0.000000e+00> : vector<8x1024xf32>
    %8 = tpu.matmul %4, %6, %cst_11 {dimension_numbers = #tpu.dot_dimension_numbers<[1], [0], [0], [1], [0, 0, 1, 1], [], []>} : vector<8x256xbf16>, vector<256x1024xbf16>, vector<8x1024xf32> -> vector<8x1024xf32>
    %9 = vector.broadcast %7 : vector<1x1024xf32> to vector<8x1024xf32>
    %10 = arith.addf %8, %9 : vector<8x1024xf32>
    %cst_12 = arith.constant 0.000000e+00 : f32
    %11 = vector.broadcast %cst_12 : f32 to vector<8x1024xf32>
    %12 = arith.maximumf %10, %11 : vector<8x1024xf32>
    %13 = arith.truncf %12 : vector<8x1024xf32> to vector<8x1024xbf16>
    %c0_13 = arith.constant 0 : index
    %c0_14 = arith.constant 0 : index
    %14 = vector.load %arg4[%c0_13, %c0_14] : memref<1024x256xbf16, #tpu.memory_space<vmem>>, vector<1024x256xbf16>
    %cst_15 = arith.constant dense<0.000000e+00> : vector<8x256xf32>
    %15 = tpu.matmul %13, %14, %cst_15 {dimension_numbers = #tpu.dot_dimension_numbers<[1], [0], [0], [1], [0, 0, 1, 1], [], []>} : vector<8x1024xbf16>, vector<1024x256xbf16>, vector<8x256xf32> -> vector<8x256xf32>
    %16 = arith.addf %5, %15 : vector<8x256xf32>
    %17 = arith.addf %0, %16 : vector<8x256xf32>
    %18 = vector.broadcast %3 : vector<1x256xf32> to vector<8x256xf32>
    %19 = arith.addf %17, %18 : vector<8x256xf32>
    %cst_16 = arith.constant dense<0.000000e+00> : vector<8xf32>
    %20 = vector.multi_reduction <add>, %19, %cst_16 [1] : vector<8x256xf32> to vector<8xf32>
    %21 = vector.shape_cast %20 : vector<8xf32> to vector<8x1xf32>
    %cst_17 = arith.constant 2.560000e+02 : f32
    %22 = vector.broadcast %cst_17 : f32 to vector<8x1xf32>
    %23 = arith.divf %21, %22 : vector<8x1xf32>
    %24 = vector.broadcast %23 : vector<8x1xf32> to vector<8x256xf32>
    %25 = arith.subf %19, %24 : vector<8x256xf32>
    %26 = arith.mulf %25, %25 : vector<8x256xf32>
    %cst_18 = arith.constant dense<0.000000e+00> : vector<8xf32>
    %27 = vector.multi_reduction <add>, %26, %cst_18 [1] : vector<8x256xf32> to vector<8xf32>
    %28 = vector.shape_cast %27 : vector<8xf32> to vector<8x1xf32>
    %cst_19 = arith.constant 2.560000e+02 : f32
    %29 = vector.broadcast %cst_19 : f32 to vector<8x1xf32>
    %30 = arith.divf %28, %29 : vector<8x1xf32>
    %cst_20 = arith.constant 9.99999974E-6 : f32
    %31 = vector.broadcast %cst_20 : f32 to vector<8x1xf32>
    %32 = arith.addf %30, %31 : vector<8x1xf32>
    %33 = math.rsqrt %32 : vector<8x1xf32>
    %34 = vector.broadcast %33 : vector<8x1xf32> to vector<8x256xf32>
    %35 = arith.mulf %25, %34 : vector<8x256xf32>
    %36 = vector.broadcast %1 : vector<1x256xf32> to vector<8x256xf32>
    %37 = arith.mulf %35, %36 : vector<8x256xf32>
    %38 = vector.broadcast %2 : vector<1x256xf32> to vector<8x256xf32>
    %39 = arith.addf %37, %38 : vector<8x256xf32>
    %c0_21 = arith.constant 0 : index
    %c0_22 = arith.constant 0 : index
    %40 = vector.load %arg8[%c0_21, %c0_22] : memref<8x256xf32, #tpu.memory_space<vmem>>, vector<8x256xf32>
    tpu.vector_store %arg8[%c0_21, %c0_22], %39 {strides = array<i32>} : memref<8x256xf32, #tpu.memory_space<vmem>>, vector<8x256xf32>,
    return
  }
  func.func @transform_0(%arg0: i32) -> (i32, i32) {
    %c0_i32 = arith.constant 0 : i32
    %c0_i32_0 = arith.constant 0 : i32
    return %arg0, %c0_i32 : i32, i32
  }
  func.func @transform_1(%arg0: i32) -> (i32, i32) {
    %c0_i32 = arith.constant 0 : i32
    %c0_i32_0 = arith.constant 0 : i32
    %c0_i32_1 = arith.constant 0 : i32
    return %c0_i32, %c0_i32_0 : i32, i32
  }
  func.func @transform_2(%arg0: i32) -> (i32, i32) {
    %c0_i32 = arith.constant 0 : i32
    %c0_i32_0 = arith.constant 0 : i32
    %c0_i32_1 = arith.constant 0 : i32
    return %c0_i32, %c0_i32_0 : i32, i32
  }
  func.func @transform_3(%arg0: i32) -> (i32, i32) {
    %c0_i32 = arith.constant 0 : i32
    %c0_i32_0 = arith.constant 0 : i32
    %c0_i32_1 = arith.constant 0 : i32
    return %c0_i32, %c0_i32_0 : i32, i32
  }
  func.func @transform_4(%arg0: i32) -> (i32, i32) {
    %c0_i32 = arith.constant 0 : i32
    %c0_i32_0 = arith.constant 0 : i32
    %c0_i32_1 = arith.constant 0 : i32
    return %c0_i32, %c0_i32_0 : i32, i32
  }
  func.func @transform_5(%arg0: i32) -> (i32, i32) {
    %c0_i32 = arith.constant 0 : i32
    %c0_i32_0 = arith.constant 0 : i32
    %c0_i32_1 = arith.constant 0 : i32
    return %c0_i32, %c0_i32_0 : i32, i32
  }
  func.func @transform_6(%arg0: i32) -> (i32, i32) {
    %c0_i32 = arith.constant 0 : i32
    %c0_i32_0 = arith.constant 0 : i32
    %c0_i32_1 = arith.constant 0 : i32
    return %c0_i32, %c0_i32_0 : i32, i32
  }
  func.func @transform_7(%arg0: i32) -> (i32, i32) {
    %c0_i32 = arith.constant 0 : i32
    %c0_i32_0 = arith.constant 0 : i32
    return %arg0, %c0_i32 : i32, i32
  }
}

</mosaic_0001>

<bundles_post_ra>
// kernel: tpu_custom_call.1
= control target key start
LH: loop header
LB: loop body
LE: loop exit
PB: predicated region body
PF: predicated region fallthrough
CT: control target
= control target key end

     0   :  { %12 = vsyncpa [#allocation3], 0  ;;  %s2825_s0 = inlined_call_operand.hbm [shape: f32[8,256], index: 0, kind: input, shape index: {}]   ;;  %s2826_s1 = inlined_call_operand.hbm [shape: bf16[256,1024], index: 1, kind: input, shape index: {}]   ;;  %s2827_s2 = inlined_call_operand.hbm [shape: f32[1,1024], index: 2, kind: input, shape index: {}]   ;;  %s2828_s3 = inlined_call_operand.hbm [shape: bf16[1024,256], index: 3, kind: input, shape index: {}]   ;;  %s2829_s4 = inlined_call_operand.vmem [shape: f32[1,256], index: 4, kind: input, shape index: {}]   ;;  %s2830_s5 = inlined_call_operand.vmem [shape: f32[1,256], index: 5, kind: input, shape index: {}]   ;;  %s2831_s6 = inlined_call_operand.vmem [shape: f32[1,256], index: 6, kind: input, shape index: {}]   ;;  %s2832_s7 = inlined_call_operand.hbm [shape: f32[8,256], index: 7, kind: output, shape index: {}]  }
   0x1   :  { %13 = vsyncpa [#allocation6], 0 }
   0x2   :  { %14 = vsyncpa [#allocation9], 0 }
   0x3   :  { %15 = vsyncpa [#allocation4], 0  ;;  %s2663_s24 = smov [#allocation5]   ;;  %s2545_s28 = scalar_lea.hbm %s2826_s1, 16384 }
   0x4   :  { %s31_s25 = sshll.u32 %s2663_s24, 4  ;;  %p2546_p0 = scmp.ne.s32.totalorder %s2826_s1, %s2545_s28  ;;  %s32_s25 = int_to_ptr.vmem [resolvable:$true] %s31_s25 }
   0x5   :  { %p2549_p1 = scmp.lt.u32.totalorder %s2545_s28, %s2826_s1 }
   0x7   :  { %p2551_p2 = pnand %p2549_p1, %p2546_p0 }
   0x9   :  { %2554 = shalt.err (!%p2551_p2)
}
   0xa   :  { %s2555_s10 = scalar_lea.vmem %s32_s25, 16384  ;;  %p2560_p4 = scmp.lt.s32.totalorder %s32_s25, %s32_s25 }
   0xb   :  { %p2556_p3 = scmp.ne.s32.totalorder %s32_s25, %s2555_s10  ;;  %p2561_p5 = scmp.lt.s32.totalorder %s2555_s10, %s2555_s10 }
   0xd   :  { %p2562_p6 = por %p2561_p5, %p2560_p4 }
   0xf   :  { %p2563_p7 = pnand %p2562_p6, %p2556_p3 }
  0x11   :  { %2566 = shalt.err (!%p2563_p7)
}
  0x12   :  { %s2664_s11 = smov 512   ;;  %s2665_s12 = smov 32  }
  0x13   :  { %37 = dma.hbm_to_vmem [thread:$0]  %s2826_s1, 16384, %s32_s25, [#allocation6], %s2664_s11, %s2664_s11, %s2665_s12  }
  0x14   :  { %s2666_s15 = smov [#allocation2]   ;;  %s2667_s17 = smov [#allocation7]  }
  0x15   :  { %s22_s16 = sshll.u32 %s2666_s15, 4  ;;  %s44_s18 = sshll.u32 %s2667_s17, 4  ;;  %s23_s16 = int_to_ptr.vmem [resolvable:$true] %s22_s16  ;;  %s45_s18 = int_to_ptr.vmem [resolvable:$true] %s44_s18 }
  0x16   :  { %s2567_s21 = scalar_lea.hbm %s2825_s0, 256 }
  0x17   :  { %p2568_p8 = scmp.ne.s32.totalorder %s2825_s0, %s2567_s21  ;;  %p2571_p9 = scmp.lt.u32.totalorder %s2567_s21, %s2825_s0 }
  0x19   :  { %p2573_p10 = pnand %p2571_p9, %p2568_p8 }
  0x1b   :  { %2576 = shalt.err (!%p2573_p10)
}
  0x1c   :  { %s2577_s1 = scalar_lea.vmem %s23_s16, 256  ;;  %p2582_p12 = scmp.lt.s32.totalorder %s23_s16, %s23_s16 }
  0x1d   :  { %p2578_p11 = scmp.ne.s32.totalorder %s23_s16, %s2577_s1  ;;  %p2583_p13 = scmp.lt.s32.totalorder %s2577_s1, %s2577_s1 }
  0x1f   :  { %p2584_p0 = por %p2583_p13, %p2582_p12 }
  0x21   :  { %p2585_p1 = pnand %p2584_p0, %p2578_p11 }
  0x23   :  { %2588 = shalt.err (!%p2585_p1)
}
  0x24   :  { %25 = dma.hbm_to_vmem [thread:$0]  %s2825_s0, 256, %s23_s16, [#allocation3]  }
  0x25   :  { %s2589_s30 = scalar_lea.hbm %s2827_s2, 128 }
  0x26   :  { %p2590_p2 = scmp.ne.s32.totalorder %s2827_s2, %s2589_s30  ;;  %p2593_p3 = scmp.lt.u32.totalorder %s2589_s30, %s2827_s2 }
  0x28   :  { %p2595_p4 = pnand %p2593_p3, %p2590_p2 }
  0x2a   :  { %2598 = shalt.err (!%p2595_p4)
}
  0x2b   :  { %s2599_s12 = scalar_lea.vmem %s45_s18, 128  ;;  %p2604_p6 = scmp.lt.s32.totalorder %s45_s18, %s45_s18 }
  0x2c   :  { %p2600_p5 = scmp.ne.s32.totalorder %s45_s18, %s2599_s12  ;;  %p2605_p7 = scmp.lt.s32.totalorder %s2599_s12, %s2599_s12 }
  0x2e   :  { %p2606_p8 = por %p2605_p7, %p2604_p6 }
  0x30   :  { %p2607_p9 = pnand %p2606_p8, %p2600_p5 }
  0x32   :  { %2610 = shalt.err (!%p2607_p9)
}
  0x33   :  { %47 = dma.hbm_to_vmem [thread:$0]  %s2827_s2, 128, %s45_s18, [#allocation6]  }
  0x34   :  { %s2668_s14 = smov [#allocation8]   ;;  %s2611_s19 = scalar_lea.hbm %s2828_s3, 16384 }
  0x35   :  { %s53_s15 = sshll.u32 %s2668_s14, 4  ;;  %p2612_p10 = scmp.ne.s32.totalorder %s2828_s3, %s2611_s19  ;;  %s54_s15 = int_to_ptr.vmem [resolvable:$true] %s53_s15 }
  0x36   :  { %p2615_p11 = scmp.lt.u32.totalorder %s2611_s19, %s2828_s3 }
  0x38   :  { %p2617_p12 = pnand %p2615_p11, %p2612_p10 }
  0x3a   :  { %2620 = shalt.err (!%p2617_p12)
}
  0x3b   :  { %s2621_s24 = scalar_lea.vmem %s54_s15, 16384  ;;  %p2626_p0 = scmp.lt.s32.totalorder %s54_s15, %s54_s15 }
  0x3c   :  { %p2622_p13 = scmp.ne.s32.totalorder %s54_s15, %s2621_s24  ;;  %p2627_p1 = scmp.lt.s32.totalorder %s2621_s24, %s2621_s24 }
  0x3e   :  { %p2628_p2 = por %p2627_p1, %p2626_p0 }
  0x40   :  { %p2629_p3 = pnand %p2628_p2, %p2622_p13 }
  0x42   :  { %2632 = shalt.err (!%p2629_p3)
}
  0x43   :  { %s2669_s2 = smov 128   ;;  %s2670_s18 = smov 8  }
  0x44   :  { %59 = dma.hbm_to_vmem [thread:$0]  %s2828_s3, 16384, %s54_s15, [#allocation9], %s2669_s2, %s2669_s2, %s2670_s18  }
  0x45   :  { %2655 = dma.done.wait [#allocation3], 256  }
  0x46   :  { %2656 = vsyncadd [#allocation3], 4294967040 }
  0x47   :  { %2657 = dma.done.wait [#allocation6], 16512  }
  0x48   :  { %2658 = vsyncadd [#allocation6], 4294950784 }
  0x49   :  { %2659 = dma.done.wait [#allocation9], 16384  }
  0x4a   :  { %2660 = vsyncadd [#allocation9], 4294950912  ;;  %v85_v0 = vld [vmem:[#allocation5] sm:$0xff]  ;;  %v86_v2 = vld [vmem:[#allocation5 + $0x8] sm:$0xff]  ;;  %s2671_s30 = smov [#allocation10]  }
  0x4b   :  { %v89_v1 = vld [vmem:[#allocation5 + $0x20] sm:$0xff]  ;;  %v90_v4 = vld [vmem:[#allocation5 + $0x28] sm:$0xff]  ;;  %v79_v53 = vld [vmem:[#allocation2 + $0x8] sm:$0xff]  ;;  %s2073_s8 = sshll.u32 %s2671_s30, 4  ;;  %s2074_s8 = int_to_ptr.vmem [resolvable:$true] %s2073_s8 }
  0x4c   :  { %v2085_v3 = vcombine.high %v85_v0, %v89_v1  ;;  %v2084_v5 = vcombine.low %v85_v0, %v89_v1  ;;  %v93_v6 = vld [vmem:[#allocation5 + $0x40] sm:$0xff]  ;;  %v2087_v8 = vcombine.high %v86_v2, %v90_v4  ;;  %v2086_v9 = vcombine.low %v86_v2, %v90_v4  ;;  %v94_v11 = vld [vmem:[#allocation5 + $0x48] sm:$0xff]  ;;  %p2638_p5 = scmp.lt.s32.totalorder %s2074_s8, %s2074_s8 }
  0x4d   :  { %v97_v7 = vld [vmem:[#allocation5 + $0x60] sm:$0xff]  ;;  %v98_v12 = vld [vmem:[#allocation5 + $0x68] sm:$0xff]  ;;  %v2760_v57 = vpack.c.bf16 %v79_v53, %v79_v53 }
  0x4e   :  { %v2093_v10 = vcombine.high %v93_v6, %v97_v7  ;;  %v101_v13 = vld [vmem:[#allocation5 + $0x80] sm:$0xff]  ;;  %895 = vmatprep.subr.bf16.mxu0 %v2085_v3  ;;  %v2095_v14 = vcombine.high %v94_v11, %v98_v12  ;;  %v102_v16 = vld [vmem:[#allocation5 + $0x88] sm:$0xff]  ;;  %936 = vmatprep.subr.bf16.mxu1 %v2087_v8  ;;  %v2092_v18 = vcombine.low %v93_v6, %v97_v7 }
  0x4f   :  { %v105_v15 = vld [vmem:[#allocation5 + $0xa0] sm:$0xff]  ;;  %v106_v17 = vld [vmem:[#allocation5 + $0xa8] sm:$0xff]  ;;  %896 = vmatpush1.bf16.msra.mxu0 %v2084_v5  ;;  %937 = vmatpush1.bf16.msra.mxu1 %v2086_v9  ;;  %v2094_v19 = vcombine.low %v94_v11, %v98_v12 }
  0x50   :  { %897 = vmatprep.subr.bf16.mxu0 %v2093_v10  ;;  %v2101_v20 = vcombine.high %v101_v13, %v105_v15  ;;  %938 = vmatprep.subr.bf16.mxu1 %v2095_v14  ;;  %v2103_v21 = vcombine.high %v102_v16, %v106_v17  ;;  %v109_v22 = vld [vmem:[#allocation5 + $0xc0] sm:$0xff]  ;;  %v110_v24 = vld [vmem:[#allocation5 + $0xc8] sm:$0xff]  ;;  %v2100_v26 = vcombine.low %v101_v13, %v105_v15 }
  0x51   :  { %v113_v23 = vld [vmem:[#allocation5 + $0xe0] sm:$0xff]  ;;  %v114_v25 = vld [vmem:[#allocation5 + $0xe8] sm:$0xff]  ;;  %v2102_v27 = vcombine.low %v102_v16, %v106_v17  ;;  %927 = vmatprep.mubr.bf16.mxu0 %v2760_v57  ;;  %968 = vmatprep.mubr.bf16.mxu1 %v2760_v57 }
  0x52   :  { %v2109_v28 = vcombine.high %v109_v22, %v113_v23  ;;  %v2111_v29 = vcombine.high %v110_v24, %v114_v25  ;;  %v117_v30 = vld [vmem:[#allocation5 + $0x100] sm:$0xff]  ;;  %v118_v32 = vld [vmem:[#allocation5 + $0x108] sm:$0xff]  ;;  %v2108_v34 = vcombine.low %v109_v22, %v113_v23  ;;  %v2110_v35 = vcombine.low %v110_v24, %v114_v25 }
  0x53   :  { %898 = vmatpush1.bf16.msra.mxu0 %v2092_v18  ;;  %939 = vmatpush1.bf16.msra.mxu1 %v2094_v19  ;;  %v121_v31 = vld [vmem:[#allocation5 + $0x120] sm:$0xff]  ;;  %v122_v33 = vld [vmem:[#allocation5 + $0x128] sm:$0xff] }
  0x54   :  { %899 = vmatprep.subr.bf16.mxu0 %v2101_v20  ;;  %940 = vmatprep.subr.bf16.mxu1 %v2103_v21  ;;  %v2117_v36 = vcombine.high %v117_v30, %v121_v31  ;;  %v2119_v37 = vcombine.high %v118_v32, %v122_v33  ;;  %v125_v38 = vld [vmem:[#allocation5 + $0x140] sm:$0xff]  ;;  %v126_v40 = vld [vmem:[#allocation5 + $0x148] sm:$0xff]  ;;  %v2116_v42 = vcombine.low %v117_v30, %v121_v31 }
  0x55   :  { %v129_v39 = vld [vmem:[#allocation5 + $0x160] sm:$0xff]  ;;  %v130_v41 = vld [vmem:[#allocation5 + $0x168] sm:$0xff]  ;;  %v2118_v43 = vcombine.low %v118_v32, %v122_v33 }
  0x56   :  { %v2125_v44 = vcombine.high %v125_v38, %v129_v39  ;;  %v2127_v45 = vcombine.high %v126_v40, %v130_v41  ;;  %v133_v46 = vld [vmem:[#allocation5 + $0x180] sm:$0xff]  ;;  %v134_v48 = vld [vmem:[#allocation5 + $0x188] sm:$0xff]  ;;  %v2124_v50 = vcombine.low %v125_v38, %v129_v39  ;;  %v2126_v51 = vcombine.low %v126_v40, %v130_v41 }
  0x57   :  { %900 = vmatpush1.bf16.msra.mxu0 %v2100_v26  ;;  %941 = vmatpush1.bf16.msra.mxu1 %v2102_v27  ;;  %v137_v47 = vld [vmem:[#allocation5 + $0x1a0] sm:$0xff]  ;;  %v138_v49 = vld [vmem:[#allocation5 + $0x1a8] sm:$0xff] }
  0x58   :  { %901 = vmatprep.subr.bf16.mxu0 %v2109_v28  ;;  %942 = vmatprep.subr.bf16.mxu1 %v2111_v29  ;;  %v2133_v52 = vcombine.high %v133_v46, %v137_v47  ;;  %v2135_v54 = vcombine.high %v134_v48, %v138_v49  ;;  %v141_v55 = vld [vmem:[#allocation5 + $0x1c0] sm:$0xff]  ;;  %v142_v58 = vld [vmem:[#allocation5 + $0x1c8] sm:$0xff]  ;;  %v2132_v60 = vcombine.low %v133_v46, %v137_v47 }
  0x59   :  { %v145_v56 = vld [vmem:[#allocation5 + $0x1e0] sm:$0xff]  ;;  %v146_v59 = vld [vmem:[#allocation5 + $0x1e8] sm:$0xff]  ;;  %v2134_v61 = vcombine.low %v134_v48, %v138_v49 }
  0x5a   :  { %v2141_v62 = vcombine.high %v141_v55, %v145_v56  ;;  %v2143_v63 = vcombine.high %v142_v58, %v146_v59  ;;  %v149_v0 = vld [vmem:[#allocation5 + $0x200] sm:$0xff]  ;;  %v150_v2 = vld [vmem:[#allocation5 + $0x208] sm:$0xff]  ;;  %v2140_v4 = vcombine.low %v141_v55, %v145_v56  ;;  %v2142_v5 = vcombine.low %v142_v58, %v146_v59 }
  0x5b   :  { %902 = vmatpush1.bf16.msra.mxu0 %v2108_v34  ;;  %943 = vmatpush1.bf16.msra.mxu1 %v2110_v35  ;;  %v153_v1 = vld [vmem:[#allocation5 + $0x220] sm:$0xff]  ;;  %v154_v3 = vld [vmem:[#allocation5 + $0x228] sm:$0xff] }
  0x5c   :  { %903 = vmatprep.subr.bf16.mxu0 %v2117_v36  ;;  %944 = vmatprep.subr.bf16.mxu1 %v2119_v37  ;;  %v2149_v6 = vcombine.high %v149_v0, %v153_v1  ;;  %v2151_v7 = vcombine.high %v150_v2, %v154_v3  ;;  %v157_v8 = vld [vmem:[#allocation5 + $0x240] sm:$0xff]  ;;  %v158_v10 = vld [vmem:[#allocation5 + $0x248] sm:$0xff]  ;;  %v2148_v12 = vcombine.low %v149_v0, %v153_v1  ;;  %v87_v0 = vld [vmem:[#allocation5 + $0x10] sm:$0xff] }
  0x5d   :  { %v161_v9 = vld [vmem:[#allocation5 + $0x260] sm:$0xff]  ;;  %v162_v11 = vld [vmem:[#allocation5 + $0x268] sm:$0xff]  ;;  %v2150_v13 = vcombine.low %v150_v2, %v154_v3  ;;  %v91_v1 = vld [vmem:[#allocation5 + $0x30] sm:$0xff] }
  0x5e   :  { %v2157_v14 = vcombine.high %v157_v8, %v161_v9  ;;  %v2159_v15 = vcombine.high %v158_v10, %v162_v11  ;;  %v165_v16 = vld [vmem:[#allocation5 + $0x280] sm:$0xff]  ;;  %v166_v18 = vld [vmem:[#allocation5 + $0x288] sm:$0xff]  ;;  %v2156_v20 = vcombine.low %v157_v8, %v161_v9  ;;  %v2158_v21 = vcombine.low %v158_v10, %v162_v11  ;;  %v88_v3 = vld [vmem:[#allocation5 + $0x18] sm:$0xff] }
  0x5f   :  { %904 = vmatpush1.bf16.msra.mxu0 %v2116_v42  ;;  %945 = vmatpush1.bf16.msra.mxu1 %v2118_v43  ;;  %v169_v17 = vld [vmem:[#allocation5 + $0x2a0] sm:$0xff]  ;;  %v170_v19 = vld [vmem:[#allocation5 + $0x2a8] sm:$0xff]  ;;  %v2089_v8 = vcombine.high %v87_v0, %v91_v1  ;;  %v95_v9 = vld [vmem:[#allocation5 + $0x50] sm:$0xff] }
  0x60   :  { %905 = vmatprep.subr.bf16.mxu0 %v2125_v44  ;;  %946 = vmatprep.subr.bf16.mxu1 %v2127_v45  ;;  %v2165_v22 = vcombine.high %v165_v16, %v169_v17  ;;  %v2167_v23 = vcombine.high %v166_v18, %v170_v19  ;;  %v173_v24 = vld [vmem:[#allocation5 + $0x2c0] sm:$0xff]  ;;  %v174_v26 = vld [vmem:[#allocation5 + $0x2c8] sm:$0xff]  ;;  %v2164_v28 = vcombine.low %v165_v16, %v169_v17  ;;  %v99_v10 = vld [vmem:[#allocation5 + $0x70] sm:$0xff] }
  0x61   :  { %v177_v25 = vld [vmem:[#allocation5 + $0x2e0] sm:$0xff]  ;;  %v178_v27 = vld [vmem:[#allocation5 + $0x2e8] sm:$0xff]  ;;  %v2166_v29 = vcombine.low %v166_v18, %v170_v19  ;;  %v2097_v17 = vcombine.high %v95_v9, %v99_v10  ;;  %v103_v18 = vld [vmem:[#allocation5 + $0x90] sm:$0xff] }
  0x62   :  { %v2173_v30 = vcombine.high %v173_v24, %v177_v25  ;;  %v2175_v31 = vcombine.high %v174_v26, %v178_v27  ;;  %v181_v32 = vld [vmem:[#allocation5 + $0x300] sm:$0xff]  ;;  %v182_v34 = vld [vmem:[#allocation5 + $0x308] sm:$0xff]  ;;  %v2172_v36 = vcombine.low %v173_v24, %v177_v25  ;;  %v2174_v37 = vcombine.low %v174_v26, %v178_v27  ;;  %v107_v19 = vld [vmem:[#allocation5 + $0xb0] sm:$0xff] }
  0x63   :  { %906 = vmatpush1.bf16.msra.mxu0 %v2124_v50  ;;  %947 = vmatpush1.bf16.msra.mxu1 %v2126_v51  ;;  %v185_v33 = vld [vmem:[#allocation5 + $0x320] sm:$0xff]  ;;  %v186_v35 = vld [vmem:[#allocation5 + $0x328] sm:$0xff]  ;;  %v2105_v25 = vcombine.high %v103_v18, %v107_v19  ;;  %v111_v26 = vld [vmem:[#allocation5 + $0xd0] sm:$0xff] }
  0x64   :  { %907 = vmatprep.subr.bf16.mxu0 %v2133_v52  ;;  %948 = vmatprep.subr.bf16.mxu1 %v2135_v54  ;;  %v2181_v38 = vcombine.high %v181_v32, %v185_v33  ;;  %v189_v39 = vld [vmem:[#allocation5 + $0x340] sm:$0xff]  ;;  %v2183_v41 = vcombine.high %v182_v34, %v186_v35  ;;  %v190_v42 = vld [vmem:[#allocation5 + $0x348] sm:$0xff]  ;;  %v2180_v44 = vcombine.low %v181_v32, %v185_v33  ;;  %v115_v27 = vld [vmem:[#allocation5 + $0xf0] sm:$0xff] }
  0x65   :  { %v193_v40 = vld [vmem:[#allocation5 + $0x360] sm:$0xff]  ;;  %v194_v43 = vld [vmem:[#allocation5 + $0x368] sm:$0xff]  ;;  %v2182_v45 = vcombine.low %v182_v34, %v186_v35  ;;  %v2113_v33 = vcombine.high %v111_v26, %v115_v27  ;;  %v119_v34 = vld [vmem:[#allocation5 + $0x110] sm:$0xff] }
  0x66   :  { %v2189_v46 = vcombine.high %v189_v39, %v193_v40  ;;  %v197_v47 = vld [vmem:[#allocation5 + $0x380] sm:$0xff]  ;;  %v2191_v49 = vcombine.high %v190_v42, %v194_v43  ;;  %v198_v50 = vld [vmem:[#allocation5 + $0x388] sm:$0xff]  ;;  %v2188_v52 = vcombine.low %v189_v39, %v193_v40  ;;  %v2190_v53 = vcombine.low %v190_v42, %v194_v43  ;;  %v123_v35 = vld [vmem:[#allocation5 + $0x130] sm:$0xff] }
  0x67   :  { %908 = vmatpush1.bf16.msra.mxu0 %v2132_v60  ;;  %949 = vmatpush1.bf16.msra.mxu1 %v2134_v61  ;;  %v201_v48 = vld [vmem:[#allocation5 + $0x3a0] sm:$0xff]  ;;  %v202_v51 = vld [vmem:[#allocation5 + $0x3a8] sm:$0xff]  ;;  %v2112_v39 = vcombine.low %v111_v26, %v115_v27  ;;  %v127_v42 = vld [vmem:[#allocation5 + $0x150] sm:$0xff] }
  0x68   :  { %909 = vmatprep.subr.bf16.mxu0 %v2141_v62  ;;  %950 = vmatprep.subr.bf16.mxu1 %v2143_v63  ;;  %v2197_v54 = vcombine.high %v197_v47, %v201_v48  ;;  %v205_v55 = vld [vmem:[#allocation5 + $0x3c0] sm:$0xff]  ;;  %v2199_v58 = vcombine.high %v198_v50, %v202_v51  ;;  %v206_v59 = vld [vmem:[#allocation5 + $0x3c8] sm:$0xff]  ;;  %v2196_v61 = vcombine.low %v197_v47, %v201_v48  ;;  %v135_v47 = vld [vmem:[#allocation5 + $0x190] sm:$0xff] }
  0x69   :  { %v209_v56 = vld [vmem:[#allocation5 + $0x3e0] sm:$0xff]  ;;  %v210_v60 = vld [vmem:[#allocation5 + $0x3e8] sm:$0xff]  ;;  %v2198_v62 = vcombine.low %v198_v50, %v202_v51  ;;  %v139_v48 = vld [vmem:[#allocation5 + $0x1b0] sm:$0xff] }
  0x6a   :  { %v2205_v63 = vcombine.high %v205_v55, %v209_v56  ;;  %v2207_v2 = vcombine.high %v206_v59, %v210_v60  ;;  %v136_v51 = vld [vmem:[#allocation5 + $0x198] sm:$0xff]  ;;  %v179_v26 = vld [vmem:[#allocation5 + $0x2f0] sm:$0xff] }
  0x6b   :  { %910 = vmatpush1.bf16.msra.mxu0 %v2140_v4  ;;  %951 = vmatpush1.bf16.msra.mxu1 %v2142_v5  ;;  %v92_v4 = vld [vmem:[#allocation5 + $0x38] sm:$0xff]  ;;  %v2204_v5 = vcombine.low %v205_v55, %v209_v56  ;;  %v143_v55 = vld [vmem:[#allocation5 + $0x1d0] sm:$0xff] }
  0x6c   :  { %911 = vmatprep.subr.bf16.mxu0 %v2149_v6  ;;  %952 = vmatprep.subr.bf16.mxu1 %v2151_v7  ;;  %v78_v6 = vld [vmem:[#allocation2] sm:$0xff]  ;;  %v2206_v7 = vcombine.low %v206_v59, %v210_v60  ;;  %v2091_v11 = vcombine.high %v88_v3, %v92_v4  ;;  %v2090_v16 = vcombine.low %v88_v3, %v92_v4  ;;  %v144_v60 = vld [vmem:[#allocation5 + $0x1d8] sm:$0xff] }
  0x6d   :  { %v147_v56 = vld [vmem:[#allocation5 + $0x1f0] sm:$0xff]  ;;  %v2137_v59 = vcombine.high %v135_v47, %v139_v48  ;;  %v152_v4 = vld [vmem:[#allocation5 + $0x218] sm:$0xff] }
  0x6e   :  { %v2145_v3 = vcombine.high %v143_v55, %v147_v56 }
  0x6f   :  { %912 = vmatpush1.bf16.msra.mxu0 %v2148_v12  ;;  %953 = vmatpush1.bf16.msra.mxu1 %v2150_v13  ;;  %v96_v12 = vld [vmem:[#allocation5 + $0x58] sm:$0xff]  ;;  %v2764_v13 = vpack.c.bf16 %v78_v6, %v78_v6 }
  0x70   :  { %913 = vmatprep.subr.bf16.mxu0 %v2157_v14  ;;  %954 = vmatprep.subr.bf16.mxu1 %v2159_v15  ;;  %v100_v14 = vld [vmem:[#allocation5 + $0x78] sm:$0xff]  ;;  %v2088_v15 = vcombine.low %v87_v0, %v91_v1  ;;  %v151_v0 = vld [vmem:[#allocation5 + $0x210] sm:$0xff] }
  0x71   :  { %v2098_v24 = vcombine.low %v96_v12, %v100_v14  ;;  %v155_v1 = vld [vmem:[#allocation5 + $0x230] sm:$0xff] }
  0x73   :  { %914 = vmatpush1.bf16.msra.mxu0 %v2156_v20  ;;  %955 = vmatpush1.bf16.msra.mxu1 %v2158_v21  ;;  %v2099_v20 = vcombine.high %v96_v12, %v100_v14  ;;  %v104_v21 = vld [vmem:[#allocation5 + $0x98] sm:$0xff] }
  0x74   :  { %915 = vmatprep.subr.bf16.mxu0 %v2165_v22  ;;  %956 = vmatprep.subr.bf16.mxu1 %v2167_v23  ;;  %v108_v22 = vld [vmem:[#allocation5 + $0xb8] sm:$0xff]  ;;  %v2096_v23 = vcombine.low %v95_v9, %v99_v10  ;;  %v163_v9 = vld [vmem:[#allocation5 + $0x270] sm:$0xff] }
  0x75   :  { %v2106_v32 = vcombine.low %v104_v21, %v108_v22  ;;  %v160_v12 = vld [vmem:[#allocation5 + $0x258] sm:$0xff] }
  0x76   :  { %v164_v14 = vld [vmem:[#allocation5 + $0x278] sm:$0xff] }
  0x77   :  { %916 = vmatpush1.bf16.msra.mxu0 %v2164_v28  ;;  %957 = vmatpush1.bf16.msra.mxu1 %v2166_v29  ;;  %v2107_v28 = vcombine.high %v104_v21, %v108_v22  ;;  %v112_v29 = vld [vmem:[#allocation5 + $0xd8] sm:$0xff]  ;;  %v2162_v27 = vcombine.low %v160_v12, %v164_v14 }
  0x78   :  { %917 = vmatprep.subr.bf16.mxu0 %v2173_v30  ;;  %958 = vmatprep.subr.bf16.mxu1 %v2175_v31  ;;  %v116_v30 = vld [vmem:[#allocation5 + $0xf8] sm:$0xff]  ;;  %v2104_v31 = vcombine.low %v103_v18, %v107_v19  ;;  %v171_v18 = vld [vmem:[#allocation5 + $0x2b0] sm:$0xff] }
  0x79   :  { %v2114_v40 = vcombine.low %v112_v29, %v116_v30  ;;  %v168_v21 = vld [vmem:[#allocation5 + $0x298] sm:$0xff] }
  0x7a   :  { %v172_v22 = vld [vmem:[#allocation5 + $0x2b8] sm:$0xff] }
  0x7b   :  { %918 = vmatpush1.bf16.msra.mxu0 %v2172_v36  ;;  %959 = vmatpush1.bf16.msra.mxu1 %v2174_v37  ;;  %v2115_v36 = vcombine.high %v112_v29, %v116_v30  ;;  %v120_v37 = vld [vmem:[#allocation5 + $0x118] sm:$0xff] }
  0x7c   :  { %919 = vmatprep.subr.bf16.mxu0 %v2181_v38  ;;  %960 = vmatprep.subr.bf16.mxu1 %v2183_v41  ;;  %v124_v38 = vld [vmem:[#allocation5 + $0x138] sm:$0xff]  ;;  %v2121_v41 = vcombine.high %v119_v34, %v123_v35 }
  0x7d   :  { %v2123_v43 = vcombine.high %v120_v37, %v124_v38  ;;  %v176_v29 = vld [vmem:[#allocation5 + $0x2d8] sm:$0xff] }
  0x7e   :  { %v180_v30 = vld [vmem:[#allocation5 + $0x2f8] sm:$0xff] }
  0x7f   :  { %920 = vmatpush1.bf16.msra.mxu0 %v2180_v44  ;;  %961 = vmatpush1.bf16.msra.mxu1 %v2182_v45  ;;  %v128_v44 = vld [vmem:[#allocation5 + $0x158] sm:$0xff] }
  0x80   :  { %921 = vmatprep.subr.bf16.mxu0 %v2189_v46  ;;  %962 = vmatprep.subr.bf16.mxu1 %v2191_v49  ;;  %v132_v45 = vld [vmem:[#allocation5 + $0x178] sm:$0xff]  ;;  %v2120_v46 = vcombine.low %v119_v34, %v123_v35  ;;  %v2122_v49 = vcombine.low %v120_v37, %v124_v38  ;;  %v2179_v35 = vcombine.high %v176_v29, %v180_v30  ;;  %v187_v37 = vld [vmem:[#allocation5 + $0x330] sm:$0xff] }
  0x81   :  { %v184_v38 = vld [vmem:[#allocation5 + $0x318] sm:$0xff] }
  0x83   :  { %922 = vmatpush1.bf16.msra.mxu0 %v2188_v52  ;;  %963 = vmatpush1.bf16.msra.mxu1 %v2190_v53  ;;  %v140_v52 = vld [vmem:[#allocation5 + $0x1b8] sm:$0xff]  ;;  %v2131_v53 = vcombine.high %v128_v44, %v132_v45 }
  0x84   :  { %923 = vmatprep.subr.bf16.mxu0 %v2197_v54  ;;  %964 = vmatprep.subr.bf16.mxu1 %v2199_v58  ;;  %v2130_v58 = vcombine.low %v128_v44, %v132_v45  ;;  %v195_v44 = vld [vmem:[#allocation5 + $0x370] sm:$0xff]  ;;  %v192_v45 = vld [vmem:[#allocation5 + $0x358] sm:$0xff] }
  0x87   :  { %924 = vmatpush1.bf16.msra.mxu0 %v2196_v61  ;;  %965 = vmatpush1.bf16.msra.mxu1 %v2198_v62  ;;  %v148_v61 = vld [vmem:[#allocation5 + $0x1f8] sm:$0xff]  ;;  %v2139_v62 = vcombine.high %v136_v51, %v140_v52 }
  0x88   :  { %925 = vmatprep.subr.bf16.mxu0 %v2205_v63  ;;  %966 = vmatprep.subr.bf16.mxu1 %v2207_v2  ;;  %v2136_v63 = vcombine.low %v135_v47, %v139_v48  ;;  %v2138_v2 = vcombine.low %v136_v51, %v140_v52  ;;  %v2147_v6 = vcombine.high %v144_v60, %v148_v61  ;;  %v199_v51 = vld [vmem:[#allocation5 + $0x390] sm:$0xff] }
  0x89   :  { %v2146_v10 = vcombine.low %v144_v60, %v148_v61  ;;  %v203_v52 = vld [vmem:[#allocation5 + $0x3b0] sm:$0xff] }
  0x8a   :  { %v207_v60 = vld [vmem:[#allocation5 + $0x3d0] sm:$0xff] }
  0x8b   :  { %926 = vmatpush1.bf16.msra.mxu0 %v2204_v5  ;;  %967 = vmatpush1.bf16.msra.mxu1 %v2206_v7  ;;  %v156_v5 = vld [vmem:[#allocation5 + $0x238] sm:$0xff]  ;;  %v2144_v7 = vcombine.low %v143_v55, %v147_v56  ;;  %v211_v61 = vld [vmem:[#allocation5 + $0x3f0] sm:$0xff] }
  0x8c   :  { %977 = vmatprep.subr.bf16.mxu0 %v2089_v8  ;;  %1018 = vmatprep.subr.bf16.mxu1 %v2091_v11  ;;  %v159_v8 = vld [vmem:[#allocation5 + $0x250] sm:$0xff]  ;;  %v2153_v11 = vcombine.high %v151_v0, %v155_v1  ;;  %v2154_v19 = vcombine.low %v152_v4, %v156_v5 }
  0x8e   :  { %928 = vmatmul.mubr.bf16.vlgmr.msra.gmra.mrb[0].mxu0 %v2764_v13  ;;  %969 = vmatmul.mubr.bf16.vlgmr.msra.gmra.mrb[0].mxu1 %v2764_v13 }
  0x8f   :  { %978 = vmatpush1.bf16.msra.mxu0 %v2088_v15  ;;  %1019 = vmatpush1.bf16.msra.mxu1 %v2090_v16  ;;  %v2155_v15 = vcombine.high %v152_v4, %v156_v5  ;;  %v2152_v16 = vcombine.low %v151_v0, %v155_v1  ;;  %v2200_v0 = vcombine.low %v199_v51, %v203_v52 }
  0x90   :  { %979 = vmatprep.subr.bf16.mxu0 %v2097_v17  ;;  %1020 = vmatprep.subr.bf16.mxu1 %v2099_v20  ;;  %v167_v17 = vld [vmem:[#allocation5 + $0x290] sm:$0xff]  ;;  %v2161_v20 = vcombine.high %v159_v8, %v163_v9  ;;  %v2208_v4 = vcombine.low %v207_v60, %v211_v61 }
  0x91   :  { %1009 = vmatprep.mubr.bf16.mxu0 %v2760_v57  ;;  %1050 = vmatprep.mubr.bf16.mxu1 %v2760_v57  ;;  %v131_v57 = vld [vmem:[#allocation5 + $0x170] sm:$0xff] }
  0x92   :  { %v2129_v50 = vcombine.high %v127_v42, %v131_v57  ;;  %v2128_v54 = vcombine.low %v127_v42, %v131_v57 }
  0x93   :  { %980 = vmatpush1.bf16.msra.mxu0 %v2096_v23  ;;  %1021 = vmatpush1.bf16.msra.mxu1 %v2098_v24  ;;  %v2163_v23 = vcombine.high %v160_v12, %v164_v14  ;;  %v2160_v24 = vcombine.low %v159_v8, %v163_v9  ;;  %v2349_v8 = vld [vmem:[#allocation8] ss:$8 sps:$4 sm:$0xff]   ;;  %v2355_v12 = vld [vmem:[#allocation8 + $0x10] ss:$8 sps:$4 sm:$0xff]  }
  0x94   :  { %981 = vmatprep.subr.bf16.mxu0 %v2105_v25  ;;  %1022 = vmatprep.subr.bf16.mxu1 %v2107_v28  ;;  %v175_v25 = vld [vmem:[#allocation5 + $0x2d0] sm:$0xff]  ;;  %v2169_v28 = vcombine.high %v167_v17, %v171_v18  ;;  %v2358_v14 = vld [vmem:[#allocation8 + $0x110] ss:$8 sps:$4 sm:$0xff]  }
  0x95   :  { %v2177_v34 = vcombine.high %v175_v25, %v179_v26  ;;  %v2352_v9 = vld [vmem:[#allocation8 + $0x100] ss:$8 sps:$4 sm:$0xff]  }
  0x97   :  { %982 = vmatpush1.bf16.msra.mxu0 %v2104_v31  ;;  %1023 = vmatpush1.bf16.msra.mxu1 %v2106_v32  ;;  %v2171_v31 = vcombine.high %v168_v21, %v172_v22  ;;  %v2168_v32 = vcombine.low %v167_v17, %v171_v18  ;;  %v2361_v17 = vld [vmem:[#allocation8 + $0x20] ss:$8 sps:$4 sm:$0xff]  }
  0x98   :  { %983 = vmatprep.subr.bf16.mxu0 %v2113_v33  ;;  %1024 = vmatprep.subr.bf16.mxu1 %v2115_v36  ;;  %v2170_v33 = vcombine.low %v168_v21, %v172_v22  ;;  %v183_v36 = vld [vmem:[#allocation5 + $0x310] sm:$0xff]  ;;  %v2367_v21 = vld [vmem:[#allocation8 + $0x30] ss:$8 sps:$4 sm:$0xff]  }
  0x99   :  { %v2185_v42 = vcombine.high %v183_v36, %v187_v37  ;;  %v2184_v47 = vcombine.low %v183_v36, %v187_v37  ;;  %v2364_v18 = vld [vmem:[#allocation8 + $0x120] ss:$8 sps:$4 sm:$0xff]   ;;  %v2375_v22 = vld [vmem:[#allocation8 + $0x44] ss:$8 sps:$4 sm:$0xff]   ;;  %v2391_v36 = vld [vmem:[#allocation8 + $0x70] ss:$8 sps:$4 sm:$0xff]  }
  0x9a   :  { %v2394_v37 = vld [vmem:[#allocation8 + $0x170] ss:$8 sps:$4 sm:$0xff]  }
  0x9b   :  { %984 = vmatpush1.bf16.msra.mxu0 %v2112_v39  ;;  %1025 = vmatpush1.bf16.msra.mxu1 %v2114_v40  ;;  %v188_v39 = vld [vmem:[#allocation5 + $0x338] sm:$0xff]  ;;  %v2176_v40 = vcombine.low %v175_v25, %v179_v26  ;;  %v2376_v25 = vld [vmem:[#allocation8 + $0x140] ss:$8 sps:$4 sm:$0xff]  }
  0x9c   :  { %985 = vmatprep.subr.bf16.mxu0 %v2121_v41  ;;  %1026 = vmatprep.subr.bf16.mxu1 %v2123_v43  ;;  %v2178_v41 = vcombine.low %v176_v29, %v180_v30  ;;  %v2187_v57 = vcombine.high %v184_v38, %v188_v39  ;;  %v191_v43 = vld [vmem:[#allocation5 + $0x350] sm:$0xff]  ;;  %v2186_v48 = vcombine.low %v184_v38, %v188_v39  ;;  %v2381_v26 = vld [vmem:[#allocation8 + $0x54] ss:$8 sps:$4 sm:$0xff]   ;;  %v2382_v29 = vld [vmem:[#allocation8 + $0x150] ss:$8 sps:$4 sm:$0xff]  }
  0x9d   :  { %v2192_v55 = vcombine.low %v191_v43, %v195_v44  ;;  %v2387_v30 = vld [vmem:[#allocation8 + $0x64] ss:$8 sps:$4 sm:$0xff]  }
  0x9e   :  { %v2399_v38 = vld [vmem:[#allocation8 + $0x84] ss:$8 sps:$4 sm:$0xff]  }
  0x9f   :  { %986 = vmatpush1.bf16.msra.mxu0 %v2120_v46  ;;  %1027 = vmatpush1.bf16.msra.mxu1 %v2122_v49  ;;  %v196_v46 = vld [vmem:[#allocation5 + $0x378] sm:$0xff]  ;;  %v2193_v49 = vcombine.high %v191_v43, %v195_v44  ;;  %v2402_v39 = vld [vmem:[#allocation8 + $0x184] ss:$8 sps:$4 sm:$0xff]  }
  0xa0   :  { %987 = vmatprep.subr.bf16.mxu0 %v2129_v50  ;;  %1028 = vmatprep.subr.bf16.mxu1 %v2131_v53  ;;  %v2195_v50 = vcombine.high %v192_v45, %v196_v46  ;;  %v200_v53 = vld [vmem:[#allocation5 + $0x398] sm:$0xff]  ;;  %v2194_v56 = vcombine.low %v192_v45, %v196_v46  ;;  %v2411_v45 = vld [vmem:[#allocation8 + $0xa4] ss:$8 sps:$4 sm:$0xff]  }
  0xa1   :  { %v2403_v43 = vld [vmem:[#allocation8 + $0x90] ss:$8 sps:$4 sm:$0xff]   ;;  %v2414_v46 = vld [vmem:[#allocation8 + $0x1a4] ss:$8 sps:$4 sm:$0xff]  }
  0xa2   :  { %v2406_v44 = vld [vmem:[#allocation8 + $0x190] ss:$8 sps:$4 sm:$0xff]  }
  0xa3   :  { %988 = vmatpush1.bf16.msra.mxu0 %v2128_v54  ;;  %1029 = vmatpush1.bf16.msra.mxu1 %v2130_v58  ;;  %v204_v54 = vld [vmem:[#allocation5 + $0x3b8] sm:$0xff]  ;;  %v2201_v58 = vcombine.high %v199_v51, %v203_v52 }
  0xa4   :  { %989 = vmatprep.subr.bf16.mxu0 %v2137_v59  ;;  %1030 = vmatprep.subr.bf16.mxu1 %v2139_v62  ;;  %v2203_v59 = vcombine.high %v200_v53, %v204_v54  ;;  %v208_v62 = vld [vmem:[#allocation5 + $0x3d8] sm:$0xff]  ;;  %v2202_v1 = vcombine.low %v200_v53, %v204_v54  ;;  %v2423_v53 = vld [vmem:[#allocation8 + $0xc4] ss:$8 sps:$4 sm:$0xff]  }
  0xa5   :  { %v2415_v51 = vld [vmem:[#allocation8 + $0xb0] ss:$8 sps:$4 sm:$0xff]   ;;  %v2426_v54 = vld [vmem:[#allocation8 + $0x1c4] ss:$8 sps:$4 sm:$0xff]  }
  0xa6   :  { %v2418_v52 = vld [vmem:[#allocation8 + $0x1b0] ss:$8 sps:$4 sm:$0xff]  }
  0xa7   :  { %990 = vmatpush1.bf16.msra.mxu0 %v2136_v63  ;;  %1031 = vmatpush1.bf16.msra.mxu1 %v2138_v2  ;;  %v212_v63 = vld [vmem:[#allocation5 + $0x3f8] sm:$0xff]  ;;  %v2209_v2 = vcombine.high %v207_v60, %v211_v61 }
  0xa8   :  { %991 = vmatprep.subr.bf16.mxu0 %v2145_v3  ;;  %1032 = vmatprep.subr.bf16.mxu1 %v2147_v6  ;;  %v2211_v3 = vcombine.high %v208_v62, %v212_v63  ;;  %v2210_v5 = vcombine.low %v208_v62, %v212_v63  ;;  %v2351_v6 = vld [vmem:[#allocation8 + $0x4] ss:$8 sps:$4 sm:$0xff]   ;;  %v2427_v60 = vld [vmem:[#allocation8 + $0xd0] ss:$8 sps:$4 sm:$0xff]  }
  0xa9   :  { %v2430_v61 = vld [vmem:[#allocation8 + $0x1d0] ss:$8 sps:$4 sm:$0xff]   ;;  %v2435_v62 = vld [vmem:[#allocation8 + $0xe4] ss:$8 sps:$4 sm:$0xff]  }
  0xaa   :  { %v2438_v63 = vld [vmem:[#allocation8 + $0x1e4] ss:$8 sps:$4 sm:$0xff]  }
  0xab   :  { %992 = vmatpush1.bf16.msra.mxu0 %v2144_v7  ;;  %1033 = vmatpush1.bf16.msra.mxu1 %v2146_v10  ;;  %v2354_v7 = vld [vmem:[#allocation8 + $0x104] ss:$8 sps:$4 sm:$0xff]   ;;  %v2357_v10 = vld [vmem:[#allocation8 + $0x14] ss:$8 sps:$4 sm:$0xff]  }
  0xac   :  { %993 = vmatprep.subr.bf16.mxu0 %v2153_v11  ;;  %1034 = vmatprep.subr.bf16.mxu1 %v2155_v15  ;;  %v2360_v11 = vld [vmem:[#allocation8 + $0x114] ss:$8 sps:$4 sm:$0xff]   ;;  %v2363_v15 = vld [vmem:[#allocation8 + $0x24] ss:$8 sps:$4 sm:$0xff]  }
  0xaf   :  { %994 = vmatpush1.bf16.msra.mxu0 %v2152_v16  ;;  %1035 = vmatpush1.bf16.msra.mxu1 %v2154_v19  ;;  %v2366_v16 = vld [vmem:[#allocation8 + $0x124] ss:$8 sps:$4 sm:$0xff]   ;;  %v2369_v19 = vld [vmem:[#allocation8 + $0x34] ss:$8 sps:$4 sm:$0xff]  }
  0xb0   :  { %995 = vmatprep.subr.bf16.mxu0 %v2161_v20  ;;  %1036 = vmatprep.subr.bf16.mxu1 %v2163_v23  ;;  %v2372_v20 = vld [vmem:[#allocation8 + $0x134] ss:$8 sps:$4 sm:$0xff]   ;;  %v2378_v23 = vld [vmem:[#allocation8 + $0x144] ss:$8 sps:$4 sm:$0xff]  }
  0xb3   :  { %996 = vmatpush1.bf16.msra.mxu0 %v2160_v24  ;;  %1037 = vmatpush1.bf16.msra.mxu1 %v2162_v27  ;;  %v2373_v24 = vld [vmem:[#allocation8 + $0x40] ss:$8 sps:$4 sm:$0xff]   ;;  %v2384_v27 = vld [vmem:[#allocation8 + $0x154] ss:$8 sps:$4 sm:$0xff]  }
  0xb4   :  { %997 = vmatprep.subr.bf16.mxu0 %v2169_v28  ;;  %1038 = vmatprep.subr.bf16.mxu1 %v2171_v31  ;;  %v2379_v28 = vld [vmem:[#allocation8 + $0x50] ss:$8 sps:$4 sm:$0xff]   ;;  %v2390_v31 = vld [vmem:[#allocation8 + $0x164] ss:$8 sps:$4 sm:$0xff]  }
  0xb7   :  { %998 = vmatpush1.bf16.msra.mxu0 %v2168_v32  ;;  %1039 = vmatpush1.bf16.msra.mxu1 %v2170_v33  ;;  %v2385_v32 = vld [vmem:[#allocation8 + $0x60] ss:$8 sps:$4 sm:$0xff]  }
  0xb8   :  { %999 = vmatprep.subr.bf16.mxu0 %v2177_v34  ;;  %1040 = vmatprep.subr.bf16.mxu1 %v2179_v35  ;;  %v2388_v33 = vld [vmem:[#allocation8 + $0x160] ss:$8 sps:$4 sm:$0xff]   ;;  %v2393_v34 = vld [vmem:[#allocation8 + $0x74] ss:$8 sps:$4 sm:$0xff]  }
  0xb9   :  { %v2396_v35 = vld [vmem:[#allocation8 + $0x174] ss:$8 sps:$4 sm:$0xff]  }
  0xbb   :  { %1000 = vmatpush1.bf16.msra.mxu0 %v2176_v40  ;;  %1041 = vmatpush1.bf16.msra.mxu1 %v2178_v41  ;;  %v2397_v40 = vld [vmem:[#allocation8 + $0x80] ss:$8 sps:$4 sm:$0xff]  }
  0xbc   :  { %1001 = vmatprep.subr.bf16.mxu0 %v2185_v42  ;;  %1042 = vmatprep.subr.bf16.mxu1 %v2187_v57  ;;  %v2400_v41 = vld [vmem:[#allocation8 + $0x180] ss:$8 sps:$4 sm:$0xff]   ;;  %v2405_v42 = vld [vmem:[#allocation8 + $0x94] ss:$8 sps:$4 sm:$0xff]  }
  0xbd   :  { %v2408_v57 = vld [vmem:[#allocation8 + $0x194] ss:$8 sps:$4 sm:$0xff]  }
  0xbf   :  { %1002 = vmatpush1.bf16.msra.mxu0 %v2184_v47  ;;  %1043 = vmatpush1.bf16.msra.mxu1 %v2186_v48  ;;  %v2409_v47 = vld [vmem:[#allocation8 + $0xa0] ss:$8 sps:$4 sm:$0xff]  }
  0xc0   :  { %1003 = vmatprep.subr.bf16.mxu0 %v2193_v49  ;;  %1044 = vmatprep.subr.bf16.mxu1 %v2195_v50  ;;  %v2412_v48 = vld [vmem:[#allocation8 + $0x1a0] ss:$8 sps:$4 sm:$0xff]   ;;  %v2417_v49 = vld [vmem:[#allocation8 + $0xb4] ss:$8 sps:$4 sm:$0xff]  }
  0xc1   :  { %v2420_v50 = vld [vmem:[#allocation8 + $0x1b4] ss:$8 sps:$4 sm:$0xff]  }
  0xc3   :  { %1004 = vmatpush1.bf16.msra.mxu0 %v2192_v55  ;;  %1045 = vmatpush1.bf16.msra.mxu1 %v2194_v56  ;;  %v2421_v55 = vld [vmem:[#allocation8 + $0xc0] ss:$8 sps:$4 sm:$0xff]  }
  0xc4   :  { %1005 = vmatprep.subr.bf16.mxu0 %v2201_v58  ;;  %1046 = vmatprep.subr.bf16.mxu1 %v2203_v59  ;;  %v2424_v56 = vld [vmem:[#allocation8 + $0x1c0] ss:$8 sps:$4 sm:$0xff]   ;;  %v2429_v58 = vld [vmem:[#allocation8 + $0xd4] ss:$8 sps:$4 sm:$0xff]  }
  0xc5   :  { %v2432_v59 = vld [vmem:[#allocation8 + $0x1d4] ss:$8 sps:$4 sm:$0xff]  }
  0xc7   :  { %1006 = vmatpush1.bf16.msra.mxu0 %v2200_v0  ;;  %1047 = vmatpush1.bf16.msra.mxu1 %v2202_v1  ;;  %v2433_v0 = vld [vmem:[#allocation8 + $0xe0] ss:$8 sps:$4 sm:$0xff]  }
  0xc8   :  { %1007 = vmatprep.subr.bf16.mxu0 %v2209_v2  ;;  %1048 = vmatprep.subr.bf16.mxu1 %v2211_v3  ;;  %v2436_v1 = vld [vmem:[#allocation8 + $0x1e0] ss:$8 sps:$4 sm:$0xff]   ;;  %v2441_v2 = vld [vmem:[#allocation8 + $0xf4] ss:$8 sps:$4 sm:$0xff]  }
  0xc9   :  { %v2444_v3 = vld [vmem:[#allocation8 + $0x1f4] ss:$8 sps:$4 sm:$0xff]  }
  0xcb   :  { %1008 = vmatpush1.bf16.msra.mxu0 %v2208_v4  ;;  %1049 = vmatpush1.bf16.msra.mxu1 %v2210_v5  ;;  %v2439_v4 = vld [vmem:[#allocation8 + $0xf0] ss:$8 sps:$4 sm:$0xff]  }
  0xcc   :  { %1843 = vmatprep.subr.bf16.mxu0 %v2351_v6  ;;  %1884 = vmatprep.subr.bf16.mxu1 %v2354_v7  ;;  %v2442_v5 = vld [vmem:[#allocation8 + $0x1f0] ss:$8 sps:$4 sm:$0xff]   ;;  %v2447_v6 = vld [vmem:[#allocation8 + $0x204] ss:$8 sps:$4 sm:$0xff]  }
  0xcd   :  { %v2450_v7 = vld [vmem:[#allocation8 + $0x304] ss:$8 sps:$4 sm:$0xff]  }
  0xce   :  { %1010 = vmatmul.mubr.bf16.vlgmr.msra.gmra.mrb[4].mxu0 %v2764_v13  ;;  %1051 = vmatmul.mubr.bf16.vlgmr.msra.gmra.mrb[4].mxu1 %v2764_v13  ;;  %v2370_v13 = vld [vmem:[#allocation8 + $0x130] ss:$8 sps:$4 sm:$0xff]  }
  0xcf   :  { %1844 = vmatpush1.bf16.msra.mxu0 %v2349_v8  ;;  %1885 = vmatpush1.bf16.msra.mxu1 %v2352_v9  ;;  %v215_v8 = vlaneseq }
  0xd0   :  { %1845 = vmatprep.subr.bf16.mxu0 %v2357_v10  ;;  %1886 = vmatprep.subr.bf16.mxu1 %v2360_v11  ;;  %v2777_v11 = vld [vmem:[#allocation7] sm:$0xff] }
  0xd1   :  { %v2772_v9 = vshrl.u32 %v215_v8, 7  ;;  %v2496_v8 = vld [vmem:[#allocation8 + $0x380] ss:$8 sps:$4 sm:$0xff]  }
  0xd3   :  { %1846 = vmatpush1.bf16.msra.mxu0 %v2355_v12  ;;  %1887 = vmatpush1.bf16.msra.mxu1 %v2358_v14  ;;  %v2775_v10 = vsub.s32 0, %v2772_v9  ;;  %v225_v12 = vsub.s32 2, %v2772_v9  ;;  %v2781_v14 = vsub.s32 1, %v2772_v9 }
  0xd4   :  { %1847 = vmatprep.subr.bf16.mxu0 %v2363_v15  ;;  %1888 = vmatprep.subr.bf16.mxu1 %v2366_v16  ;;  %v229_v15 = vsub.s32 3, %v2772_v9 }
  0xd5   :  { %v218_v16 = vrot.slane %v2777_v11, %v2775_v10 }
  0xd7   :  { %1848 = vmatpush1.bf16.msra.mxu0 %v2361_v17  ;;  %1889 = vmatpush1.bf16.msra.mxu1 %v2364_v18  ;;  %v226_v17 = vrot.slane %v2777_v11, %v225_v12  ;;  %v222_v18 = vrot.slane %v2777_v11, %v2781_v14  ;;  %v2501_v12 = vld [vmem:[#allocation8 + $0x294] ss:$8 sps:$4 sm:$0xff]  }
  0xd8   :  { %1849 = vmatprep.subr.bf16.mxu0 %v2369_v19  ;;  %1890 = vmatprep.subr.bf16.mxu1 %v2372_v20  ;;  %v230_v19 = vrot.slane %v2777_v11, %v229_v15  ;;  %v2504_v15 = vld [vmem:[#allocation8 + $0x394] ss:$8 sps:$4 sm:$0xff]  }
  0xdb   :  { %1850 = vmatpush1.bf16.msra.mxu0 %v2367_v21  ;;  %1891 = vmatpush1.bf16.msra.mxu1 %v2370_v13 }
  0xdc   :  { %1851 = vmatprep.subr.bf16.mxu0 %v2375_v22  ;;  %1892 = vmatprep.subr.bf16.mxu1 %v2378_v23 }
  0xdf   :  { %1852 = vmatpush1.bf16.msra.mxu0 %v2373_v24  ;;  %1893 = vmatpush1.bf16.msra.mxu1 %v2376_v25 }
  0xe0   :  { %1853 = vmatprep.subr.bf16.mxu0 %v2381_v26  ;;  %1894 = vmatprep.subr.bf16.mxu1 %v2384_v27 }
  0xe3   :  { %1854 = vmatpush1.bf16.msra.mxu0 %v2379_v28  ;;  %1895 = vmatpush1.bf16.msra.mxu1 %v2382_v29 }
  0xe4   :  { %1855 = vmatprep.subr.bf16.mxu0 %v2387_v30  ;;  %1896 = vmatprep.subr.bf16.mxu1 %v2390_v31 }
  0xe7   :  { %1856 = vmatpush1.bf16.msra.mxu0 %v2385_v32  ;;  %1897 = vmatpush1.bf16.msra.mxu1 %v2388_v33 }
  0xe8   :  { %1857 = vmatprep.subr.bf16.mxu0 %v2393_v34  ;;  %1898 = vmatprep.subr.bf16.mxu1 %v2396_v35 }
  0xeb   :  { %1858 = vmatpush1.bf16.msra.mxu0 %v2391_v36  ;;  %1899 = vmatpush1.bf16.msra.mxu1 %v2394_v37 }
  0xec   :  { %1859 = vmatprep.subr.bf16.mxu0 %v2399_v38  ;;  %1900 = vmatprep.subr.bf16.mxu1 %v2402_v39  ;;  %v2445_v38 = vld [vmem:[#allocation8 + $0x200] ss:$8 sps:$4 sm:$0xff]  }
  0xef   :  { %1860 = vmatpush1.bf16.msra.mxu0 %v2397_v40  ;;  %1901 = vmatpush1.bf16.msra.mxu1 %v2400_v41  ;;  %v2448_v40 = vld [vmem:[#allocation8 + $0x300] ss:$8 sps:$4 sm:$0xff]   ;;  %v2453_v41 = vld [vmem:[#allocation8 + $0x214] ss:$8 sps:$4 sm:$0xff]  }
  0xf0   :  { %1861 = vmatprep.subr.bf16.mxu0 %v2405_v42  ;;  %1902 = vmatprep.subr.bf16.mxu1 %v2408_v57  ;;  %v2456_v42 = vld [vmem:[#allocation8 + $0x314] ss:$8 sps:$4 sm:$0xff]   ;;  %v2451_v57 = vld [vmem:[#allocation8 + $0x210] ss:$8 sps:$4 sm:$0xff]  }
  0xf3   :  { %1862 = vmatpush1.bf16.msra.mxu0 %v2403_v43  ;;  %1903 = vmatpush1.bf16.msra.mxu1 %v2406_v44  ;;  %v2454_v43 = vld [vmem:[#allocation8 + $0x310] ss:$8 sps:$4 sm:$0xff]   ;;  %v2459_v44 = vld [vmem:[#allocation8 + $0x224] ss:$8 sps:$4 sm:$0xff]  }
  0xf4   :  { %1863 = vmatprep.subr.bf16.mxu0 %v2411_v45  ;;  %1904 = vmatprep.subr.bf16.mxu1 %v2414_v46  ;;  %v2462_v45 = vld [vmem:[#allocation8 + $0x324] ss:$8 sps:$4 sm:$0xff]   ;;  %v2457_v46 = vld [vmem:[#allocation8 + $0x220] ss:$8 sps:$4 sm:$0xff]  }
  0xf7   :  { %1864 = vmatpush1.bf16.msra.mxu0 %v2409_v47  ;;  %1905 = vmatpush1.bf16.msra.mxu1 %v2412_v48  ;;  %v2460_v47 = vld [vmem:[#allocation8 + $0x320] ss:$8 sps:$4 sm:$0xff]   ;;  %v2465_v48 = vld [vmem:[#allocation8 + $0x234] ss:$8 sps:$4 sm:$0xff]  }
  0xf8   :  { %1865 = vmatprep.subr.bf16.mxu0 %v2417_v49  ;;  %1906 = vmatprep.subr.bf16.mxu1 %v2420_v50  ;;  %v2468_v49 = vld [vmem:[#allocation8 + $0x334] ss:$8 sps:$4 sm:$0xff]   ;;  %v2463_v50 = vld [vmem:[#allocation8 + $0x230] ss:$8 sps:$4 sm:$0xff]  }
  0xfb   :  { %1866 = vmatpush1.bf16.msra.mxu0 %v2415_v51  ;;  %1907 = vmatpush1.bf16.msra.mxu1 %v2418_v52  ;;  %v2466_v51 = vld [vmem:[#allocation8 + $0x330] ss:$8 sps:$4 sm:$0xff]   ;;  %v2471_v52 = vld [vmem:[#allocation8 + $0x244] ss:$8 sps:$4 sm:$0xff]  }
  0xfc   :  { %1867 = vmatprep.subr.bf16.mxu0 %v2423_v53  ;;  %1908 = vmatprep.subr.bf16.mxu1 %v2426_v54  ;;  %v2474_v53 = vld [vmem:[#allocation8 + $0x344] ss:$8 sps:$4 sm:$0xff]   ;;  %v2469_v54 = vld [vmem:[#allocation8 + $0x240] ss:$8 sps:$4 sm:$0xff]  }
  0xff   :  { %1868 = vmatpush1.bf16.msra.mxu0 %v2421_v55  ;;  %1909 = vmatpush1.bf16.msra.mxu1 %v2424_v56  ;;  %v2472_v55 = vld [vmem:[#allocation8 + $0x340] ss:$8 sps:$4 sm:$0xff]   ;;  %v2477_v56 = vld [vmem:[#allocation8 + $0x254] ss:$8 sps:$4 sm:$0xff]  }
 0x100   :  { %1869 = vmatprep.subr.bf16.mxu0 %v2429_v58  ;;  %1910 = vmatprep.subr.bf16.mxu1 %v2432_v59  ;;  %v2480_v58 = vld [vmem:[#allocation8 + $0x354] ss:$8 sps:$4 sm:$0xff]   ;;  %v2475_v59 = vld [vmem:[#allocation8 + $0x250] ss:$8 sps:$4 sm:$0xff]  }
 0x103   :  { %1870 = vmatpush1.bf16.msra.mxu0 %v2427_v60  ;;  %1911 = vmatpush1.bf16.msra.mxu1 %v2430_v61  ;;  %v2478_v60 = vld [vmem:[#allocation8 + $0x350] ss:$8 sps:$4 sm:$0xff]   ;;  %v2483_v61 = vld [vmem:[#allocation8 + $0x264] ss:$8 sps:$4 sm:$0xff]  }
 0x104   :  { %1871 = vmatprep.subr.bf16.mxu0 %v2435_v62  ;;  %1912 = vmatprep.subr.bf16.mxu1 %v2438_v63  ;;  %v2486_v62 = vld [vmem:[#allocation8 + $0x364] ss:$8 sps:$4 sm:$0xff]   ;;  %v2481_v63 = vld [vmem:[#allocation8 + $0x260] ss:$8 sps:$4 sm:$0xff]  }
 0x107   :  { %1872 = vmatpush1.bf16.msra.mxu0 %v2433_v0  ;;  %1913 = vmatpush1.bf16.msra.mxu1 %v2436_v1  ;;  %v2484_v0 = vld [vmem:[#allocation8 + $0x360] ss:$8 sps:$4 sm:$0xff]   ;;  %v2489_v1 = vld [vmem:[#allocation8 + $0x274] ss:$8 sps:$4 sm:$0xff]  }
 0x108   :  { %1873 = vmatprep.subr.bf16.mxu0 %v2441_v2  ;;  %1914 = vmatprep.subr.bf16.mxu1 %v2444_v3  ;;  %v2492_v2 = vld [vmem:[#allocation8 + $0x374] ss:$8 sps:$4 sm:$0xff]   ;;  %v2487_v3 = vld [vmem:[#allocation8 + $0x270] ss:$8 sps:$4 sm:$0xff]  }
 0x10b   :  { %1874 = vmatpush1.bf16.msra.mxu0 %v2439_v4  ;;  %1915 = vmatpush1.bf16.msra.mxu1 %v2442_v5  ;;  %v2490_v4 = vld [vmem:[#allocation8 + $0x370] ss:$8 sps:$4 sm:$0xff]   ;;  %v2495_v5 = vld [vmem:[#allocation8 + $0x284] ss:$8 sps:$4 sm:$0xff]  }
 0x10c   :  { %1925 = vmatprep.subr.bf16.mxu0 %v2447_v6  ;;  %1966 = vmatprep.subr.bf16.mxu1 %v2450_v7  ;;  %v2498_v6 = vld [vmem:[#allocation8 + $0x384] ss:$8 sps:$4 sm:$0xff]   ;;  %v2493_v7 = vld [vmem:[#allocation8 + $0x280] ss:$8 sps:$4 sm:$0xff]  }
 0x161   :  { %v929_v20 = vpop.f32.mrb[0].mxu0  ;;  %v970_v13 = vpop.f32.mrb[0].mxu1 }
 0x162   :  { %v930_v21 = vadd.f32 %v929_v20, %v218_v16  ;;  %v931_v22 = vpop.f32.mrb[1].mxu0  ;;  %v971_v23 = vadd.f32 %v970_v13, %v226_v17  ;;  %v972_v25 = vpop.f32.mrb[1].mxu1  ;;  %v2499_v16 = vld [vmem:[#allocation8 + $0x290] ss:$8 sps:$4 sm:$0xff]   ;;  %v2505_v20 = vld [vmem:[#allocation8 + $0x2a0] ss:$8 sps:$4 sm:$0xff]  }
 0x163   :  { %v932_v24 = vadd.f32 %v931_v22, %v222_v18  ;;  %v933_v26 = vpop.f32.mrb[2].mxu0  ;;  %v973_v28 = vadd.f32 %v972_v25, %v230_v19  ;;  %v974_v29 = vpop.f32.mrb[2].mxu1  ;;  %v2502_v17 = vld [vmem:[#allocation8 + $0x390] ss:$8 sps:$4 sm:$0xff]   ;;  %v2507_v18 = vld [vmem:[#allocation8 + $0x2a4] ss:$8 sps:$4 sm:$0xff]  }
 0x164   :  { %v1059_v27 = vmax.f32 %v930_v21, 0.0  ;;  %v934_v30 = vpop.f32.mrb[3].mxu0  ;;  %v1061_v31 = vmax.f32 %v971_v23, 0.0  ;;  %v975_v33 = vpop.f32.mrb[3].mxu1  ;;  %v2510_v19 = vld [vmem:[#allocation8 + $0x3a4] ss:$8 sps:$4 sm:$0xff]  }
 0x165   :  { %v1060_v32 = vmax.f32 %v932_v24, 0.0  ;;  %v1062_v35 = vmax.f32 %v973_v28, 0.0  ;;  %v2508_v21 = vld [vmem:[#allocation8 + $0x3a0] ss:$8 sps:$4 sm:$0xff]   ;;  %v2513_v13 = vld [vmem:[#allocation8 + $0x2b4] ss:$8 sps:$4 sm:$0xff]  }
 0x166   :  { %v1067_v34 = vpack.c.bf16 %v1059_v27, %v1059_v27  ;;  %v1069_v36 = vpack.c.bf16 %v1061_v31, %v1061_v31  ;;  %v2516_v22 = vld [vmem:[#allocation8 + $0x3b4] ss:$8 sps:$4 sm:$0xff]   ;;  %v2511_v23 = vld [vmem:[#allocation8 + $0x2b0] ss:$8 sps:$4 sm:$0xff]   ;;  %v2519_v25 = vld [vmem:[#allocation8 + $0x2c4] ss:$8 sps:$4 sm:$0xff]  }
 0x167   :  { %v1068_v37 = vpack.c.bf16 %v1060_v32, %v1060_v32  ;;  %v1070_v39 = vpack.c.bf16 %v1062_v35, %v1062_v35  ;;  %v2514_v24 = vld [vmem:[#allocation8 + $0x3b0] ss:$8 sps:$4 sm:$0xff]   ;;  %v2522_v26 = vld [vmem:[#allocation8 + $0x3c4] ss:$8 sps:$4 sm:$0xff]   ;;  %v2517_v27 = vld [vmem:[#allocation8 + $0x2c0] ss:$8 sps:$4 sm:$0xff]  }
 0x168   :  { %v2520_v28 = vld [vmem:[#allocation8 + $0x3c0] ss:$8 sps:$4 sm:$0xff]   ;;  %v2525_v29 = vld [vmem:[#allocation8 + $0x2d4] ss:$8 sps:$4 sm:$0xff]   ;;  %v233_v31 = vsub.s32 4, %v2772_v9  ;;  %v241_v33 = vsub.s32 6, %v2772_v9 }
 0x169   :  { %1875 = vmatprep.mubr.bf16.mxu0 %v1068_v37  ;;  %1916 = vmatprep.mubr.bf16.mxu1 %v1070_v39  ;;  %v2528_v30 = vld [vmem:[#allocation8 + $0x3d4] ss:$8 sps:$4 sm:$0xff]   ;;  %v2523_v32 = vld [vmem:[#allocation8 + $0x2d0] ss:$8 sps:$4 sm:$0xff]   ;;  %v2531_v37 = vld [vmem:[#allocation8 + $0x2e4] ss:$8 sps:$4 sm:$0xff]  }
 0x16a   :  { %1876 = vmatmul.mubr.bf16.vlgmr.msra.gmra.mrb[8].mxu0 %v1067_v34  ;;  %1917 = vmatmul.mubr.bf16.vlgmr.msra.gmra.mrb[8].mxu1 %v1069_v36  ;;  %v237_v34 = vsub.s32 5, %v2772_v9  ;;  %v2526_v35 = vld [vmem:[#allocation8 + $0x3d0] ss:$8 sps:$4 sm:$0xff]   ;;  %v245_v36 = vsub.s32 7, %v2772_v9  ;;  %v234_v39 = vrot.slane %v2777_v11, %v233_v31  ;;  %v2540_v9 = vld [vmem:[#allocation8 + $0x3f4] ss:$8 sps:$4 sm:$0xff]  }
 0x16b   :  { %1926 = vmatpush1.bf16.msra.mxu0 %v2445_v38  ;;  %1967 = vmatpush1.bf16.msra.mxu1 %v2448_v40  ;;  %v2534_v38 = vld [vmem:[#allocation8 + $0x3e4] ss:$8 sps:$4 sm:$0xff]   ;;  %v242_v40 = vrot.slane %v2777_v11, %v241_v33 }
 0x16c   :  { %1927 = vmatprep.subr.bf16.mxu0 %v2453_v41  ;;  %1968 = vmatprep.subr.bf16.mxu1 %v2456_v42  ;;  %v238_v41 = vrot.slane %v2777_v11, %v237_v34  ;;  %v2529_v42 = vld [vmem:[#allocation8 + $0x2e0] ss:$8 sps:$4 sm:$0xff]   ;;  %v2544_v34 = vld [vmem:[#allocation2 + $0x8] sm:$0xff] }
 0x16f   :  { %1928 = vmatpush1.bf16.msra.mxu0 %v2451_v57  ;;  %1969 = vmatpush1.bf16.msra.mxu1 %v2454_v43  ;;  %v246_v57 = vrot.slane %v2777_v11, %v245_v36  ;;  %v2532_v43 = vld [vmem:[#allocation8 + $0x3e0] ss:$8 sps:$4 sm:$0xff]  }
 0x170   :  { %1929 = vmatprep.subr.bf16.mxu0 %v2459_v44  ;;  %1970 = vmatprep.subr.bf16.mxu1 %v2462_v45  ;;  %v2537_v44 = vld [vmem:[#allocation8 + $0x2f4] ss:$8 sps:$4 sm:$0xff]  }
 0x173   :  { %1930 = vmatpush1.bf16.msra.mxu0 %v2457_v46  ;;  %1971 = vmatpush1.bf16.msra.mxu1 %v2460_v47 }
 0x174   :  { %1931 = vmatprep.subr.bf16.mxu0 %v2465_v48  ;;  %1972 = vmatprep.subr.bf16.mxu1 %v2468_v49 }
 0x177   :  { %1932 = vmatpush1.bf16.msra.mxu0 %v2463_v50  ;;  %1973 = vmatpush1.bf16.msra.mxu1 %v2466_v51 }
 0x178   :  { %1933 = vmatprep.subr.bf16.mxu0 %v2471_v52  ;;  %1974 = vmatprep.subr.bf16.mxu1 %v2474_v53  ;;  %v2535_v53 = vld [vmem:[#allocation8 + $0x2f0] ss:$8 sps:$4 sm:$0xff]  }
 0x17b   :  { %1934 = vmatpush1.bf16.msra.mxu0 %v2469_v54  ;;  %1975 = vmatpush1.bf16.msra.mxu1 %v2472_v55 }
 0x17c   :  { %1935 = vmatprep.subr.bf16.mxu0 %v2477_v56  ;;  %1976 = vmatprep.subr.bf16.mxu1 %v2480_v58  ;;  %v2538_v58 = vld [vmem:[#allocation8 + $0x3f0] ss:$8 sps:$4 sm:$0xff]  }
 0x17f   :  { %1936 = vmatpush1.bf16.msra.mxu0 %v2475_v59  ;;  %1977 = vmatpush1.bf16.msra.mxu1 %v2478_v60 }
 0x180   :  { %1937 = vmatprep.subr.bf16.mxu0 %v2483_v61  ;;  %1978 = vmatprep.subr.bf16.mxu1 %v2486_v62 }
 0x183   :  { %1938 = vmatpush1.bf16.msra.mxu0 %v2481_v63  ;;  %1979 = vmatpush1.bf16.msra.mxu1 %v2484_v0 }
 0x184   :  { %1939 = vmatprep.subr.bf16.mxu0 %v2489_v1  ;;  %1980 = vmatprep.subr.bf16.mxu1 %v2492_v2 }
 0x187   :  { %1940 = vmatpush1.bf16.msra.mxu0 %v2487_v3  ;;  %1981 = vmatpush1.bf16.msra.mxu1 %v2490_v4 }
 0x188   :  { %1941 = vmatprep.subr.bf16.mxu0 %v2495_v5  ;;  %1982 = vmatprep.subr.bf16.mxu1 %v2498_v6 }
 0x18b   :  { %1942 = vmatpush1.bf16.msra.mxu0 %v2493_v7  ;;  %1983 = vmatpush1.bf16.msra.mxu1 %v2496_v8 }
 0x18c   :  { %1943 = vmatprep.subr.bf16.mxu0 %v2501_v12  ;;  %1984 = vmatprep.subr.bf16.mxu1 %v2504_v15 }
 0x18f   :  { %1944 = vmatpush1.bf16.msra.mxu0 %v2499_v16  ;;  %1985 = vmatpush1.bf16.msra.mxu1 %v2502_v17 }
 0x190   :  { %1945 = vmatprep.subr.bf16.mxu0 %v2507_v18  ;;  %1986 = vmatprep.subr.bf16.mxu1 %v2510_v19  ;;  %v82_v19 = vld [vmem:[%s2829_s4] sm:$0x3] }
 0x191   :  { %v2017_v31 = vrot.slane %v82_v19, %v2781_v14 }
 0x193   :  { %1946 = vmatpush1.bf16.msra.mxu0 %v2505_v20  ;;  %1987 = vmatpush1.bf16.msra.mxu1 %v2508_v21 }
 0x194   :  { %1947 = vmatprep.subr.bf16.mxu0 %v2513_v13  ;;  %1988 = vmatprep.subr.bf16.mxu1 %v2516_v22 }
 0x197   :  { %1948 = vmatpush1.bf16.msra.mxu0 %v2511_v23  ;;  %1989 = vmatpush1.bf16.msra.mxu1 %v2514_v24 }
 0x198   :  { %1949 = vmatprep.subr.bf16.mxu0 %v2519_v25  ;;  %1990 = vmatprep.subr.bf16.mxu1 %v2522_v26 }
 0x19b   :  { %1950 = vmatpush1.bf16.msra.mxu0 %v2517_v27  ;;  %1991 = vmatpush1.bf16.msra.mxu1 %v2520_v28  ;;  %v2013_v28 = vrot.slane %v82_v19, %v2775_v10 }
 0x19c   :  { %1951 = vmatprep.subr.bf16.mxu0 %v2525_v29  ;;  %1992 = vmatprep.subr.bf16.mxu1 %v2528_v30 }
 0x19f   :  { %1952 = vmatpush1.bf16.msra.mxu0 %v2523_v32  ;;  %1993 = vmatpush1.bf16.msra.mxu1 %v2526_v35  ;;  %v2543_v32 = vld [vmem:[#allocation2] sm:$0xff] }
 0x1a0   :  { %1953 = vmatprep.subr.bf16.mxu0 %v2531_v37  ;;  %1994 = vmatprep.subr.bf16.mxu1 %v2534_v38 }
 0x1a1   :  { %v1011_v45 = vpop.f32.mrb[4].mxu0  ;;  %v1052_v47 = vpop.f32.mrb[4].mxu1 }
 0x1a2   :  { %v1012_v46 = vadd.f32 %v1011_v45, %v234_v39  ;;  %v1013_v48 = vpop.f32.mrb[5].mxu0  ;;  %v1053_v49 = vadd.f32 %v1052_v47, %v242_v40  ;;  %v1054_v51 = vpop.f32.mrb[5].mxu1  ;;  %v80_v47 = vld [vmem:[%s2830_s5] sm:$0x3]  ;;  %s2633_s5 = scalar_lea.vmem %s2074_s8, 256 }
 0x1a3   :  { %v1014_v50 = vadd.f32 %v1013_v48, %v238_v41  ;;  %v1015_v52 = vpop.f32.mrb[6].mxu0  ;;  %1954 = vmatpush1.bf16.msra.mxu0 %v2529_v42  ;;  %v1055_v55 = vadd.f32 %v1054_v51, %v246_v57  ;;  %v1056_v56 = vpop.f32.mrb[6].mxu1  ;;  %1995 = vmatpush1.bf16.msra.mxu1 %v2532_v43  ;;  %v81_v48 = vld [vmem:[%s2831_s6] sm:$0x3]  ;;  %p2634_p4 = scmp.ne.s32.totalorder %s2074_s8, %s2633_s5  ;;  %p2639_p6 = scmp.lt.s32.totalorder %s2633_s5, %s2633_s5 }
 0x1a4   :  { %v1063_v54 = vmax.f32 %v1012_v46, 0.0  ;;  %v1016_v11 = vpop.f32.mrb[7].mxu0  ;;  %1955 = vmatprep.subr.bf16.mxu0 %v2537_v44  ;;  %v1065_v59 = vmax.f32 %v1053_v49, 0.0  ;;  %v1057_v61 = vpop.f32.mrb[7].mxu1  ;;  %1996 = vmatprep.subr.bf16.mxu1 %v2540_v9  ;;  %v2043_v49 = vrot.slane %v80_v47, %v2775_v10 }
 0x1a5   :  { %v1064_v60 = vmax.f32 %v1014_v50, 0.0  ;;  %v1066_v62 = vmax.f32 %v1055_v55, 0.0  ;;  %v2047_v50 = vrot.slane %v80_v47, %v2781_v14  ;;  %v2060_v55 = vrot.slane %v81_v48, %v2781_v14  ;;  %p2640_p7 = por %p2639_p6, %p2638_p5 }
 0x1a6   :  { %v1073_v63 = vpack.c.bf16 %v1065_v59, %v1065_v59  ;;  %v1071_v1 = vpack.c.bf16 %v1063_v54, %v1063_v54  ;;  %v2056_v54 = vrot.slane %v81_v48, %v2775_v10 }
 0x1a7   :  { %v1072_v0 = vpack.c.bf16 %v1064_v60, %v1064_v60  ;;  %1956 = vmatpush1.bf16.msra.mxu0 %v2535_v53  ;;  %v1074_v2 = vpack.c.bf16 %v1066_v62, %v1066_v62  ;;  %1997 = vmatpush1.bf16.msra.mxu1 %v2538_v58  ;;  %p2641_p8 = pnand %p2640_p7, %p2634_p4 }
 0x1a9   :  { %1957 = vmatprep.mubr.bf16.mxu0 %v1072_v0  ;;  %1998 = vmatprep.mubr.bf16.mxu1 %v1074_v2 }
 0x1aa   :  { %1958 = vmatmul.mubr.bf16.vlgmr.msra.gmra.mrb[12].mxu0 %v1071_v1  ;;  %1999 = vmatmul.mubr.bf16.vlgmr.msra.gmra.mrb[12].mxu1 %v1073_v63 }
 0x23d   :  { %v1877_v3 = vpop.f32.mrb[8].mxu0  ;;  %v1918_v4 = vpop.f32.mrb[8].mxu1 }
 0x23e   :  { %v1879_v5 = vpop.f32.mrb[9].mxu0  ;;  %v1919_v6 = vadd.f32 %v1918_v4, %v1877_v3  ;;  %v1920_v7 = vpop.f32.mrb[9].mxu1 }
 0x23f   :  { %v1881_v8 = vpop.f32.mrb[10].mxu0  ;;  %v1921_v12 = vadd.f32 %v1920_v7, %v1879_v5  ;;  %v1922_v15 = vpop.f32.mrb[10].mxu1 }
 0x240   :  { %v1882_v16 = vpop.f32.mrb[11].mxu0  ;;  %v1923_v17 = vpop.f32.mrb[11].mxu1 }
 0x27d   :  { %v1959_v18 = vpop.f32.mrb[12].mxu0  ;;  %v2000_v21 = vpop.f32.mrb[12].mxu1 }
 0x27e   :  { %v1960_v20 = vadd.f32 %v1959_v18, %v1919_v6  ;;  %v1961_v13 = vpop.f32.mrb[13].mxu0  ;;  %v2002_v23 = vpop.f32.mrb[13].mxu1 }
 0x27f   :  { %v1962_v22 = vadd.f32 %v1961_v13, %v1921_v12  ;;  %v1963_v24 = vpop.f32.mrb[14].mxu0  ;;  %v2004_v26 = vpop.f32.mrb[14].mxu1 }
 0x280   :  { %v2001_v25 = vadd.f32 %v2000_v21, %v1960_v20  ;;  %v1964_v27 = vpop.f32.mrb[15].mxu0  ;;  %v2005_v30 = vpop.f32.mrb[15].mxu1 }
 0x281   :  { %v2003_v29 = vadd.f32 %v2002_v23, %v1962_v22 }
 0x282   :  { %v2007_v33 = vadd.f32 %v2543_v32, %v2001_v25 }
 0x283   :  { %v2008_v35 = vadd.f32 %v2544_v34, %v2003_v29 }
 0x284   :  { %v2020_v36 = vadd.f32 %v2013_v28, %v2007_v33 }
 0x285   :  { %v2021_v37 = vadd.f32 %v2017_v31, %v2008_v35 }
 0x287   :  { %v2022_v38 = vadd.f32 %v2021_v37, %v2020_v36 }
 0x289   :  { %2023 = vadd.xlane.f32.xlu0 %v2022_v38 }
 0x316   :  { %v2024_v39 = vpop.xlane.xlu0 %2023 }
 0x317   :  { %v2026_v40 = vmul.f32 0.00390625, %v2024_v39 }
 0x319   :  { %v2027_v41 = vsub.f32 %v2020_v36, %v2026_v40  ;;  %v2028_v42 = vsub.f32 %v2021_v37, %v2026_v40 }
 0x31b   :  { %v2029_v57 = vmul.f32 %v2027_v41, %v2027_v41  ;;  %v2030_v43 = vmul.f32 %v2028_v42, %v2028_v42 }
 0x31d   :  { %v2031_v44 = vadd.f32 %v2030_v43, %v2029_v57 }
 0x31f   :  { %2032 = vadd.xlane.f32.xlu0 %v2031_v44 }
 0x3ac   :  { %v2033_v45 = vpop.xlane.xlu0 %2032 }
 0x3ad   :  { %v2034_v9 = vmul.f32 0.00390625, %v2033_v45 }
 0x3af   :  { %v2035_v46 = vadd.f32 1e-05, %v2034_v9 }
 0x3b1   :  { %2541 = vrsqrt.f32 %v2035_v46 }
 0x3bb   :  { %v2542_v51 = vpop.eup %2541 }
 0x3bc   :  { %v2037_v52 = vmul.f32 %v2542_v51, %v2027_v41  ;;  %v2038_v53 = vmul.f32 %v2542_v51, %v2028_v42 }
 0x3be   :  { %v2050_v56 = vmul.f32 %v2043_v49, %v2037_v52  ;;  %v2051_v11 = vmul.f32 %v2047_v50, %v2038_v53 }
 0x3c0   :  { %v2063_v58 = vadd.f32 %v2056_v54, %v2050_v56  ;;  %v2064_v59 = vadd.f32 %v2060_v55, %v2051_v11 }
 0x3c2   :  { %2065 = vst [vmem:[#allocation10] sm:$0xff] %v2063_v58  ;;  %2066 = vst [vmem:[#allocation10 + $0x8] sm:$0xff] %v2064_v59 }
 0x3c3   :  { %2644 = shalt.err (!%p2641_p8)
}
 0x3c4   :  { %s2645_s10 = scalar_lea.hbm %s2832_s7, 256 }
 0x3c5   :  { %p2646_p9 = scmp.ne.s32.totalorder %s2832_s7, %s2645_s10  ;;  %p2649_p10 = scmp.lt.u32.totalorder %s2645_s10, %s2832_s7 }
 0x3c7   :  { %p2651_p11 = pnand %p2649_p10, %p2646_p9 }
 0x3c9   :  { %2654 = shalt.err (!%p2651_p11)
}
 0x3ca   :  { %2076 = dma.vmem_to_hbm [thread:$0]  %s2074_s8, 256, %s2832_s7, [#allocation4]  }
 0x3cb   :  { %2661 = dma.done.wait [#allocation4], 256  }
 0x3cc   :  { %2662 = vsyncadd [#allocation4], 4294967040 }
 0x3cd   :  { %2080 = vsyncpa [#allocation3], 1 }
 0x3ce   :  { %2081 = vsyncpa [#allocation6], 1 }
 0x3cf   :  { %2082 = vsyncpa [#allocation9], 1 }
 0x3d0   :  { %2083 = vsyncpa [#allocation4], 1 }

// kernel: tpu_custom_call.1
= control target key start
LH: loop header
LB: loop body
LE: loop exit
PB: predicated region body
PF: predicated region fallthrough
CT: control target
= control target key end

     0   :  { %12 = vsyncpa [#allocation3], 0  ;;  %s2825_s0 = inlined_call_operand.hbm [shape: f32[8,256], index: 0, kind: input, shape index: {}]   ;;  %s2826_s1 = inlined_call_operand.hbm [shape: bf16[256,1024], index: 1, kind: input, shape index: {}]   ;;  %s2827_s2 = inlined_call_operand.hbm [shape: f32[1,1024], index: 2, kind: input, shape index: {}]   ;;  %s2828_s3 = inlined_call_operand.hbm [shape: bf16[1024,256], index: 3, kind: input, shape index: {}]   ;;  %s2829_s4 = inlined_call_operand.vmem [shape: f32[1,256], index: 4, kind: input, shape index: {}]   ;;  %s2830_s5 = inlined_call_operand.vmem [shape: f32[1,256], index: 5, kind: input, shape index: {}]   ;;  %s2831_s6 = inlined_call_operand.vmem [shape: f32[1,256], index: 6, kind: input, shape index: {}]   ;;  %s2832_s7 = inlined_call_operand.hbm [shape: f32[8,256], index: 7, kind: output, shape index: {}]  }
   0x1   :  { %13 = vsyncpa [#allocation6], 0 }
   0x2   :  { %14 = vsyncpa [#allocation9], 0 }
   0x3   :  { %15 = vsyncpa [#allocation4], 0  ;;  %s2663_s24 = smov [#allocation5]   ;;  %s2545_s28 = scalar_lea.hbm %s2826_s1, 16384 }
   0x4   :  { %s31_s25 = sshll.u32 %s2663_s24, 4  ;;  %p2546_p0 = scmp.ne.s32.totalorder %s2826_s1, %s2545_s28  ;;  %s32_s25 = int_to_ptr.vmem [resolvable:$true] %s31_s25 }
   0x5   :  { %p2549_p1 = scmp.lt.u32.totalorder %s2545_s28, %s2826_s1 }
   0x7   :  { %p2551_p2 = pnand %p2549_p1, %p2546_p0 }
   0x9   :  { %2554 = shalt.err (!%p2551_p2)
}
   0xa   :  { %s2555_s10 = scalar_lea.vmem %s32_s25, 16384  ;;  %p2560_p4 = scmp.lt.s32.totalorder %s32_s25, %s32_s25 }
   0xb   :  { %p2556_p3 = scmp.ne.s32.totalorder %s32_s25, %s2555_s10  ;;  %p2561_p5 = scmp.lt.s32.totalorder %s2555_s10, %s2555_s10 }
   0xd   :  { %p2562_p6 = por %p2561_p5, %p2560_p4 }
   0xf   :  { %p2563_p7 = pnand %p2562_p6, %p2556_p3 }
  0x11   :  { %2566 = shalt.err (!%p2563_p7)
}
  0x12   :  { %s2664_s11 = smov 512   ;;  %s2665_s12 = smov 32  }
  0x13   :  { %37 = dma.hbm_to_vmem [thread:$0]  %s2826_s1, 16384, %s32_s25, [#allocation6], %s2664_s11, %s2664_s11, %s2665_s12  }
  0x14   :  { %s2666_s15 = smov [#allocation2]   ;;  %s2667_s17 = smov [#allocation7]  }
  0x15   :  { %s22_s16 = sshll.u32 %s2666_s15, 4  ;;  %s44_s18 = sshll.u32 %s2667_s17, 4  ;;  %s23_s16 = int_to_ptr.vmem [resolvable:$true] %s22_s16  ;;  %s45_s18 = int_to_ptr.vmem [resolvable:$true] %s44_s18 }
  0x16   :  { %s2567_s21 = scalar_lea.hbm %s2825_s0, 256 }
  0x17   :  { %p2568_p8 = scmp.ne.s32.totalorder %s2825_s0, %s2567_s21  ;;  %p2571_p9 = scmp.lt.u32.totalorder %s2567_s21, %s2825_s0 }
  0x19   :  { %p2573_p10 = pnand %p2571_p9, %p2568_p8 }
  0x1b   :  { %2576 = shalt.err (!%p2573_p10)
}
  0x1c   :  { %s2577_s1 = scalar_lea.vmem %s23_s16, 256  ;;  %p2582_p12 = scmp.lt.s32.totalorder %s23_s16, %s23_s16 }
  0x1d   :  { %p2578_p11 = scmp.ne.s32.totalorder %s23_s16, %s2577_s1  ;;  %p2583_p13 = scmp.lt.s32.totalorder %s2577_s1, %s2577_s1 }
  0x1f   :  { %p2584_p0 = por %p2583_p13, %p2582_p12 }
  0x21   :  { %p2585_p1 = pnand %p2584_p0, %p2578_p11 }
  0x23   :  { %2588 = shalt.err (!%p2585_p1)
}
  0x24   :  { %25 = dma.hbm_to_vmem [thread:$0]  %s2825_s0, 256, %s23_s16, [#allocation3]  }
  0x25   :  { %s2589_s30 = scalar_lea.hbm %s2827_s2, 128 }
  0x26   :  { %p2590_p2 = scmp.ne.s32.totalorder %s2827_s2, %s2589_s30  ;;  %p2593_p3 = scmp.lt.u32.totalorder %s2589_s30, %s2827_s2 }
  0x28   :  { %p2595_p4 = pnand %p2593_p3, %p2590_p2 }
  0x2a   :  { %2598 = shalt.err (!%p2595_p4)
}
  0x2b   :  { %s2599_s12 = scalar_lea.vmem %s45_s18, 128  ;;  %p2604_p6 = scmp.lt.s32.totalorder %s45_s18, %s45_s18 }
  0x2c   :  { %p2600_p5 = scmp.ne.s32.totalorder %s45_s18, %s2599_s12  ;;  %p2605_p7 = scmp.lt.s32.totalorder %s2599_s12, %s2599_s12 }
  0x2e   :  { %p2606_p8 = por %p2605_p7, %p2604_p6 }
  0x30   :  { %p2607_p9 = pnand %p2606_p8, %p2600_p5 }
  0x32   :  { %2610 = shalt.err (!%p2607_p9)
}
  0x33   :  { %47 = dma.hbm_to_vmem [thread:$0]  %s2827_s2, 128, %s45_s18, [#allocation6]  }
  0x34   :  { %s2668_s14 = smov [#allocation8]   ;;  %s2611_s19 = scalar_lea.hbm %s2828_s3, 16384 }
  0x35   :  { %s53_s15 = sshll.u32 %s2668_s14, 4  ;;  %p2612_p10 = scmp.ne.s32.totalorder %s2828_s3, %s2611_s19  ;;  %s54_s15 = int_to_ptr.vmem [resolvable:$true] %s53_s15 }
  0x36   :  { %p2615_p11 = scmp.lt.u32.totalorder %s2611_s19, %s2828_s3 }
  0x38   :  { %p2617_p12 = pnand %p2615_p11, %p2612_p10 }
  0x3a   :  { %2620 = shalt.err (!%p2617_p12)
}
  0x3b   :  { %s2621_s24 = scalar_lea.vmem %s54_s15, 16384  ;;  %p2626_p0 = scmp.lt.s32.totalorder %s54_s15, %s54_s15 }
  0x3c   :  { %p2622_p13 = scmp.ne.s32.totalorder %s54_s15, %s2621_s24  ;;  %p2627_p1 = scmp.lt.s32.totalorder %s2621_s24, %s2621_s24 }
  0x3e   :  { %p2628_p2 = por %p2627_p1, %p2626_p0 }
  0x40   :  { %p2629_p3 = pnand %p2628_p2, %p2622_p13 }
  0x42   :  { %2632 = shalt.err (!%p2629_p3)
}
  0x43   :  { %s2669_s2 = smov 128   ;;  %s2670_s18 = smov 8  }
  0x44   :  { %59 = dma.hbm_to_vmem [thread:$0]  %s2828_s3, 16384, %s54_s15, [#allocation9], %s2669_s2, %s2669_s2, %s2670_s18  }
  0x45   :  { %2655 = dma.done.wait [#allocation3], 256  }
  0x46   :  { %2656 = vsyncadd [#allocation3], 4294967040 }
  0x47   :  { %2657 = dma.done.wait [#allocation6], 16512  }
  0x48   :  { %2658 = vsyncadd [#allocation6], 4294950784 }
  0x49   :  { %2659 = dma.done.wait [#allocation9], 16384  }
  0x4a   :  { %2660 = vsyncadd [#allocation9], 4294950912  ;;  %v85_v0 = vld [vmem:[#allocation5] sm:$0xff]  ;;  %v86_v2 = vld [vmem:[#allocation5 + $0x8] sm:$0xff]  ;;  %s2671_s30 = smov [#allocation10]  }
  0x4b   :  { %v89_v1 = vld [vmem:[#allocation5 + $0x20] sm:$0xff]  ;;  %v90_v4 = vld [vmem:[#allocation5 + $0x28] sm:$0xff]  ;;  %v79_v53 = vld [vmem:[#allocation2 + $0x8] sm:$0xff]  ;;  %s2073_s8 = sshll.u32 %s2671_s30, 4  ;;  %s2074_s8 = int_to_ptr.vmem [resolvable:$true] %s2073_s8 }
  0x4c   :  { %v2085_v3 = vcombine.high %v85_v0, %v89_v1  ;;  %v2084_v5 = vcombine.low %v85_v0, %v89_v1  ;;  %v93_v6 = vld [vmem:[#allocation5 + $0x40] sm:$0xff]  ;;  %v2087_v8 = vcombine.high %v86_v2, %v90_v4  ;;  %v2086_v9 = vcombine.low %v86_v2, %v90_v4  ;;  %v94_v11 = vld [vmem:[#allocation5 + $0x48] sm:$0xff]  ;;  %p2638_p5 = scmp.lt.s32.totalorder %s2074_s8, %s2074_s8 }
  0x4d   :  { %v97_v7 = vld [vmem:[#allocation5 + $0x60] sm:$0xff]  ;;  %v98_v12 = vld [vmem:[#allocation5 + $0x68] sm:$0xff]  ;;  %v2760_v57 = vpack.c.bf16 %v79_v53, %v79_v53 }
  0x4e   :  { %v2093_v10 = vcombine.high %v93_v6, %v97_v7  ;;  %v101_v13 = vld [vmem:[#allocation5 + $0x80] sm:$0xff]  ;;  %895 = vmatprep.subr.bf16.mxu0 %v2085_v3  ;;  %v2095_v14 = vcombine.high %v94_v11, %v98_v12  ;;  %v102_v16 = vld [vmem:[#allocation5 + $0x88] sm:$0xff]  ;;  %936 = vmatprep.subr.bf16.mxu1 %v2087_v8  ;;  %v2092_v18 = vcombine.low %v93_v6, %v97_v7 }
  0x4f   :  { %v105_v15 = vld [vmem:[#allocation5 + $0xa0] sm:$0xff]  ;;  %v106_v17 = vld [vmem:[#allocation5 + $0xa8] sm:$0xff]  ;;  %896 = vmatpush1.bf16.msra.mxu0 %v2084_v5  ;;  %937 = vmatpush1.bf16.msra.mxu1 %v2086_v9  ;;  %v2094_v19 = vcombine.low %v94_v11, %v98_v12 }
  0x50   :  { %897 = vmatprep.subr.bf16.mxu0 %v2093_v10  ;;  %v2101_v20 = vcombine.high %v101_v13, %v105_v15  ;;  %938 = vmatprep.subr.bf16.mxu1 %v2095_v14  ;;  %v2103_v21 = vcombine.high %v102_v16, %v106_v17  ;;  %v109_v22 = vld [vmem:[#allocation5 + $0xc0] sm:$0xff]  ;;  %v110_v24 = vld [vmem:[#allocation5 + $0xc8] sm:$0xff]  ;;  %v2100_v26 = vcombine.low %v101_v13, %v105_v15 }
  0x51   :  { %v113_v23 = vld [vmem:[#allocation5 + $0xe0] sm:$0xff]  ;;  %v114_v25 = vld [vmem:[#allocation5 + $0xe8] sm:$0xff]  ;;  %v2102_v27 = vcombine.low %v102_v16, %v106_v17  ;;  %927 = vmatprep.mubr.bf16.mxu0 %v2760_v57  ;;  %968 = vmatprep.mubr.bf16.mxu1 %v2760_v57 }
  0x52   :  { %v2109_v28 = vcombine.high %v109_v22, %v113_v23  ;;  %v2111_v29 = vcombine.high %v110_v24, %v114_v25  ;;  %v117_v30 = vld [vmem:[#allocation5 + $0x100] sm:$0xff]  ;;  %v118_v32 = vld [vmem:[#allocation5 + $0x108] sm:$0xff]  ;;  %v2108_v34 = vcombine.low %v109_v22, %v113_v23  ;;  %v2110_v35 = vcombine.low %v110_v24, %v114_v25 }
  0x53   :  { %898 = vmatpush1.bf16.msra.mxu0 %v2092_v18  ;;  %939 = vmatpush1.bf16.msra.mxu1 %v2094_v19  ;;  %v121_v31 = vld [vmem:[#allocation5 + $0x120] sm:$0xff]  ;;  %v122_v33 = vld [vmem:[#allocation5 + $0x128] sm:$0xff] }
  0x54   :  { %899 = vmatprep.subr.bf16.mxu0 %v2101_v20  ;;  %940 = vmatprep.subr.bf16.mxu1 %v2103_v21  ;;  %v2117_v36 = vcombine.high %v117_v30, %v121_v31  ;;  %v2119_v37 = vcombine.high %v118_v32, %v122_v33  ;;  %v125_v38 = vld [vmem:[#allocation5 + $0x140] sm:$0xff]  ;;  %v126_v40 = vld [vmem:[#allocation5 + $0x148] sm:$0xff]  ;;  %v2116_v42 = vcombine.low %v117_v30, %v121_v31 }
  0x55   :  { %v129_v39 = vld [vmem:[#allocation5 + $0x160] sm:$0xff]  ;;  %v130_v41 = vld [vmem:[#allocation5 + $0x168] sm:$0xff]  ;;  %v2118_v43 = vcombine.low %v118_v32, %v122_v33 }
  0x56   :  { %v2125_v44 = vcombine.high %v125_v38, %v129_v39  ;;  %v2127_v45 = vcombine.high %v126_v40, %v130_v41  ;;  %v133_v46 = vld [vmem:[#allocation5 + $0x180] sm:$0xff]  ;;  %v134_v48 = vld [vmem:[#allocation5 + $0x188] sm:$0xff]  ;;  %v2124_v50 = vcombine.low %v125_v38, %v129_v39  ;;  %v2126_v51 = vcombine.low %v126_v40, %v130_v41 }
  0x57   :  { %900 = vmatpush1.bf16.msra.mxu0 %v2100_v26  ;;  %941 = vmatpush1.bf16.msra.mxu1 %v2102_v27  ;;  %v137_v47 = vld [vmem:[#allocation5 + $0x1a0] sm:$0xff]  ;;  %v138_v49 = vld [vmem:[#allocation5 + $0x1a8] sm:$0xff] }
  0x58   :  { %901 = vmatprep.subr.bf16.mxu0 %v2109_v28  ;;  %942 = vmatprep.subr.bf16.mxu1 %v2111_v29  ;;  %v2133_v52 = vcombine.high %v133_v46, %v137_v47  ;;  %v2135_v54 = vcombine.high %v134_v48, %v138_v49  ;;  %v141_v55 = vld [vmem:[#allocation5 + $0x1c0] sm:$0xff]  ;;  %v142_v58 = vld [vmem:[#allocation5 + $0x1c8] sm:$0xff]  ;;  %v2132_v60 = vcombine.low %v133_v46, %v137_v47 }
  0x59   :  { %v145_v56 = vld [vmem:[#allocation5 + $0x1e0] sm:$0xff]  ;;  %v146_v59 = vld [vmem:[#allocation5 + $0x1e8] sm:$0xff]  ;;  %v2134_v61 = vcombine.low %v134_v48, %v138_v49 }
  0x5a   :  { %v2141_v62 = vcombine.high %v141_v55, %v145_v56  ;;  %v2143_v63 = vcombine.high %v142_v58, %v146_v59  ;;  %v149_v0 = vld [vmem:[#allocation5 + $0x200] sm:$0xff]  ;;  %v150_v2 = vld [vmem:[#allocation5 + $0x208] sm:$0xff]  ;;  %v2140_v4 = vcombine.low %v141_v55, %v145_v56  ;;  %v2142_v5 = vcombine.low %v142_v58, %v146_v59 }
  0x5b   :  { %902 = vmatpush1.bf16.msra.mxu0 %v2108_v34  ;;  %943 = vmatpush1.bf16.msra.mxu1 %v2110_v35  ;;  %v153_v1 = vld [vmem:[#allocation5 + $0x220] sm:$0xff]  ;;  %v154_v3 = vld [vmem:[#allocation5 + $0x228] sm:$0xff] }
  0x5c   :  { %903 = vmatprep.subr.bf16.mxu0 %v2117_v36  ;;  %944 = vmatprep.subr.bf16.mxu1 %v2119_v37  ;;  %v2149_v6 = vcombine.high %v149_v0, %v153_v1  ;;  %v2151_v7 = vcombine.high %v150_v2, %v154_v3  ;;  %v157_v8 = vld [vmem:[#allocation5 + $0x240] sm:$0xff]  ;;  %v158_v10 = vld [vmem:[#allocation5 + $0x248] sm:$0xff]  ;;  %v2148_v12 = vcombine.low %v149_v0, %v153_v1  ;;  %v87_v0 = vld [vmem:[#allocation5 + $0x10] sm:$0xff] }
  0x5d   :  { %v161_v9 = vld [vmem:[#allocation5 + $0x260] sm:$0xff]  ;;  %v162_v11 = vld [vmem:[#allocation5 + $0x268] sm:$0xff]  ;;  %v2150_v13 = vcombine.low %v150_v2, %v154_v3  ;;  %v91_v1 = vld [vmem:[#allocation5 + $0x30] sm:$0xff] }
  0x5e   :  { %v2157_v14 = vcombine.high %v157_v8, %v161_v9  ;;  %v2159_v15 = vcombine.high %v158_v10, %v162_v11  ;;  %v165_v16 = vld [vmem:[#allocation5 + $0x280] sm:$0xff]  ;;  %v166_v18 = vld [vmem:[#allocation5 + $0x288] sm:$0xff]  ;;  %v2156_v20 = vcombine.low %v157_v8, %v161_v9  ;;  %v2158_v21 = vcombine.low %v158_v10, %v162_v11  ;;  %v88_v3 = vld [vmem:[#allocation5 + $0x18] sm:$0xff] }
  0x5f   :  { %904 = vmatpush1.bf16.msra.mxu0 %v2116_v42  ;;  %945 = vmatpush1.bf16.msra.mxu1 %v2118_v43  ;;  %v169_v17 = vld [vmem:[#allocation5 + $0x2a0] sm:$0xff]  ;;  %v170_v19 = vld [vmem:[#allocation5 + $0x2a8] sm:$0xff]  ;;  %v2089_v8 = vcombine.high %v87_v0, %v91_v1  ;;  %v95_v9 = vld [vmem:[#allocation5 + $0x50] sm:$0xff] }
  0x60   :  { %905 = vmatprep.subr.bf16.mxu0 %v2125_v44  ;;  %946 = vmatprep.subr.bf16.mxu1 %v2127_v45  ;;  %v2165_v22 = vcombine.high %v165_v16, %v169_v17  ;;  %v2167_v23 = vcombine.high %v166_v18, %v170_v19  ;;  %v173_v24 = vld [vmem:[#allocation5 + $0x2c0] sm:$0xff]  ;;  %v174_v26 = vld [vmem:[#allocation5 + $0x2c8] sm:$0xff]  ;;  %v2164_v28 = vcombine.low %v165_v16, %v169_v17  ;;  %v99_v10 = vld [vmem:[#allocation5 + $0x70] sm:$0xff] }
  0x61   :  { %v177_v25 = vld [vmem:[#allocation5 + $0x2e0] sm:$0xff]  ;;  %v178_v27 = vld [vmem:[#allocation5 + $0x2e8] sm:$0xff]  ;;  %v2166_v29 = vcombine.low %v166_v18, %v170_v19  ;;  %v2097_v17 = vcombine.high %v95_v9, %v99_v10  ;;  %v103_v18 = vld [vmem:[#allocation5 + $0x90] sm:$0xff] }
  0x62   :  { %v2173_v30 = vcombine.high %v173_v24, %v177_v25  ;;  %v2175_v31 = vcombine.high %v174_v26, %v178_v27  ;;  %v181_v32 = vld [vmem:[#allocation5 + $0x300] sm:$0xff]  ;;  %v182_v34 = vld [vmem:[#allocation5 + $0x308] sm:$0xff]  ;;  %v2172_v36 = vcombine.low %v173_v24, %v177_v25  ;;  %v2174_v37 = vcombine.low %v174_v26, %v178_v27  ;;  %v107_v19 = vld [vmem:[#allocation5 + $0xb0] sm:$0xff] }
  0x63   :  { %906 = vmatpush1.bf16.msra.mxu0 %v2124_v50  ;;  %947 = vmatpush1.bf16.msra.mxu1 %v2126_v51  ;;  %v185_v33 = vld [vmem:[#allocation5 + $0x320] sm:$0xff]  ;;  %v186_v35 = vld [vmem:[#allocation5 + $0x328] sm:$0xff]  ;;  %v2105_v25 = vcombine.high %v103_v18, %v107_v19  ;;  %v111_v26 = vld [vmem:[#allocation5 + $0xd0] sm:$0xff] }
  0x64   :  { %907 = vmatprep.subr.bf16.mxu0 %v2133_v52  ;;  %948 = vmatprep.subr.bf16.mxu1 %v2135_v54  ;;  %v2181_v38 = vcombine.high %v181_v32, %v185_v33  ;;  %v189_v39 = vld [vmem:[#allocation5 + $0x340] sm:$0xff]  ;;  %v2183_v41 = vcombine.high %v182_v34, %v186_v35  ;;  %v190_v42 = vld [vmem:[#allocation5 + $0x348] sm:$0xff]  ;;  %v2180_v44 = vcombine.low %v181_v32, %v185_v33  ;;  %v115_v27 = vld [vmem:[#allocation5 + $0xf0] sm:$0xff] }
  0x65   :  { %v193_v40 = vld [vmem:[#allocation5 + $0x360] sm:$0xff]  ;;  %v194_v43 = vld [vmem:[#allocation5 + $0x368] sm:$0xff]  ;;  %v2182_v45 = vcombine.low %v182_v34, %v186_v35  ;;  %v2113_v33 = vcombine.high %v111_v26, %v115_v27  ;;  %v119_v34 = vld [vmem:[#allocation5 + $0x110] sm:$0xff] }
  0x66   :  { %v2189_v46 = vcombine.high %v189_v39, %v193_v40  ;;  %v197_v47 = vld [vmem:[#allocation5 + $0x380] sm:$0xff]  ;;  %v2191_v49 = vcombine.high %v190_v42, %v194_v43  ;;  %v198_v50 = vld [vmem:[#allocation5 + $0x388] sm:$0xff]  ;;  %v2188_v52 = vcombine.low %v189_v39, %v193_v40  ;;  %v2190_v53 = vcombine.low %v190_v42, %v194_v43  ;;  %v123_v35 = vld [vmem:[#allocation5 + $0x130] sm:$0xff] }
  0x67   :  { %908 = vmatpush1.bf16.msra.mxu0 %v2132_v60  ;;  %949 = vmatpush1.bf16.msra.mxu1 %v2134_v61  ;;  %v201_v48 = vld [vmem:[#allocation5 + $0x3a0] sm:$0xff]  ;;  %v202_v51 = vld [vmem:[#allocation5 + $0x3a8] sm:$0xff]  ;;  %v2112_v39 = vcombine.low %v111_v26, %v115_v27  ;;  %v127_v42 = vld [vmem:[#allocation5 + $0x150] sm:$0xff] }
  0x68   :  { %909 = vmatprep.subr.bf16.mxu0 %v2141_v62  ;;  %950 = vmatprep.subr.bf16.mxu1 %v2143_v63  ;;  %v2197_v54 = vcombine.high %v197_v47, %v201_v48  ;;  %v205_v55 = vld [vmem:[#allocation5 + $0x3c0] sm:$0xff]  ;;  %v2199_v58 = vcombine.high %v198_v50, %v202_v51  ;;  %v206_v59 = vld [vmem:[#allocation5 + $0x3c8] sm:$0xff]  ;;  %v2196_v61 = vcombine.low %v197_v47, %v201_v48  ;;  %v135_v47 = vld [vmem:[#allocation5 + $0x190] sm:$0xff] }
  0x69   :  { %v209_v56 = vld [vmem:[#allocation5 + $0x3e0] sm:$0xff]  ;;  %v210_v60 = vld [vmem:[#allocation5 + $0x3e8] sm:$0xff]  ;;  %v2198_v62 = vcombine.low %v198_v50, %v202_v51  ;;  %v139_v48 = vld [vmem:[#allocation5 + $0x1b0] sm:$0xff] }
  0x6a   :  { %v2205_v63 = vcombine.high %v205_v55, %v209_v56  ;;  %v2207_v2 = vcombine.high %v206_v59, %v210_v60  ;;  %v136_v51 = vld [vmem:[#allocation5 + $0x198] sm:$0xff]  ;;  %v179_v26 = vld [vmem:[#allocation5 + $0x2f0] sm:$0xff] }
  0x6b   :  { %910 = vmatpush1.bf16.msra.mxu0 %v2140_v4  ;;  %951 = vmatpush1.bf16.msra.mxu1 %v2142_v5  ;;  %v92_v4 = vld [vmem:[#allocation5 + $0x38] sm:$0xff]  ;;  %v2204_v5 = vcombine.low %v205_v55, %v209_v56  ;;  %v143_v55 = vld [vmem:[#allocation5 + $0x1d0] sm:$0xff] }
  0x6c   :  { %911 = vmatprep.subr.bf16.mxu0 %v2149_v6  ;;  %952 = vmatprep.subr.bf16.mxu1 %v2151_v7  ;;  %v78_v6 = vld [vmem:[#allocation2] sm:$0xff]  ;;  %v2206_v7 = vcombine.low %v206_v59, %v210_v60  ;;  %v2091_v11 = vcombine.high %v88_v3, %v92_v4  ;;  %v2090_v16 = vcombine.low %v88_v3, %v92_v4  ;;  %v144_v60 = vld [vmem:[#allocation5 + $0x1d8] sm:$0xff] }
  0x6d   :  { %v147_v56 = vld [vmem:[#allocation5 + $0x1f0] sm:$0xff]  ;;  %v2137_v59 = vcombine.high %v135_v47, %v139_v48  ;;  %v152_v4 = vld [vmem:[#allocation5 + $0x218] sm:$0xff] }
  0x6e   :  { %v2145_v3 = vcombine.high %v143_v55, %v147_v56 }
  0x6f   :  { %912 = vmatpush1.bf16.msra.mxu0 %v2148_v12  ;;  %953 = vmatpush1.bf16.msra.mxu1 %v2150_v13  ;;  %v96_v12 = vld [vmem:[#allocation5 + $0x58] sm:$0xff]  ;;  %v2764_v13 = vpack.c.bf16 %v78_v6, %v78_v6 }
  0x70   :  { %913 = vmatprep.subr.bf16.mxu0 %v2157_v14  ;;  %954 = vmatprep.subr.bf16.mxu1 %v2159_v15  ;;  %v100_v14 = vld [vmem:[#allocation5 + $0x78] sm:$0xff]  ;;  %v2088_v15 = vcombine.low %v87_v0, %v91_v1  ;;  %v151_v0 = vld [vmem:[#allocation5 + $0x210] sm:$0xff] }
  0x71   :  { %v2098_v24 = vcombine.low %v96_v12, %v100_v14  ;;  %v155_v1 = vld [vmem:[#allocation5 + $0x230] sm:$0xff] }
  0x73   :  { %914 = vmatpush1.bf16.msra.mxu0 %v2156_v20  ;;  %955 = vmatpush1.bf16.msra.mxu1 %v2158_v21  ;;  %v2099_v20 = vcombine.high %v96_v12, %v100_v14  ;;  %v104_v21 = vld [vmem:[#allocation5 + $0x98] sm:$0xff] }
  0x74   :  { %915 = vmatprep.subr.bf16.mxu0 %v2165_v22  ;;  %956 = vmatprep.subr.bf16.mxu1 %v2167_v23  ;;  %v108_v22 = vld [vmem:[#allocation5 + $0xb8] sm:$0xff]  ;;  %v2096_v23 = vcombine.low %v95_v9, %v99_v10  ;;  %v163_v9 = vld [vmem:[#allocation5 + $0x270] sm:$0xff] }
  0x75   :  { %v2106_v32 = vcombine.low %v104_v21, %v108_v22  ;;  %v160_v12 = vld [vmem:[#allocation5 + $0x258] sm:$0xff] }
  0x76   :  { %v164_v14 = vld [vmem:[#allocation5 + $0x278] sm:$0xff] }
  0x77   :  { %916 = vmatpush1.bf16.msra.mxu0 %v2164_v28  ;;  %957 = vmatpush1.bf16.msra.mxu1 %v2166_v29  ;;  %v2107_v28 = vcombine.high %v104_v21, %v108_v22  ;;  %v112_v29 = vld [vmem:[#allocation5 + $0xd8] sm:$0xff]  ;;  %v2162_v27 = vcombine.low %v160_v12, %v164_v14 }
  0x78   :  { %917 = vmatprep.subr.bf16.mxu0 %v2173_v30  ;;  %958 = vmatprep.subr.bf16.mxu1 %v2175_v31  ;;  %v116_v30 = vld [vmem:[#allocation5 + $0xf8] sm:$0xff]  ;;  %v2104_v31 = vcombine.low %v103_v18, %v107_v19  ;;  %v171_v18 = vld [vmem:[#allocation5 + $0x2b0] sm:$0xff] }
  0x79   :  { %v2114_v40 = vcombine.low %v112_v29, %v116_v30  ;;  %v168_v21 = vld [vmem:[#allocation5 + $0x298] sm:$0xff] }
  0x7a   :  { %v172_v22 = vld [vmem:[#allocation5 + $0x2b8] sm:$0xff] }
  0x7b   :  { %918 = vmatpush1.bf16.msra.mxu0 %v2172_v36  ;;  %959 = vmatpush1.bf16.msra.mxu1 %v2174_v37  ;;  %v2115_v36 = vcombine.high %v112_v29, %v116_v30  ;;  %v120_v37 = vld [vmem:[#allocation5 + $0x118] sm:$0xff] }
  0x7c   :  { %919 = vmatprep.subr.bf16.mxu0 %v2181_v38  ;;  %960 = vmatprep.subr.bf16.mxu1 %v2183_v41  ;;  %v124_v38 = vld [vmem:[#allocation5 + $0x138] sm:$0xff]  ;;  %v2121_v41 = vcombine.high %v119_v34, %v123_v35 }
  0x7d   :  { %v2123_v43 = vcombine.high %v120_v37, %v124_v38  ;;  %v176_v29 = vld [vmem:[#allocation5 + $0x2d8] sm:$0xff] }
  0x7e   :  { %v180_v30 = vld [vmem:[#allocation5 + $0x2f8] sm:$0xff] }
  0x7f   :  { %920 = vmatpush1.bf16.msra.mxu0 %v2180_v44  ;;  %961 = vmatpush1.bf16.msra.mxu1 %v2182_v45  ;;  %v128_v44 = vld [vmem:[#allocation5 + $0x158] sm:$0xff] }
  0x80   :  { %921 = vmatprep.subr.bf16.mxu0 %v2189_v46  ;;  %962 = vmatprep.subr.bf16.mxu1 %v2191_v49  ;;  %v132_v45 = vld [vmem:[#allocation5 + $0x178] sm:$0xff]  ;;  %v2120_v46 = vcombine.low %v119_v34, %v123_v35  ;;  %v2122_v49 = vcombine.low %v120_v37, %v124_v38  ;;  %v2179_v35 = vcombine.high %v176_v29, %v180_v30  ;;  %v187_v37 = vld [vmem:[#allocation5 + $0x330] sm:$0xff] }
  0x81   :  { %v184_v38 = vld [vmem:[#allocation5 + $0x318] sm:$0xff] }
  0x83   :  { %922 = vmatpush1.bf16.msra.mxu0 %v2188_v52  ;;  %963 = vmatpush1.bf16.msra.mxu1 %v2190_v53  ;;  %v140_v52 = vld [vmem:[#allocation5 + $0x1b8] sm:$0xff]  ;;  %v2131_v53 = vcombine.high %v128_v44, %v132_v45 }
  0x84   :  { %923 = vmatprep.subr.bf16.mxu0 %v2197_v54  ;;  %964 = vmatprep.subr.bf16.mxu1 %v2199_v58  ;;  %v2130_v58 = vcombine.low %v128_v44, %v132_v45  ;;  %v195_v44 = vld [vmem:[#allocation5 + $0x370] sm:$0xff]  ;;  %v192_v45 = vld [vmem:[#allocation5 + $0x358] sm:$0xff] }
  0x87   :  { %924 = vmatpush1.bf16.msra.mxu0 %v2196_v61  ;;  %965 = vmatpush1.bf16.msra.mxu1 %v2198_v62  ;;  %v148_v61 = vld [vmem:[#allocation5 + $0x1f8] sm:$0xff]  ;;  %v2139_v62 = vcombine.high %v136_v51, %v140_v52 }
  0x88   :  { %925 = vmatprep.subr.bf16.mxu0 %v2205_v63  ;;  %966 = vmatprep.subr.bf16.mxu1 %v2207_v2  ;;  %v2136_v63 = vcombine.low %v135_v47, %v139_v48  ;;  %v2138_v2 = vcombine.low %v136_v51, %v140_v52  ;;  %v2147_v6 = vcombine.high %v144_v60, %v148_v61  ;;  %v199_v51 = vld [vmem:[#allocation5 + $0x390] sm:$0xff] }
  0x89   :  { %v2146_v10 = vcombine.low %v144_v60, %v148_v61  ;;  %v203_v52 = vld [vmem:[#allocation5 + $0x3b0] sm:$0xff] }
  0x8a   :  { %v207_v60 = vld [vmem:[#allocation5 + $0x3d0] sm:$0xff] }
  0x8b   :  { %926 = vmatpush1.bf16.msra.mxu0 %v2204_v5  ;;  %967 = vmatpush1.bf16.msra.mxu1 %v2206_v7  ;;  %v156_v5 = vld [vmem:[#allocation5 + $0x238] sm:$0xff]  ;;  %v2144_v7 = vcombine.low %v143_v55, %v147_v56  ;;  %v211_v61 = vld [vmem:[#allocation5 + $0x3f0] sm:$0xff] }
  0x8c   :  { %977 = vmatprep.subr.bf16.mxu0 %v2089_v8  ;;  %1018 = vmatprep.subr.bf16.mxu1 %v2091_v11  ;;  %v159_v8 = vld [vmem:[#allocation5 + $0x250] sm:$0xff]  ;;  %v2153_v11 = vcombine.high %v151_v0, %v155_v1  ;;  %v2154_v19 = vcombine.low %v152_v4, %v156_v5 }
  0x8e   :  { %928 = vmatmul.mubr.bf16.vlgmr.msra.gmra.mrb[0].mxu0 %v2764_v13  ;;  %969 = vmatmul.mubr.bf16.vlgmr.msra.gmra.mrb[0].mxu1 %v2764_v13 }
  0x8f   :  { %978 = vmatpush1.bf16.msra.mxu0 %v2088_v15  ;;  %1019 = vmatpush1.bf16.msra.mxu1 %v2090_v16  ;;  %v2155_v15 = vcombine.high %v152_v4, %v156_v5  ;;  %v2152_v16 = vcombine.low %v151_v0, %v155_v1  ;;  %v2200_v0 = vcombine.low %v199_v51, %v203_v52 }
  0x90   :  { %979 = vmatprep.subr.bf16.mxu0 %v2097_v17  ;;  %1020 = vmatprep.subr.bf16.mxu1 %v2099_v20  ;;  %v167_v17 = vld [vmem:[#allocation5 + $0x290] sm:$0xff]  ;;  %v2161_v20 = vcombine.high %v159_v8, %v163_v9  ;;  %v2208_v4 = vcombine.low %v207_v60, %v211_v61 }
  0x91   :  { %1009 = vmatprep.mubr.bf16.mxu0 %v2760_v57  ;;  %1050 = vmatprep.mubr.bf16.mxu1 %v2760_v57  ;;  %v131_v57 = vld [vmem:[#allocation5 + $0x170] sm:$0xff] }
  0x92   :  { %v2129_v50 = vcombine.high %v127_v42, %v131_v57  ;;  %v2128_v54 = vcombine.low %v127_v42, %v131_v57 }
  0x93   :  { %980 = vmatpush1.bf16.msra.mxu0 %v2096_v23  ;;  %1021 = vmatpush1.bf16.msra.mxu1 %v2098_v24  ;;  %v2163_v23 = vcombine.high %v160_v12, %v164_v14  ;;  %v2160_v24 = vcombine.low %v159_v8, %v163_v9  ;;  %v2349_v8 = vld [vmem:[#allocation8] ss:$8 sps:$4 sm:$0xff]   ;;  %v2355_v12 = vld [vmem:[#allocation8 + $0x10] ss:$8 sps:$4 sm:$0xff]  }
  0x94   :  { %981 = vmatprep.subr.bf16.mxu0 %v2105_v25  ;;  %1022 = vmatprep.subr.bf16.mxu1 %v2107_v28  ;;  %v175_v25 = vld [vmem:[#allocation5 + $0x2d0] sm:$0xff]  ;;  %v2169_v28 = vcombine.high %v167_v17, %v171_v18  ;;  %v2358_v14 = vld [vmem:[#allocation8 + $0x110] ss:$8 sps:$4 sm:$0xff]  }
  0x95   :  { %v2177_v34 = vcombine.high %v175_v25, %v179_v26  ;;  %v2352_v9 = vld [vmem:[#allocation8 + $0x100] ss:$8 sps:$4 sm:$0xff]  }
  0x97   :  { %982 = vmatpush1.bf16.msra.mxu0 %v2104_v31  ;;  %1023 = vmatpush1.bf16.msra.mxu1 %v2106_v32  ;;  %v2171_v31 = vcombine.high %v168_v21, %v172_v22  ;;  %v2168_v32 = vcombine.low %v167_v17, %v171_v18  ;;  %v2361_v17 = vld [vmem:[#allocation8 + $0x20] ss:$8 sps:$4 sm:$0xff]  }
  0x98   :  { %983 = vmatprep.subr.bf16.mxu0 %v2113_v33  ;;  %1024 = vmatprep.subr.bf16.mxu1 %v2115_v36  ;;  %v2170_v33 = vcombine.low %v168_v21, %v172_v22  ;;  %v183_v36 = vld [vmem:[#allocation5 + $0x310] sm:$0xff]  ;;  %v2367_v21 = vld [vmem:[#allocation8 + $0x30] ss:$8 sps:$4 sm:$0xff]  }
  0x99   :  { %v2185_v42 = vcombine.high %v183_v36, %v187_v37  ;;  %v2184_v47 = vcombine.low %v183_v36, %v187_v37  ;;  %v2364_v18 = vld [vmem:[#allocation8 + $0x120] ss:$8 sps:$4 sm:$0xff]   ;;  %v2375_v22 = vld [vmem:[#allocation8 + $0x44] ss:$8 sps:$4 sm:$0xff]   ;;  %v2391_v36 = vld [vmem:[#allocation8 + $0x70] ss:$8 sps:$4 sm:$0xff]  }
  0x9a   :  { %v2394_v37 = vld [vmem:[#allocation8 + $0x170] ss:$8 sps:$4 sm:$0xff]  }
  0x9b   :  { %984 = vmatpush1.bf16.msra.mxu0 %v2112_v39  ;;  %1025 = vmatpush1.bf16.msra.mxu1 %v2114_v40  ;;  %v188_v39 = vld [vmem:[#allocation5 + $0x338] sm:$0xff]  ;;  %v2176_v40 = vcombine.low %v175_v25, %v179_v26  ;;  %v2376_v25 = vld [vmem:[#allocation8 + $0x140] ss:$8 sps:$4 sm:$0xff]  }
  0x9c   :  { %985 = vmatprep.subr.bf16.mxu0 %v2121_v41  ;;  %1026 = vmatprep.subr.bf16.mxu1 %v2123_v43  ;;  %v2178_v41 = vcombine.low %v176_v29, %v180_v30  ;;  %v2187_v57 = vcombine.high %v184_v38, %v188_v39  ;;  %v191_v43 = vld [vmem:[#allocation5 + $0x350] sm:$0xff]  ;;  %v2186_v48 = vcombine.low %v184_v38, %v188_v39  ;;  %v2381_v26 = vld [vmem:[#allocation8 + $0x54] ss:$8 sps:$4 sm:$0xff]   ;;  %v2382_v29 = vld [vmem:[#allocation8 + $0x150] ss:$8 sps:$4 sm:$0xff]  }
  0x9d   :  { %v2192_v55 = vcombine.low %v191_v43, %v195_v44  ;;  %v2387_v30 = vld [vmem:[#allocation8 + $0x64] ss:$8 sps:$4 sm:$0xff]  }
  0x9e   :  { %v2399_v38 = vld [vmem:[#allocation8 + $0x84] ss:$8 sps:$4 sm:$0xff]  }
  0x9f   :  { %986 = vmatpush1.bf16.msra.mxu0 %v2120_v46  ;;  %1027 = vmatpush1.bf16.msra.mxu1 %v2122_v49  ;;  %v196_v46 = vld [vmem:[#allocation5 + $0x378] sm:$0xff]  ;;  %v2193_v49 = vcombine.high %v191_v43, %v195_v44  ;;  %v2402_v39 = vld [vmem:[#allocation8 + $0x184] ss:$8 sps:$4 sm:$0xff]  }
  0xa0   :  { %987 = vmatprep.subr.bf16.mxu0 %v2129_v50  ;;  %1028 = vmatprep.subr.bf16.mxu1 %v2131_v53  ;;  %v2195_v50 = vcombine.high %v192_v45, %v196_v46  ;;  %v200_v53 = vld [vmem:[#allocation5 + $0x398] sm:$0xff]  ;;  %v2194_v56 = vcombine.low %v192_v45, %v196_v46  ;;  %v2411_v45 = vld [vmem:[#allocation8 + $0xa4] ss:$8 sps:$4 sm:$0xff]  }
  0xa1   :  { %v2403_v43 = vld [vmem:[#allocation8 + $0x90] ss:$8 sps:$4 sm:$0xff]   ;;  %v2414_v46 = vld [vmem:[#allocation8 + $0x1a4] ss:$8 sps:$4 sm:$0xff]  }
  0xa2   :  { %v2406_v44 = vld [vmem:[#allocation8 + $0x190] ss:$8 sps:$4 sm:$0xff]  }
  0xa3   :  { %988 = vmatpush1.bf16.msra.mxu0 %v2128_v54  ;;  %1029 = vmatpush1.bf16.msra.mxu1 %v2130_v58  ;;  %v204_v54 = vld [vmem:[#allocation5 + $0x3b8] sm:$0xff]  ;;  %v2201_v58 = vcombine.high %v199_v51, %v203_v52 }
  0xa4   :  { %989 = vmatprep.subr.bf16.mxu0 %v2137_v59  ;;  %1030 = vmatprep.subr.bf16.mxu1 %v2139_v62  ;;  %v2203_v59 = vcombine.high %v200_v53, %v204_v54  ;;  %v208_v62 = vld [vmem:[#allocation5 + $0x3d8] sm:$0xff]  ;;  %v2202_v1 = vcombine.low %v200_v53, %v204_v54  ;;  %v2423_v53 = vld [vmem:[#allocation8 + $0xc4] ss:$8 sps:$4 sm:$0xff]  }
  0xa5   :  { %v2415_v51 = vld [vmem:[#allocation8 + $0xb0] ss:$8 sps:$4 sm:$0xff]   ;;  %v2426_v54 = vld [vmem:[#allocation8 + $0x1c4] ss:$8 sps:$4 sm:$0xff]  }
  0xa6   :  { %v2418_v52 = vld [vmem:[#allocation8 + $0x1b0] ss:$8 sps:$4 sm:$0xff]  }
  0xa7   :  { %990 = vmatpush1.bf16.msra.mxu0 %v2136_v63  ;;  %1031 = vmatpush1.bf16.msra.mxu1 %v2138_v2  ;;  %v212_v63 = vld [vmem:[#allocation5 + $0x3f8] sm:$0xff]  ;;  %v2209_v2 = vcombine.high %v207_v60, %v211_v61 }
  0xa8   :  { %991 = vmatprep.subr.bf16.mxu0 %v2145_v3  ;;  %1032 = vmatprep.subr.bf16.mxu1 %v2147_v6  ;;  %v2211_v3 = vcombine.high %v208_v62, %v212_v63  ;;  %v2210_v5 = vcombine.low %v208_v62, %v212_v63  ;;  %v2351_v6 = vld [vmem:[#allocation8 + $0x4] ss:$8 sps:$4 sm:$0xff]   ;;  %v2427_v60 = vld [vmem:[#allocation8 + $0xd0] ss:$8 sps:$4 sm:$0xff]  }
  0xa9   :  { %v2430_v61 = vld [vmem:[#allocation8 + $0x1d0] ss:$8 sps:$4 sm:$0xff]   ;;  %v2435_v62 = vld [vmem:[#allocation8 + $0xe4] ss:$8 sps:$4 sm:$0xff]  }
  0xaa   :  { %v2438_v63 = vld [vmem:[#allocation8 + $0x1e4] ss:$8 sps:$4 sm:$0xff]  }
  0xab   :  { %992 = vmatpush1.bf16.msra.mxu0 %v2144_v7  ;;  %1033 = vmatpush1.bf16.msra.mxu1 %v2146_v10  ;;  %v2354_v7 = vld [vmem:[#allocation8 + $0x104] ss:$8 sps:$4 sm:$0xff]   ;;  %v2357_v10 = vld [vmem:[#allocation8 + $0x14] ss:$8 sps:$4 sm:$0xff]  }
  0xac   :  { %993 = vmatprep.subr.bf16.mxu0 %v2153_v11  ;;  %1034 = vmatprep.subr.bf16.mxu1 %v2155_v15  ;;  %v2360_v11 = vld [vmem:[#allocation8 + $0x114] ss:$8 sps:$4 sm:$0xff]   ;;  %v2363_v15 = vld [vmem:[#allocation8 + $0x24] ss:$8 sps:$4 sm:$0xff]  }
  0xaf   :  { %994 = vmatpush1.bf16.msra.mxu0 %v2152_v16  ;;  %1035 = vmatpush1.bf16.msra.mxu1 %v2154_v19  ;;  %v2366_v16 = vld [vmem:[#allocation8 + $0x124] ss:$8 sps:$4 sm:$0xff]   ;;  %v2369_v19 = vld [vmem:[#allocation8 + $0x34] ss:$8 sps:$4 sm:$0xff]  }
  0xb0   :  { %995 = vmatprep.subr.bf16.mxu0 %v2161_v20  ;;  %1036 = vmatprep.subr.bf16.mxu1 %v2163_v23  ;;  %v2372_v20 = vld [vmem:[#allocation8 + $0x134] ss:$8 sps:$4 sm:$0xff]   ;;  %v2378_v23 = vld [vmem:[#allocation8 + $0x144] ss:$8 sps:$4 sm:$0xff]  }
  0xb3   :  { %996 = vmatpush1.bf16.msra.mxu0 %v2160_v24  ;;  %1037 = vmatpush1.bf16.msra.mxu1 %v2162_v27  ;;  %v2373_v24 = vld [vmem:[#allocation8 + $0x40] ss:$8 sps:$4 sm:$0xff]   ;;  %v2384_v27 = vld [vmem:[#allocation8 + $0x154] ss:$8 sps:$4 sm:$0xff]  }
  0xb4   :  { %997 = vmatprep.subr.bf16.mxu0 %v2169_v28  ;;  %1038 = vmatprep.subr.bf16.mxu1 %v2171_v31  ;;  %v2379_v28 = vld [vmem:[#allocation8 + $0x50] ss:$8 sps:$4 sm:$0xff]   ;;  %v2390_v31 = vld [vmem:[#allocation8 + $0x164] ss:$8 sps:$4 sm:$0xff]  }
  0xb7   :  { %998 = vmatpush1.bf16.msra.mxu0 %v2168_v32  ;;  %1039 = vmatpush1.bf16.msra.mxu1 %v2170_v33  ;;  %v2385_v32 = vld [vmem:[#allocation8 + $0x60] ss:$8 sps:$4 sm:$0xff]  }
  0xb8   :  { %999 = vmatprep.subr.bf16.mxu0 %v2177_v34  ;;  %1040 = vmatprep.subr.bf16.mxu1 %v2179_v35  ;;  %v2388_v33 = vld [vmem:[#allocation8 + $0x160] ss:$8 sps:$4 sm:$0xff]   ;;  %v2393_v34 = vld [vmem:[#allocation8 + $0x74] ss:$8 sps:$4 sm:$0xff]  }
  0xb9   :  { %v2396_v35 = vld [vmem:[#allocation8 + $0x174] ss:$8 sps:$4 sm:$0xff]  }
  0xbb   :  { %1000 = vmatpush1.bf16.msra.mxu0 %v2176_v40  ;;  %1041 = vmatpush1.bf16.msra.mxu1 %v2178_v41  ;;  %v2397_v40 = vld [vmem:[#allocation8 + $0x80] ss:$8 sps:$4 sm:$0xff]  }
  0xbc   :  { %1001 = vmatprep.subr.bf16.mxu0 %v2185_v42  ;;  %1042 = vmatprep.subr.bf16.mxu1 %v2187_v57  ;;  %v2400_v41 = vld [vmem:[#allocation8 + $0x180] ss:$8 sps:$4 sm:$0xff]   ;;  %v2405_v42 = vld [vmem:[#allocation8 + $0x94] ss:$8 sps:$4 sm:$0xff]  }
  0xbd   :  { %v2408_v57 = vld [vmem:[#allocation8 + $0x194] ss:$8 sps:$4 sm:$0xff]  }
  0xbf   :  { %1002 = vmatpush1.bf16.msra.mxu0 %v2184_v47  ;;  %1043 = vmatpush1.bf16.msra.mxu1 %v2186_v48  ;;  %v2409_v47 = vld [vmem:[#allocation8 + $0xa0] ss:$8 sps:$4 sm:$0xff]  }
  0xc0   :  { %1003 = vmatprep.subr.bf16.mxu0 %v2193_v49  ;;  %1044 = vmatprep.subr.bf16.mxu1 %v2195_v50  ;;  %v2412_v48 = vld [vmem:[#allocation8 + $0x1a0] ss:$8 sps:$4 sm:$0xff]   ;;  %v2417_v49 = vld [vmem:[#allocation8 + $0xb4] ss:$8 sps:$4 sm:$0xff]  }
  0xc1   :  { %v2420_v50 = vld [vmem:[#allocation8 + $0x1b4] ss:$8 sps:$4 sm:$0xff]  }
  0xc3   :  { %1004 = vmatpush1.bf16.msra.mxu0 %v2192_v55  ;;  %1045 = vmatpush1.bf16.msra.mxu1 %v2194_v56  ;;  %v2421_v55 = vld [vmem:[#allocation8 + $0xc0] ss:$8 sps:$4 sm:$0xff]  }
  0xc4   :  { %1005 = vmatprep.subr.bf16.mxu0 %v2201_v58  ;;  %1046 = vmatprep.subr.bf16.mxu1 %v2203_v59  ;;  %v2424_v56 = vld [vmem:[#allocation8 + $0x1c0] ss:$8 sps:$4 sm:$0xff]   ;;  %v2429_v58 = vld [vmem:[#allocation8 + $0xd4] ss:$8 sps:$4 sm:$0xff]  }
  0xc5   :  { %v2432_v59 = vld [vmem:[#allocation8 + $0x1d4] ss:$8 sps:$4 sm:$0xff]  }
  0xc7   :  { %1006 = vmatpush1.bf16.msra.mxu0 %v2200_v0  ;;  %1047 = vmatpush1.bf16.msra.mxu1 %v2202_v1  ;;  %v2433_v0 = vld [vmem:[#allocation8 + $0xe0] ss:$8 sps:$4 sm:$0xff]  }
  0xc8   :  { %1007 = vmatprep.subr.bf16.mxu0 %v2209_v2  ;;  %1048 = vmatprep.subr.bf16.mxu1 %v2211_v3  ;;  %v2436_v1 = vld [vmem:[#allocation8 + $0x1e0] ss:$8 sps:$4 sm:$0xff]   ;;  %v2441_v2 = vld [vmem:[#allocation8 + $0xf4] ss:$8 sps:$4 sm:$0xff]  }
  0xc9   :  { %v2444_v3 = vld [vmem:[#allocation8 + $0x1f4] ss:$8 sps:$4 sm:$0xff]  }
  0xcb   :  { %1008 = vmatpush1.bf16.msra.mxu0 %v2208_v4  ;;  %1049 = vmatpush1.bf16.msra.mxu1 %v2210_v5  ;;  %v2439_v4 = vld [vmem:[#allocation8 + $0xf0] ss:$8 sps:$4 sm:$0xff]  }
  0xcc   :  { %1843 = vmatprep.subr.bf16.mxu0 %v2351_v6  ;;  %1884 = vmatprep.subr.bf16.mxu1 %v2354_v7  ;;  %v2442_v5 = vld [vmem:[#allocation8 + $0x1f0] ss:$8 sps:$4 sm:$0xff]   ;;  %v2447_v6 = vld [vmem:[#allocation8 + $0x204] ss:$8 sps:$4 sm:$0xff]  }
  0xcd   :  { %v2450_v7 = vld [vmem:[#allocation8 + $0x304] ss:$8 sps:$4 sm:$0xff]  }
  0xce   :  { %1010 = vmatmul.mubr.bf16.vlgmr.msra.gmra.mrb[4].mxu0 %v2764_v13  ;;  %1051 = vmatmul.mubr.bf16.vlgmr.msra.gmra.mrb[4].mxu1 %v2764_v13  ;;  %v2370_v13 = vld [vmem:[#allocation8 + $0x130] ss:$8 sps:$4 sm:$0xff]  }
  0xcf   :  { %1844 = vmatpush1.bf16.msra.mxu0 %v2349_v8  ;;  %1885 = vmatpush1.bf16.msra.mxu1 %v2352_v9  ;;  %v215_v8 = vlaneseq }
  0xd0   :  { %1845 = vmatprep.subr.bf16.mxu0 %v2357_v10  ;;  %1886 = vmatprep.subr.bf16.mxu1 %v2360_v11  ;;  %v2777_v11 = vld [vmem:[#allocation7] sm:$0xff] }
  0xd1   :  { %v2772_v9 = vshrl.u32 %v215_v8, 7  ;;  %v2496_v8 = vld [vmem:[#allocation8 + $0x380] ss:$8 sps:$4 sm:$0xff]  }
  0xd3   :  { %1846 = vmatpush1.bf16.msra.mxu0 %v2355_v12  ;;  %1887 = vmatpush1.bf16.msra.mxu1 %v2358_v14  ;;  %v2775_v10 = vsub.s32 0, %v2772_v9  ;;  %v225_v12 = vsub.s32 2, %v2772_v9  ;;  %v2781_v14 = vsub.s32 1, %v2772_v9 }
  0xd4   :  { %1847 = vmatprep.subr.bf16.mxu0 %v2363_v15  ;;  %1888 = vmatprep.subr.bf16.mxu1 %v2366_v16  ;;  %v229_v15 = vsub.s32 3, %v2772_v9 }
  0xd5   :  { %v218_v16 = vrot.slane %v2777_v11, %v2775_v10 }
  0xd7   :  { %1848 = vmatpush1.bf16.msra.mxu0 %v2361_v17  ;;  %1889 = vmatpush1.bf16.msra.mxu1 %v2364_v18  ;;  %v226_v17 = vrot.slane %v2777_v11, %v225_v12  ;;  %v222_v18 = vrot.slane %v2777_v11, %v2781_v14  ;;  %v2501_v12 = vld [vmem:[#allocation8 + $0x294] ss:$8 sps:$4 sm:$0xff]  }
  0xd8   :  { %1849 = vmatprep.subr.bf16.mxu0 %v2369_v19  ;;  %1890 = vmatprep.subr.bf16.mxu1 %v2372_v20  ;;  %v230_v19 = vrot.slane %v2777_v11, %v229_v15  ;;  %v2504_v15 = vld [vmem:[#allocation8 + $0x394] ss:$8 sps:$4 sm:$0xff]  }
  0xdb   :  { %1850 = vmatpush1.bf16.msra.mxu0 %v2367_v21  ;;  %1891 = vmatpush1.bf16.msra.mxu1 %v2370_v13 }
  0xdc   :  { %1851 = vmatprep.subr.bf16.mxu0 %v2375_v22  ;;  %1892 = vmatprep.subr.bf16.mxu1 %v2378_v23 }
  0xdf   :  { %1852 = vmatpush1.bf16.msra.mxu0 %v2373_v24  ;;  %1893 = vmatpush1.bf16.msra.mxu1 %v2376_v25 }
  0xe0   :  { %1853 = vmatprep.subr.bf16.mxu0 %v2381_v26  ;;  %1894 = vmatprep.subr.bf16.mxu1 %v2384_v27 }
  0xe3   :  { %1854 = vmatpush1.bf16.msra.mxu0 %v2379_v28  ;;  %1895 = vmatpush1.bf16.msra.mxu1 %v2382_v29 }
  0xe4   :  { %1855 = vmatprep.subr.bf16.mxu0 %v2387_v30  ;;  %1896 = vmatprep.subr.bf16.mxu1 %v2390_v31 }
  0xe7   :  { %1856 = vmatpush1.bf16.msra.mxu0 %v2385_v32  ;;  %1897 = vmatpush1.bf16.msra.mxu1 %v2388_v33 }
  0xe8   :  { %1857 = vmatprep.subr.bf16.mxu0 %v2393_v34  ;;  %1898 = vmatprep.subr.bf16.mxu1 %v2396_v35 }
  0xeb   :  { %1858 = vmatpush1.bf16.msra.mxu0 %v2391_v36  ;;  %1899 = vmatpush1.bf16.msra.mxu1 %v2394_v37 }
  0xec   :  { %1859 = vmatprep.subr.bf16.mxu0 %v2399_v38  ;;  %1900 = vmatprep.subr.bf16.mxu1 %v2402_v39  ;;  %v2445_v38 = vld [vmem:[#allocation8 + $0x200] ss:$8 sps:$4 sm:$0xff]  }
  0xef   :  { %1860 = vmatpush1.bf16.msra.mxu0 %v2397_v40  ;;  %1901 = vmatpush1.bf16.msra.mxu1 %v2400_v41  ;;  %v2448_v40 = vld [vmem:[#allocation8 + $0x300] ss:$8 sps:$4 sm:$0xff]   ;;  %v2453_v41 = vld [vmem:[#allocation8 + $0x214] ss:$8 sps:$4 sm:$0xff]  }
  0xf0   :  { %1861 = vmatprep.subr.bf16.mxu0 %v2405_v42  ;;  %1902 = vmatprep.subr.bf16.mxu1 %v2408_v57  ;;  %v2456_v42 = vld [vmem:[#allocation8 + $0x314] ss:$8 sps:$4 sm:$0xff]   ;;  %v2451_v57 = vld [vmem:[#allocation8 + $0x210] ss:$8 sps:$4 sm:$0xff]  }
  0xf3   :  { %1862 = vmatpush1.bf16.msra.mxu0 %v2403_v43  ;;  %1903 = vmatpush1.bf16.msra.mxu1 %v2406_v44  ;;  %v2454_v43 = vld [vmem:[#allocation8 + $0x310] ss:$8 sps:$4 sm:$0xff]   ;;  %v2459_v44 = vld [vmem:[#allocation8 + $0x224] ss:$8 sps:$4 sm:$0xff]  }
  0xf4   :  { %1863 = vmatprep.subr.bf16.mxu0 %v2411_v45  ;;  %1904 = vmatprep.subr.bf16.mxu1 %v2414_v46  ;;  %v2462_v45 = vld [vmem:[#allocation8 + $0x324] ss:$8 sps:$4 sm:$0xff]   ;;  %v2457_v46 = vld [vmem:[#allocation8 + $0x220] ss:$8 sps:$4 sm:$0xff]  }
  0xf7   :  { %1864 = vmatpush1.bf16.msra.mxu0 %v2409_v47  ;;  %1905 = vmatpush1.bf16.msra.mxu1 %v2412_v48  ;;  %v2460_v47 = vld [vmem:[#allocation8 + $0x320] ss:$8 sps:$4 sm:$0xff]   ;;  %v2465_v48 = vld [vmem:[#allocation8 + $0x234] ss:$8 sps:$4 sm:$0xff]  }
  0xf8   :  { %1865 = vmatprep.subr.bf16.mxu0 %v2417_v49  ;;  %1906 = vmatprep.subr.bf16.mxu1 %v2420_v50  ;;  %v2468_v49 = vld [vmem:[#allocation8 + $0x334] ss:$8 sps:$4 sm:$0xff]   ;;  %v2463_v50 = vld [vmem:[#allocation8 + $0x230] ss:$8 sps:$4 sm:$0xff]  }
  0xfb   :  { %1866 = vmatpush1.bf16.msra.mxu0 %v2415_v51  ;;  %1907 = vmatpush1.bf16.msra.mxu1 %v2418_v52  ;;  %v2466_v51 = vld [vmem:[#allocation8 + $0x330] ss:$8 sps:$4 sm:$0xff]   ;;  %v2471_v52 = vld [vmem:[#allocation8 + $0x244] ss:$8 sps:$4 sm:$0xff]  }
  0xfc   :  { %1867 = vmatprep.subr.bf16.mxu0 %v2423_v53  ;;  %1908 = vmatprep.subr.bf16.mxu1 %v2426_v54  ;;  %v2474_v53 = vld [vmem:[#allocation8 + $0x344] ss:$8 sps:$4 sm:$0xff]   ;;  %v2469_v54 = vld [vmem:[#allocation8 + $0x240] ss:$8 sps:$4 sm:$0xff]  }
  0xff   :  { %1868 = vmatpush1.bf16.msra.mxu0 %v2421_v55  ;;  %1909 = vmatpush1.bf16.msra.mxu1 %v2424_v56  ;;  %v2472_v55 = vld [vmem:[#allocation8 + $0x340] ss:$8 sps:$4 sm:$0xff]   ;;  %v2477_v56 = vld [vmem:[#allocation8 + $0x254] ss:$8 sps:$4 sm:$0xff]  }
 0x100   :  { %1869 = vmatprep.subr.bf16.mxu0 %v2429_v58  ;;  %1910 = vmatprep.subr.bf16.mxu1 %v2432_v59  ;;  %v2480_v58 = vld [vmem:[#allocation8 + $0x354] ss:$8 sps:$4 sm:$0xff]   ;;  %v2475_v59 = vld [vmem:[#allocation8 + $0x250] ss:$8 sps:$4 sm:$0xff]  }
 0x103   :  { %1870 = vmatpush1.bf16.msra.mxu0 %v2427_v60  ;;  %1911 = vmatpush1.bf16.msra.mxu1 %v2430_v61  ;;  %v2478_v60 = vld [vmem:[#allocation8 + $0x350] ss:$8 sps:$4 sm:$0xff]   ;;  %v2483_v61 = vld [vmem:[#allocation8 + $0x264] ss:$8 sps:$4 sm:$0xff]  }
 0x104   :  { %1871 = vmatprep.subr.bf16.mxu0 %v2435_v62  ;;  %1912 = vmatprep.subr.bf16.mxu1 %v2438_v63  ;;  %v2486_v62 = vld [vmem:[#allocation8 + $0x364] ss:$8 sps:$4 sm:$0xff]   ;;  %v2481_v63 = vld [vmem:[#allocation8 + $0x260] ss:$8 sps:$4 sm:$0xff]  }
 0x107   :  { %1872 = vmatpush1.bf16.msra.mxu0 %v2433_v0  ;;  %1913 = vmatpush1.bf16.msra.mxu1 %v2436_v1  ;;  %v2484_v0 = vld [vmem:[#allocation8 + $0x360] ss:$8 sps:$4 sm:$0xff]   ;;  %v2489_v1 = vld [vmem:[#allocation8 + $0x274] ss:$8 sps:$4 sm:$0xff]  }
 0x108   :  { %1873 = vmatprep.subr.bf16.mxu0 %v2441_v2  ;;  %1914 = vmatprep.subr.bf16.mxu1 %v2444_v3  ;;  %v2492_v2 = vld [vmem:[#allocation8 + $0x374] ss:$8 sps:$4 sm:$0xff]   ;;  %v2487_v3 = vld [vmem:[#allocation8 + $0x270] ss:$8 sps:$4 sm:$0xff]  }
 0x10b   :  { %1874 = vmatpush1.bf16.msra.mxu0 %v2439_v4  ;;  %1915 = vmatpush1.bf16.msra.mxu1 %v2442_v5  ;;  %v2490_v4 = vld [vmem:[#allocation8 + $0x370] ss:$8 sps:$4 sm:$0xff]   ;;  %v2495_v5 = vld [vmem:[#allocation8 + $0x284] ss:$8 sps:$4 sm:$0xff]  }
 0x10c   :  { %1925 = vmatprep.subr.bf16.mxu0 %v2447_v6  ;;  %1966 = vmatprep.subr.bf16.mxu1 %v2450_v7  ;;  %v2498_v6 = vld [vmem:[#allocation8 + $0x384] ss:$8 sps:$4 sm:$0xff]   ;;  %v2493_v7 = vld [vmem:[#allocation8 + $0x280] ss:$8 sps:$4 sm:$0xff]  }
 0x161   :  { %v929_v20 = vpop.f32.mrb[0].mxu0  ;;  %v970_v13 = vpop.f32.mrb[0].mxu1 }
 0x162   :  { %v930_v21 = vadd.f32 %v929_v20, %v218_v16  ;;  %v931_v22 = vpop.f32.mrb[1].mxu0  ;;  %v971_v23 = vadd.f32 %v970_v13, %v226_v17  ;;  %v972_v25 = vpop.f32.mrb[1].mxu1  ;;  %v2499_v16 = vld [vmem:[#allocation8 + $0x290] ss:$8 sps:$4 sm:$0xff]   ;;  %v2505_v20 = vld [vmem:[#allocation8 + $0x2a0] ss:$8 sps:$4 sm:$0xff]  }
 0x163   :  { %v932_v24 = vadd.f32 %v931_v22, %v222_v18  ;;  %v933_v26 = vpop.f32.mrb[2].mxu0  ;;  %v973_v28 = vadd.f32 %v972_v25, %v230_v19  ;;  %v974_v29 = vpop.f32.mrb[2].mxu1  ;;  %v2502_v17 = vld [vmem:[#allocation8 + $0x390] ss:$8 sps:$4 sm:$0xff]   ;;  %v2507_v18 = vld [vmem:[#allocation8 + $0x2a4] ss:$8 sps:$4 sm:$0xff]  }
 0x164   :  { %v1059_v27 = vmax.f32 %v930_v21, 0.0  ;;  %v934_v30 = vpop.f32.mrb[3].mxu0  ;;  %v1061_v31 = vmax.f32 %v971_v23, 0.0  ;;  %v975_v33 = vpop.f32.mrb[3].mxu1  ;;  %v2510_v19 = vld [vmem:[#allocation8 + $0x3a4] ss:$8 sps:$4 sm:$0xff]  }
 0x165   :  { %v1060_v32 = vmax.f32 %v932_v24, 0.0  ;;  %v1062_v35 = vmax.f32 %v973_v28, 0.0  ;;  %v2508_v21 = vld [vmem:[#allocation8 + $0x3a0] ss:$8 sps:$4 sm:$0xff]   ;;  %v2513_v13 = vld [vmem:[#allocation8 + $0x2b4] ss:$8 sps:$4 sm:$0xff]  }
 0x166   :  { %v1067_v34 = vpack.c.bf16 %v1059_v27, %v1059_v27  ;;  %v1069_v36 = vpack.c.bf16 %v1061_v31, %v1061_v31  ;;  %v2516_v22 = vld [vmem:[#allocation8 + $0x3b4] ss:$8 sps:$4 sm:$0xff]   ;;  %v2511_v23 = vld [vmem:[#allocation8 + $0x2b0] ss:$8 sps:$4 sm:$0xff]   ;;  %v2519_v25 = vld [vmem:[#allocation8 + $0x2c4] ss:$8 sps:$4 sm:$0xff]  }
 0x167   :  { %v1068_v37 = vpack.c.bf16 %v1060_v32, %v1060_v32  ;;  %v1070_v39 = vpack.c.bf16 %v1062_v35, %v1062_v35  ;;  %v2514_v24 = vld [vmem:[#allocation8 + $0x3b0] ss:$8 sps:$4 sm:$0xff]   ;;  %v2522_v26 = vld [vmem:[#allocation8 + $0x3c4] ss:$8 sps:$4 sm:$0xff]   ;;  %v2517_v27 = vld [vmem:[#allocation8 + $0x2c0] ss:$8 sps:$4 sm:$0xff]  }
 0x168   :  { %v2520_v28 = vld [vmem:[#allocation8 + $0x3c0] ss:$8 sps:$4 sm:$0xff]   ;;  %v2525_v29 = vld [vmem:[#allocation8 + $0x2d4] ss:$8 sps:$4 sm:$0xff]   ;;  %v233_v31 = vsub.s32 4, %v2772_v9  ;;  %v241_v33 = vsub.s32 6, %v2772_v9 }
 0x169   :  { %1875 = vmatprep.mubr.bf16.mxu0 %v1068_v37  ;;  %1916 = vmatprep.mubr.bf16.mxu1 %v1070_v39  ;;  %v2528_v30 = vld [vmem:[#allocation8 + $0x3d4] ss:$8 sps:$4 sm:$0xff]   ;;  %v2523_v32 = vld [vmem:[#allocation8 + $0x2d0] ss:$8 sps:$4 sm:$0xff]   ;;  %v2531_v37 = vld [vmem:[#allocation8 + $0x2e4] ss:$8 sps:$4 sm:$0xff]  }
 0x16a   :  { %1876 = vmatmul.mubr.bf16.vlgmr.msra.gmra.mrb[8].mxu0 %v1067_v34  ;;  %1917 = vmatmul.mubr.bf16.vlgmr.msra.gmra.mrb[8].mxu1 %v1069_v36  ;;  %v237_v34 = vsub.s32 5, %v2772_v9  ;;  %v2526_v35 = vld [vmem:[#allocation8 + $0x3d0] ss:$8 sps:$4 sm:$0xff]   ;;  %v245_v36 = vsub.s32 7, %v2772_v9  ;;  %v234_v39 = vrot.slane %v2777_v11, %v233_v31  ;;  %v2540_v9 = vld [vmem:[#allocation8 + $0x3f4] ss:$8 sps:$4 sm:$0xff]  }
 0x16b   :  { %1926 = vmatpush1.bf16.msra.mxu0 %v2445_v38  ;;  %1967 = vmatpush1.bf16.msra.mxu1 %v2448_v40  ;;  %v2534_v38 = vld [vmem:[#allocation8 + $0x3e4] ss:$8 sps:$4 sm:$0xff]   ;;  %v242_v40 = vrot.slane %v2777_v11, %v241_v33 }
 0x16c   :  { %1927 = vmatprep.subr.bf16.mxu0 %v2453_v41  ;;  %1968 = vmatprep.subr.bf16.mxu1 %v2456_v42  ;;  %v238_v41 = vrot.slane %v2777_v11, %v237_v34  ;;  %v2529_v42 = vld [vmem:[#allocation8 + $0x2e0] ss:$8 sps:$4 sm:$0xff]   ;;  %v2544_v34 = vld [vmem:[#allocation2 + $0x8] sm:$0xff] }
 0x16f   :  { %1928 = vmatpush1.bf16.msra.mxu0 %v2451_v57  ;;  %1969 = vmatpush1.bf16.msra.mxu1 %v2454_v43  ;;  %v246_v57 = vrot.slane %v2777_v11, %v245_v36  ;;  %v2532_v43 = vld [vmem:[#allocation8 + $0x3e0] ss:$8 sps:$4 sm:$0xff]  }
 0x170   :  { %1929 = vmatprep.subr.bf16.mxu0 %v2459_v44  ;;  %1970 = vmatprep.subr.bf16.mxu1 %v2462_v45  ;;  %v2537_v44 = vld [vmem:[#allocation8 + $0x2f4] ss:$8 sps:$4 sm:$0xff]  }
 0x173   :  { %1930 = vmatpush1.bf16.msra.mxu0 %v2457_v46  ;;  %1971 = vmatpush1.bf16.msra.mxu1 %v2460_v47 }
 0x174   :  { %1931 = vmatprep.subr.bf16.mxu0 %v2465_v48  ;;  %1972 = vmatprep.subr.bf16.mxu1 %v2468_v49 }
 0x177   :  { %1932 = vmatpush1.bf16.msra.mxu0 %v2463_v50  ;;  %1973 = vmatpush1.bf16.msra.mxu1 %v2466_v51 }
 0x178   :  { %1933 = vmatprep.subr.bf16.mxu0 %v2471_v52  ;;  %1974 = vmatprep.subr.bf16.mxu1 %v2474_v53  ;;  %v2535_v53 = vld [vmem:[#allocation8 + $0x2f0] ss:$8 sps:$4 sm:$0xff]  }
 0x17b   :  { %1934 = vmatpush1.bf16.msra.mxu0 %v2469_v54  ;;  %1975 = vmatpush1.bf16.msra.mxu1 %v2472_v55 }
 0x17c   :  { %1935 = vmatprep.subr.bf16.mxu0 %v2477_v56  ;;  %1976 = vmatprep.subr.bf16.mxu1 %v2480_v58  ;;  %v2538_v58 = vld [vmem:[#allocation8 + $0x3f0] ss:$8 sps:$4 sm:$0xff]  }
 0x17f   :  { %1936 = vmatpush1.bf16.msra.mxu0 %v2475_v59  ;;  %1977 = vmatpush1.bf16.msra.mxu1 %v2478_v60 }
 0x180   :  { %1937 = vmatprep.subr.bf16.mxu0 %v2483_v61  ;;  %1978 = vmatprep.subr.bf16.mxu1 %v2486_v62 }
 0x183   :  { %1938 = vmatpush1.bf16.msra.mxu0 %v2481_v63  ;;  %1979 = vmatpush1.bf16.msra.mxu1 %v2484_v0 }
 0x184   :  { %1939 = vmatprep.subr.bf16.mxu0 %v2489_v1  ;;  %1980 = vmatprep.subr.bf16.mxu1 %v2492_v2 }
 0x187   :  { %1940 = vmatpush1.bf16.msra.mxu0 %v2487_v3  ;;  %1981 = vmatpush1.bf16.msra.mxu1 %v2490_v4 }
 0x188   :  { %1941 = vmatprep.subr.bf16.mxu0 %v2495_v5  ;;  %1982 = vmatprep.subr.bf16.mxu1 %v2498_v6 }
 0x18b   :  { %1942 = vmatpush1.bf16.msra.mxu0 %v2493_v7  ;;  %1983 = vmatpush1.bf16.msra.mxu1 %v2496_v8 }
 0x18c   :  { %1943 = vmatprep.subr.bf16.mxu0 %v2501_v12  ;;  %1984 = vmatprep.subr.bf16.mxu1 %v2504_v15 }
 0x18f   :  { %1944 = vmatpush1.bf16.msra.mxu0 %v2499_v16  ;;  %1985 = vmatpush1.bf16.msra.mxu1 %v2502_v17 }
 0x190   :  { %1945 = vmatprep.subr.bf16.mxu0 %v2507_v18  ;;  %1986 = vmatprep.subr.bf16.mxu1 %v2510_v19  ;;  %v82_v19 = vld [vmem:[%s2829_s4] sm:$0x3] }
 0x191   :  { %v2017_v31 = vrot.slane %v82_v19, %v2781_v14 }
 0x193   :  { %1946 = vmatpush1.bf16.msra.mxu0 %v2505_v20  ;;  %1987 = vmatpush1.bf16.msra.mxu1 %v2508_v21 }
 0x194   :  { %1947 = vmatprep.subr.bf16.mxu0 %v2513_v13  ;;  %1988 = vmatprep.subr.bf16.mxu1 %v2516_v22 }
 0x197   :  { %1948 = vmatpush1.bf16.msra.mxu0 %v2511_v23  ;;  %1989 = vmatpush1.bf16.msra.mxu1 %v2514_v24 }
 0x198   :  { %1949 = vmatprep.subr.bf16.mxu0 %v2519_v25  ;;  %1990 = vmatprep.subr.bf16.mxu1 %v2522_v26 }
 0x19b   :  { %1950 = vmatpush1.bf16.msra.mxu0 %v2517_v27  ;;  %1991 = vmatpush1.bf16.msra.mxu1 %v2520_v28  ;;  %v2013_v28 = vrot.slane %v82_v19, %v2775_v10 }
 0x19c   :  { %1951 = vmatprep.subr.bf16.mxu0 %v2525_v29  ;;  %1992 = vmatprep.subr.bf16.mxu1 %v2528_v30 }
 0x19f   :  { %1952 = vmatpush1.bf16.msra.mxu0 %v2523_v32  ;;  %1993 = vmatpush1.bf16.msra.mxu1 %v2526_v35  ;;  %v2543_v32 = vld [vmem:[#allocation2] sm:$0xff] }
 0x1a0   :  { %1953 = vmatprep.subr.bf16.mxu0 %v2531_v37  ;;  %1994 = vmatprep.subr.bf16.mxu1 %v2534_v38 }
 0x1a1   :  { %v1011_v45 = vpop.f32.mrb[4].mxu0  ;;  %v1052_v47 = vpop.f32.mrb[4].mxu1 }
 0x1a2   :  { %v1012_v46 = vadd.f32 %v1011_v45, %v234_v39  ;;  %v1013_v48 = vpop.f32.mrb[5].mxu0  ;;  %v1053_v49 = vadd.f32 %v1052_v47, %v242_v40  ;;  %v1054_v51 = vpop.f32.mrb[5].mxu1  ;;  %v80_v47 = vld [vmem:[%s2830_s5] sm:$0x3]  ;;  %s2633_s5 = scalar_lea.vmem %s2074_s8, 256 }
 0x1a3   :  { %v1014_v50 = vadd.f32 %v1013_v48, %v238_v41  ;;  %v1015_v52 = vpop.f32.mrb[6].mxu0  ;;  %1954 = vmatpush1.bf16.msra.mxu0 %v2529_v42  ;;  %v1055_v55 = vadd.f32 %v1054_v51, %v246_v57  ;;  %v1056_v56 = vpop.f32.mrb[6].mxu1  ;;  %1995 = vmatpush1.bf16.msra.mxu1 %v2532_v43  ;;  %v81_v48 = vld [vmem:[%s2831_s6] sm:$0x3]  ;;  %p2634_p4 = scmp.ne.s32.totalorder %s2074_s8, %s2633_s5  ;;  %p2639_p6 = scmp.lt.s32.totalorder %s2633_s5, %s2633_s5 }
 0x1a4   :  { %v1063_v54 = vmax.f32 %v1012_v46, 0.0  ;;  %v1016_v11 = vpop.f32.mrb[7].mxu0  ;;  %1955 = vmatprep.subr.bf16.mxu0 %v2537_v44  ;;  %v1065_v59 = vmax.f32 %v1053_v49, 0.0  ;;  %v1057_v61 = vpop.f32.mrb[7].mxu1  ;;  %1996 = vmatprep.subr.bf16.mxu1 %v2540_v9  ;;  %v2043_v49 = vrot.slane %v80_v47, %v2775_v10 }
 0x1a5   :  { %v1064_v60 = vmax.f32 %v1014_v50, 0.0  ;;  %v1066_v62 = vmax.f32 %v1055_v55, 0.0  ;;  %v2047_v50 = vrot.slane %v80_v47, %v2781_v14  ;;  %v2060_v55 = vrot.slane %v81_v48, %v2781_v14  ;;  %p2640_p7 = por %p2639_p6, %p2638_p5 }
 0x1a6   :  { %v1073_v63 = vpack.c.bf16 %v1065_v59, %v1065_v59  ;;  %v1071_v1 = vpack.c.bf16 %v1063_v54, %v1063_v54  ;;  %v2056_v54 = vrot.slane %v81_v48, %v2775_v10 }
 0x1a7   :  { %v1072_v0 = vpack.c.bf16 %v1064_v60, %v1064_v60  ;;  %1956 = vmatpush1.bf16.msra.mxu0 %v2535_v53  ;;  %v1074_v2 = vpack.c.bf16 %v1066_v62, %v1066_v62  ;;  %1997 = vmatpush1.bf16.msra.mxu1 %v2538_v58  ;;  %p2641_p8 = pnand %p2640_p7, %p2634_p4 }
 0x1a9   :  { %1957 = vmatprep.mubr.bf16.mxu0 %v1072_v0  ;;  %1998 = vmatprep.mubr.bf16.mxu1 %v1074_v2 }
 0x1aa   :  { %1958 = vmatmul.mubr.bf16.vlgmr.msra.gmra.mrb[12].mxu0 %v1071_v1  ;;  %1999 = vmatmul.mubr.bf16.vlgmr.msra.gmra.mrb[12].mxu1 %v1073_v63 }
 0x23d   :  { %v1877_v3 = vpop.f32.mrb[8].mxu0  ;;  %v1918_v4 = vpop.f32.mrb[8].mxu1 }
 0x23e   :  { %v1879_v5 = vpop.f32.mrb[9].mxu0  ;;  %v1919_v6 = vadd.f32 %v1918_v4, %v1877_v3  ;;  %v1920_v7 = vpop.f32.mrb[9].mxu1 }
 0x23f   :  { %v1881_v8 = vpop.f32.mrb[10].mxu0  ;;  %v1921_v12 = vadd.f32 %v1920_v7, %v1879_v5  ;;  %v1922_v15 = vpop.f32.mrb[10].mxu1 }
 0x240   :  { %v1882_v16 = vpop.f32.mrb[11].mxu0  ;;  %v1923_v17 = vpop.f32.mrb[11].mxu1 }
 0x27d   :  { %v1959_v18 = vpop.f32.mrb[12].mxu0  ;;  %v2000_v21 = vpop.f32.mrb[12].mxu1 }
 0x27e   :  { %v1960_v20 = vadd.f32 %v1959_v18, %v1919_v6  ;;  %v1961_v13 = vpop.f32.mrb[13].mxu0  ;;  %v2002_v23 = vpop.f32.mrb[13].mxu1 }
 0x27f   :  { %v1962_v22 = vadd.f32 %v1961_v13, %v1921_v12  ;;  %v1963_v24 = vpop.f32.mrb[14].mxu0  ;;  %v2004_v26 = vpop.f32.mrb[14].mxu1 }
 0x280   :  { %v2001_v25 = vadd.f32 %v2000_v21, %v1960_v20  ;;  %v1964_v27 = vpop.f32.mrb[15].mxu0  ;;  %v2005_v30 = vpop.f32.mrb[15].mxu1 }
 0x281   :  { %v2003_v29 = vadd.f32 %v2002_v23, %v1962_v22 }
 0x282   :  { %v2007_v33 = vadd.f32 %v2543_v32, %v2001_v25 }
 0x283   :  { %v2008_v35 = vadd.f32 %v2544_v34, %v2003_v29 }
 0x284   :  { %v2020_v36 = vadd.f32 %v2013_v28, %v2007_v33 }
 0x285   :  { %v2021_v37 = vadd.f32 %v2017_v31, %v2008_v35 }
 0x287   :  { %v2022_v38 = vadd.f32 %v2021_v37, %v2020_v36 }
 0x289   :  { %2023 = vadd.xlane.f32.xlu0 %v2022_v38 }
 0x316   :  { %v2024_v39 = vpop.xlane.xlu0 %2023 }
 0x317   :  { %v2026_v40 = vmul.f32 0.00390625, %v2024_v39 }
 0x319   :  { %v2027_v41 = vsub.f32 %v2020_v36, %v2026_v40  ;;  %v2028_v42 = vsub.f32 %v2021_v37, %v2026_v40 }
 0x31b   :  { %v2029_v57 = vmul.f32 %v2027_v41, %v2027_v41  ;;  %v2030_v43 = vmul.f32 %v2028_v42, %v2028_v42 }
 0x31d   :  { %v2031_v44 = vadd.f32 %v2030_v43, %v2029_v57 }
 0x31f   :  { %2032 = vadd.xlane.f32.xlu0 %v2031_v44 }
 0x3ac   :  { %v2033_v45 = vpop.xlane.xlu0 %2032 }
 0x3ad   :  { %v2034_v9 = vmul.f32 0.00390625, %v2033_v45 }
 0x3af   :  { %v2035_v46 = vadd.f32 1e-05, %v2034_v9 }
 0x3b1   :  { %2541 = vrsqrt.f32 %v2035_v46 }
 0x3bb   :  { %v2542_v51 = vpop.eup %2541 }
 0x3bc   :  { %v2037_v52 = vmul.f32 %v2542_v51, %v2027_v41  ;;  %v2038_v53 = vmul.f32 %v2542_v51, %v2028_v42 }
 0x3be   :  { %v2050_v56 = vmul.f32 %v2043_v49, %v2037_v52  ;;  %v2051_v11 = vmul.f32 %v2047_v50, %v2038_v53 }
 0x3c0   :  { %v2063_v58 = vadd.f32 %v2056_v54, %v2050_v56  ;;  %v2064_v59 = vadd.f32 %v2060_v55, %v2051_v11 }
 0x3c2   :  { %2065 = vst [vmem:[#allocation10] sm:$0xff] %v2063_v58  ;;  %2066 = vst [vmem:[#allocation10 + $0x8] sm:$0xff] %v2064_v59 }
 0x3c3   :  { %2644 = shalt.err (!%p2641_p8)
}
 0x3c4   :  { %s2645_s10 = scalar_lea.hbm %s2832_s7, 256 }
 0x3c5   :  { %p2646_p9 = scmp.ne.s32.totalorder %s2832_s7, %s2645_s10  ;;  %p2649_p10 = scmp.lt.u32.totalorder %s2645_s10, %s2832_s7 }
 0x3c7   :  { %p2651_p11 = pnand %p2649_p10, %p2646_p9 }
 0x3c9   :  { %2654 = shalt.err (!%p2651_p11)
}
 0x3ca   :  { %2076 = dma.vmem_to_hbm [thread:$0]  %s2074_s8, 256, %s2832_s7, [#allocation4]  }
 0x3cb   :  { %2661 = dma.done.wait [#allocation4], 256  }
 0x3cc   :  { %2662 = vsyncadd [#allocation4], 4294967040 }
 0x3cd   :  { %2080 = vsyncpa [#allocation3], 1 }
 0x3ce   :  { %2081 = vsyncpa [#allocation6], 1 }
 0x3cf   :  { %2082 = vsyncpa [#allocation9], 1 }
 0x3d0   :  { %2083 = vsyncpa [#allocation4], 1 }

</bundles_post_ra>
